<compile_context>
chip_gen: v7x
topology: tpu7x:2x2x1
jax: 0.10.0
libtpu: 0.0.40
codegen_flags: <defaults>
</compile_context>

<pallas_src>
import functools
import math

import numpy as np
import jax
import jax.numpy as jnp
from jax.experimental import pallas as pl
from jax.experimental.pallas import tpu as pltpu

# ------------------------------ hyper-parameters ------------------------------
BATCH = 2
SEQ = 16                  # maxlen of the sequences fed to forward()
D_INP = 4                 # d_inp
D_MODEL = 32              # d_model (even, divisible by nhead)
NHEAD = 2
HEAD_DIM = D_MODEL // NHEAD
NHID = 64                 # transformer FFN hidden dim
NLAYERS = 2
D_STATIC = 3
N_CLASSES = 2
PE_MAX_LEN = 500.0        # PositionalEncodingTF(max_len) timescale base
LN_EPS = 1e-5

TOKENS = SEQ + 1                            # sequence tokens + static-embedding token
T_PAD = ((TOKENS + 7) // 8) * 8             # 24: sublane-aligned token count
D_AUG = 8                                   # d_inp(4) + d_static(3) padded to 8

_VMEM = pl.BlockSpec(memory_space=pltpu.MemorySpace.VMEM)


# -------------------------------- fused kernel --------------------------------
def _transformer_kernel(x_in_ref, pe_ref, kbias_ref, pool_ref,
                        w_aug_ref, w_qkv_ref, w_o_ref, w_f1_ref, w_f2_ref,
                        v_blob_ref, head_w_ref, head_b_ref, out_ref,
                        *, nlayers, nhead, eps):
    n_batch, t_pad, d_aug = x_in_ref.shape
    d_model = w_aug_ref.shape[1]
    nhid = w_f1_ref.shape[2]
    head_dim = d_model // nhead
    bt = n_batch * t_pad
    inv_sqrt_hd = jnp.float32(1.0 / math.sqrt(head_dim))

    def layer_norm(y, g, b):
        mu = jnp.mean(y, axis=-1, keepdims=True)
        var = jnp.mean(jnp.square(y - mu), axis=-1, keepdims=True)
        return (y - mu) * jax.lax.rsqrt(var + eps) * g + b

    # Fused encoder / static-emb projection + (PE / bias) add, batch folded into rows.
    x = jnp.dot(x_in_ref[...].reshape(bt, d_aug), w_aug_ref[...],
                preferred_element_type=jnp.float32)
    x = x + pe_ref[...].reshape(bt, d_model)                         # (B*T, dm)

    key_bias = kbias_ref[...]                                        # (B, 1, T)

    for l in range(nlayers):
        # per-layer bias / LayerNorm vectors, one packed (8, 3*dm) slab
        V = v_blob_ref[l]
        b_qkv = V[0:1, :]
        b_o = V[1:2, :d_model]
        ln1_g = V[2:3, :d_model]
        ln1_b = V[3:4, :d_model]
        b_f1 = V[4:5, :nhid]
        b_f2 = V[5:6, :d_model]
        ln2_g = V[6:7, :d_model]
        ln2_b = V[7:8, :d_model]

        # ---- multi-head self-attention: one fused QKV matmul for all heads/batches ----
        qkv = jnp.dot(x, w_qkv_ref[l], preferred_element_type=jnp.float32) + b_qkv
        qkv = qkv.reshape(n_batch, t_pad, 3 * d_model)

        heads = []
        for hh in range(nhead):
            q = qkv[:, :, hh * head_dim:(hh + 1) * head_dim]
            k = qkv[:, :, d_model + hh * head_dim:d_model + (hh + 1) * head_dim]
            v = qkv[:, :, 2 * d_model + hh * head_dim:2 * d_model + (hh + 1) * head_dim]
            s = jnp.einsum('bqd,bkd->bqk', q, k,
                           preferred_element_type=jnp.float32) * inv_sqrt_hd
            s = s + key_bias                                          # key-padding mask
            s = s - jnp.max(s, axis=-1, keepdims=True)
            p = jnp.exp(s)
            p = p * pl.reciprocal(jnp.sum(p, axis=-1, keepdims=True), approx=True)
            heads.append(jnp.einsum('bqk,bkd->bqd', p, v,
                                    preferred_element_type=jnp.float32))
        attn = jnp.concatenate(heads, axis=-1).reshape(bt, d_model)   # (B*T, dm)
        attn = jnp.dot(attn, w_o_ref[l], preferred_element_type=jnp.float32) + b_o
        x = layer_norm(x + attn, ln1_g, ln1_b)                        # post-norm

        # ---- feed-forward (ReLU), post-norm ----
        f = jnp.dot(x, w_f1_ref[l], preferred_element_type=jnp.float32) + b_f1
        f = jnp.maximum(f, 0.0)
        f = jnp.dot(f, w_f2_ref[l], preferred_element_type=jnp.float32) + b_f2
        x = layer_norm(x + f, ln2_g, ln2_b)

    # masked-mean pooling on VPU/XLU (sum over valid tokens / (lengths + 1))
    pooled = jnp.sum(x.reshape(n_batch, t_pad, d_model) * pool_ref[...], axis=1)  # (B, dm)

    # classification head: Linear -> ReLU -> Linear (w_m2 zero-padded to dm lanes)
    z = jnp.dot(pooled, head_w_ref[0], preferred_element_type=jnp.float32) + head_b_ref[0]
    z = jnp.maximum(z, 0.0)
    logits = jnp.dot(z, head_w_ref[1], preferred_element_type=jnp.float32) + head_b_ref[1]
    out_ref[...] = logits[:, :out_ref.shape[1]]


# --------------------------------- parameters ---------------------------------
def init_params(key):
    def nrm(k, shape, scale=0.1):
        return scale * jax.random.normal(k, shape, dtype=jnp.float32)

    keys = iter(jax.random.split(key, 32))
    nxt = lambda: next(keys)

    p = {}
    p["w_enc"] = nrm(nxt(), (D_INP, D_MODEL))
    p["b_enc"] = nrm(nxt(), (1, D_MODEL))
    p["w_emb"] = nrm(nxt(), (D_STATIC, D_MODEL))
    p["b_emb"] = nrm(nxt(), (1, D_MODEL))
    p["w_qkv"] = nrm(nxt(), (NLAYERS, D_MODEL, 3 * D_MODEL))     # [Q | K | V] lanes
    p["b_qkv"] = nrm(nxt(), (NLAYERS, 1, 3 * D_MODEL))
    p["w_o"] = nrm(nxt(), (NLAYERS, D_MODEL, D_MODEL))
    p["b_o"] = nrm(nxt(), (NLAYERS, 1, D_MODEL))
    p["ln1_g"] = jnp.ones((NLAYERS, 1, D_MODEL), jnp.float32)
    p["ln1_b"] = jnp.zeros((NLAYERS, 1, D_MODEL), jnp.float32)
    p["w_f1"] = nrm(nxt(), (NLAYERS, D_MODEL, NHID))
    p["b_f1"] = nrm(nxt(), (NLAYERS, 1, NHID))
    p["w_f2"] = nrm(nxt(), (NLAYERS, NHID, D_MODEL))
    p["b_f2"] = nrm(nxt(), (NLAYERS, 1, D_MODEL))
    p["ln2_g"] = jnp.ones((NLAYERS, 1, D_MODEL), jnp.float32)
    p["ln2_b"] = jnp.zeros((NLAYERS, 1, D_MODEL), jnp.float32)
    p["w_m1"] = nrm(nxt(), (D_MODEL, D_MODEL))
    p["b_m1"] = nrm(nxt(), (1, D_MODEL))
    p["w_m2"] = nrm(nxt(), (D_MODEL, N_CLASSES))
    p["b_m2"] = nrm(nxt(), (1, N_CLASSES))
    return p


def pack_params(p):
    """Pack the natural parameters into the handful of buffers the kernel consumes."""
    sqrt_dm = math.sqrt(D_MODEL)

    # fused input projection: rows 0:4 = encoder * sqrt(d_model), rows 4:7 = static emb
    w_aug = jnp.zeros((D_AUG, D_MODEL), jnp.float32)
    w_aug = w_aug.at[:D_INP, :].set(p["w_enc"] * sqrt_dm)
    w_aug = w_aug.at[D_INP:D_INP + D_STATIC, :].set(p["w_emb"])

    # all per-layer bias / LayerNorm vectors in one (L, 8, 3*dm) blob (row order fixed)
    def row(v, width):
        out = jnp.zeros((NLAYERS, 1, 3 * D_MODEL), jnp.float32)
        return out.at[:, :, :width].set(v)
    v_blob = jnp.concatenate([
        p["b_qkv"],
        row(p["b_o"], D_MODEL), row(p["ln1_g"], D_MODEL), row(p["ln1_b"], D_MODEL),
        row(p["b_f1"], NHID),
        row(p["b_f2"], D_MODEL), row(p["ln2_g"], D_MODEL), row(p["ln2_b"], D_MODEL),
    ], axis=1)                                                        # (L, 8, 96)

    # classifier head: stack the two Linear layers (w_m2 / b_m2 zero-padded to dm lanes)
    w_m2p = jnp.zeros((D_MODEL, D_MODEL), jnp.float32).at[:, :N_CLASSES].set(p["w_m2"])
    b_m2p = jnp.zeros((1, D_MODEL), jnp.float32).at[:, :N_CLASSES].set(p["b_m2"])
    head_w = jnp.stack([p["w_m1"], w_m2p], axis=0)                    # (2, dm, dm)
    head_b = jnp.stack([p["b_m1"], b_m2p], axis=0)                    # (2, 1, dm)

    return {
        "w_aug": w_aug, "w_qkv": p["w_qkv"], "w_o": p["w_o"],
        "w_f1": p["w_f1"], "w_f2": p["w_f2"], "v_blob": v_blob,
        "head_w": head_w, "head_b": head_b,
        # used by the wrapper prelude when building the per-token additive bias
        "b_enc_s": p["b_enc"] * sqrt_dm, "b_emb": p["b_emb"],
    }


# ----------------------------------- forward -----------------------------------
@jax.jit
def transformer_forward(kp, src, static, times, lengths):
    """src:(S,B,d_inp), static:(B,d_static), times:(S,B), lengths:(B,) -> (B,n_classes)."""
    seq, n_batch, _ = src.shape

    # PositionalEncodingTF: sin/cos(times / timescales) — tiny fused XLA prelude.
    num_ts = D_MODEL // 2
    timescales = jnp.asarray(PE_MAX_LEN ** np.linspace(0.0, 1.0, num_ts), jnp.float32)
    scaled = times.astype(jnp.float32)[:, :, None] / timescales[None, None, :]
    pe = jnp.concatenate([jnp.sin(scaled), jnp.cos(scaled)], axis=-1)     # (S, B, dm)
    pe_b = jnp.transpose(pe, (1, 0, 2))                                   # (B, S, dm)

    # padded, batch-major augmented token features: [src | static] (static token at row SEQ)
    src_b = jnp.transpose(src.astype(jnp.float32), (1, 0, 2))             # (B, S, d_inp)
    x_in = jnp.zeros((n_batch, T_PAD, D_AUG), jnp.float32)
    x_in = x_in.at[:, :seq, :D_INP].set(src_b)
    x_in = x_in.at[:, seq, D_INP:D_INP + D_STATIC].set(static.astype(jnp.float32))

    # per-token additive bias: b_enc*sqrt(dm)+PE for sequence tokens, b_emb for static token
    pe_bias = jnp.zeros((n_batch, T_PAD, D_MODEL), jnp.float32)
    pe_bias = pe_bias.at[:, :seq, :].set(pe_b + kp["b_enc_s"])
    pe_bias = pe_bias.at[:, seq, :].set(jnp.broadcast_to(kp["b_emb"], (n_batch, D_MODEL)))

    # key-padding bias (B,1,T) and masked-mean pooling weights (B,T,1), built once
    lengths_f = lengths.astype(jnp.float32)
    tok = jnp.arange(T_PAD, dtype=jnp.float32)
    valid = jnp.logical_or(tok[None, :] < lengths_f[:, None],
                           tok[None, :] == float(seq)).astype(jnp.float32)   # (B, T)
    key_bias = ((1.0 - valid) * jnp.float32(-1e30))[:, None, :]              # (B, 1, T)
    pool_scale = (valid / (lengths_f[:, None] + 1.0))[:, :, None]            # (B, T, 1)

    kernel = functools.partial(_transformer_kernel,
                               nlayers=NLAYERS, nhead=NHEAD, eps=LN_EPS)
    cost = pl.CostEstimate(flops=2_000_000, transcendentals=5_000, bytes_accessed=120_000)
    return pl.pallas_call(
        kernel,
        out_shape=jax.ShapeDtypeStruct((n_batch, N_CLASSES), jnp.float32),
        in_specs=[_VMEM] * 12,
        out_specs=_VMEM,
        cost_estimate=cost,
    )(x_in, pe_bias, key_bias, pool_scale,
      kp["w_aug"], kp["w_qkv"], kp["w_o"], kp["w_f1"], kp["w_f2"],
      kp["v_blob"], kp["head_w"], kp["head_b"])


# ------------------------------------- main -------------------------------------
if __name__ == "__main__":
    root = jax.random.PRNGKey(0)
    k_par, k_src, k_stat, k_t = jax.random.split(root, 4)
    params = init_params(k_par)
    kparams = pack_params(params)

    src = jax.random.normal(k_src, (SEQ, BATCH, D_INP), dtype=jnp.float32)
    static = jax.random.normal(k_stat, (BATCH, D_STATIC), dtype=jnp.float32)
    times = jnp.cumsum(jax.random.uniform(k_t, (SEQ, BATCH), minval=0.5, maxval=1.5), axis=0)
    lengths = jnp.array([SEQ, SEQ - 5], dtype=jnp.int32)   # second sequence has padded tail

    out = transformer_forward(kparams, src, static, times, lengths)
    out = jax.block_until_ready(out)
    assert out.shape == (BATCH, N_CLASSES), out.shape
    assert bool(jnp.all(jnp.isfinite(out))), "non-finite output"
    print("KERNEL_OK")
</pallas_src>

<mosaic_0001>
module attributes {stable_mosaic.version = 11 : i64} {
  func.func @_transformer_kernel(%arg0: memref<2x24x8xf32, #tpu.memory_space<vmem>>, %arg1: memref<2x24x32xf32, #tpu.memory_space<vmem>>, %arg2: memref<2x1x24xf32, #tpu.memory_space<vmem>>, %arg3: memref<2x24x1xf32, #tpu.memory_space<vmem>>, %arg4: memref<8x32xf32, #tpu.memory_space<vmem>>, %arg5: memref<2x32x96xf32, #tpu.memory_space<vmem>>, %arg6: memref<2x32x32xf32, #tpu.memory_space<vmem>>, %arg7: memref<2x32x64xf32, #tpu.memory_space<vmem>>, %arg8: memref<2x64x32xf32, #tpu.memory_space<vmem>>, %arg9: memref<2x8x96xf32, #tpu.memory_space<vmem>>, %arg10: memref<2x32x32xf32, #tpu.memory_space<vmem>>, %arg11: memref<2x1x32xf32, #tpu.memory_space<vmem>>, %arg12: memref<2x2xf32, #tpu.memory_space<vmem>>) attributes {dimension_semantics = [], scalar_prefetch = 0 : i64, scratch_operands = 0 : i64, tpu.core_type = #tpu.core_type<tc>} {
    %c0 = arith.constant 0 : index
    %c0_0 = arith.constant 0 : index
    %c0_1 = arith.constant 0 : index
    %0 = vector.load %arg0[%c0, %c0_0, %c0_1] : memref<2x24x8xf32, #tpu.memory_space<vmem>>, vector<2x24x8xf32>
    %1 = vector.shape_cast %0 : vector<2x24x8xf32> to vector<48x8xf32>
    %c0_2 = arith.constant 0 : index
    %c0_3 = arith.constant 0 : index
    %2 = vector.load %arg4[%c0_2, %c0_3] : memref<8x32xf32, #tpu.memory_space<vmem>>, vector<8x32xf32>
    %cst = arith.constant dense<0.000000e+00> : vector<48x32xf32>
    %3 = tpu.matmul %1, %2, %cst {dimension_numbers = #tpu.dot_dimension_numbers<[1], [0], [0], [1], [0, 0, 1, 1], [], []>} : vector<48x8xf32>, vector<8x32xf32>, vector<48x32xf32> -> vector<48x32xf32>
    %c0_4 = arith.constant 0 : index
    %c0_5 = arith.constant 0 : index
    %c0_6 = arith.constant 0 : index
    %4 = vector.load %arg1[%c0_4, %c0_5, %c0_6] : memref<2x24x32xf32, #tpu.memory_space<vmem>>, vector<2x24x32xf32>
    %5 = vector.shape_cast %4 : vector<2x24x32xf32> to vector<48x32xf32>
    %6 = arith.addf %3, %5 : vector<48x32xf32>
    %c0_7 = arith.constant 0 : index
    %c0_8 = arith.constant 0 : index
    %c0_9 = arith.constant 0 : index
    %7 = vector.load %arg2[%c0_7, %c0_8, %c0_9] : memref<2x1x24xf32, #tpu.memory_space<vmem>>, vector<2x1x24xf32>
    %c0_10 = arith.constant 0 : index
    %c0_11 = arith.constant 0 : index
    %c0_12 = arith.constant 0 : index
    %8 = vector.load %arg9[%c0_10, %c0_11, %c0_12] : memref<2x8x96xf32, #tpu.memory_space<vmem>>, vector<1x8x96xf32>
    %9 = vector.shape_cast %8 : vector<1x8x96xf32> to vector<8x96xf32>
    %10 = vector.extract_strided_slice %9 {offsets = [0, 0], sizes = [1, 96], strides = [1, 1]} : vector<8x96xf32> to vector<1x96xf32>
    %11 = vector.extract_strided_slice %9 {offsets = [1, 0], sizes = [1, 32], strides = [1, 1]} : vector<8x96xf32> to vector<1x32xf32>
    %12 = vector.extract_strided_slice %9 {offsets = [2, 0], sizes = [1, 32], strides = [1, 1]} : vector<8x96xf32> to vector<1x32xf32>
    %13 = vector.extract_strided_slice %9 {offsets = [3, 0], sizes = [1, 32], strides = [1, 1]} : vector<8x96xf32> to vector<1x32xf32>
    %14 = vector.extract_strided_slice %9 {offsets = [4, 0], sizes = [1, 64], strides = [1, 1]} : vector<8x96xf32> to vector<1x64xf32>
    %15 = vector.extract_strided_slice %9 {offsets = [5, 0], sizes = [1, 32], strides = [1, 1]} : vector<8x96xf32> to vector<1x32xf32>
    %16 = vector.extract_strided_slice %9 {offsets = [6, 0], sizes = [1, 32], strides = [1, 1]} : vector<8x96xf32> to vector<1x32xf32>
    %17 = vector.extract_strided_slice %9 {offsets = [7, 0], sizes = [1, 32], strides = [1, 1]} : vector<8x96xf32> to vector<1x32xf32>
    %c0_13 = arith.constant 0 : index
    %c0_14 = arith.constant 0 : index
    %c0_15 = arith.constant 0 : index
    %18 = vector.load %arg5[%c0_13, %c0_14, %c0_15] : memref<2x32x96xf32, #tpu.memory_space<vmem>>, vector<1x32x96xf32>
    %19 = vector.shape_cast %18 : vector<1x32x96xf32> to vector<32x96xf32>
    %cst_16 = arith.constant dense<0.000000e+00> : vector<48x96xf32>
    %20 = tpu.matmul %6, %19, %cst_16 {dimension_numbers = #tpu.dot_dimension_numbers<[1], [0], [0], [1], [0, 0, 1, 1], [], []>} : vector<48x32xf32>, vector<32x96xf32>, vector<48x96xf32> -> vector<48x96xf32>
    %21 = vector.broadcast %10 : vector<1x96xf32> to vector<48x96xf32>
    %22 = arith.addf %20, %21 : vector<48x96xf32>
    %23 = vector.shape_cast %22 : vector<48x96xf32> to vector<2x24x96xf32>
    %24 = vector.extract_strided_slice %23 {offsets = [0, 0, 0], sizes = [2, 24, 16], strides = [1, 1, 1]} : vector<2x24x96xf32> to vector<2x24x16xf32>
    %25 = vector.extract_strided_slice %23 {offsets = [0, 0, 32], sizes = [2, 24, 16], strides = [1, 1, 1]} : vector<2x24x96xf32> to vector<2x24x16xf32>
    %26 = vector.extract_strided_slice %23 {offsets = [0, 0, 64], sizes = [2, 24, 16], strides = [1, 1, 1]} : vector<2x24x96xf32> to vector<2x24x16xf32>
    "tpu.trace_start"() <{level = 10 : i32, message = "bqd,bkd->bqk"}> : () -> ()
    %cst_17 = arith.constant dense<0.000000e+00> : vector<2x24x24xf32>
    %27 = tpu.matmul %24, %25, %cst_17 {dimension_numbers = #tpu.dot_dimension_numbers<[2], [2], [1], [1], [0, 0, 0, 1, 1, 1], [0], [0]>} : vector<2x24x16xf32>, vector<2x24x16xf32>, vector<2x24x24xf32> -> vector<2x24x24xf32>
    "tpu.trace_stop"() : () -> ()
    %cst_18 = arith.constant 2.500000e-01 : f32
    %28 = vector.broadcast %cst_18 : f32 to vector<2x24x24xf32>
    %29 = arith.mulf %27, %28 : vector<2x24x24xf32>
    %30 = vector.broadcast %7 : vector<2x1x24xf32> to vector<2x24x24xf32>
    %31 = arith.addf %29, %30 : vector<2x24x24xf32>
    %cst_19 = arith.constant dense<0xFF800000> : vector<2x24xf32>
    %32 = vector.multi_reduction <maximumf>, %31, %cst_19 [2] : vector<2x24x24xf32> to vector<2x24xf32>
    %33 = vector.shape_cast %32 : vector<2x24xf32> to vector<2x24x1xf32>
    %34 = vector.broadcast %33 : vector<2x24x1xf32> to vector<2x24x24xf32>
    %35 = arith.subf %31, %34 : vector<2x24x24xf32>
    %36 = math.exp %35 : vector<2x24x24xf32>
    %cst_20 = arith.constant dense<0.000000e+00> : vector<2x24xf32>
    %37 = vector.multi_reduction <add>, %36, %cst_20 [2] : vector<2x24x24xf32> to vector<2x24xf32>
    %38 = vector.shape_cast %37 : vector<2x24xf32> to vector<2x24x1xf32>
    %39 = tpu.reciprocal %38 {approx = true} : vector<2x24x1xf32> -> vector<2x24x1xf32>
    %40 = vector.broadcast %39 : vector<2x24x1xf32> to vector<2x24x24xf32>
    %41 = arith.mulf %36, %40 : vector<2x24x24xf32>
    "tpu.trace_start"() <{level = 10 : i32, message = "bqk,bkd->bqd"}> : () -> ()
    %cst_21 = arith.constant dense<0.000000e+00> : vector<2x24x16xf32>
    %42 = tpu.matmul %41, %26, %cst_21 {dimension_numbers = #tpu.dot_dimension_numbers<[2], [1], [1], [2], [0, 0, 0, 1, 1, 2], [0], [0]>} : vector<2x24x24xf32>, vector<2x24x16xf32>, vector<2x24x16xf32> -> vector<2x24x16xf32>
    "tpu.trace_stop"() : () -> ()
    %43 = vector.extract_strided_slice %23 {offsets = [0, 0, 16], sizes = [2, 24, 16], strides = [1, 1, 1]} : vector<2x24x96xf32> to vector<2x24x16xf32>
    %44 = vector.extract_strided_slice %23 {offsets = [0, 0, 48], sizes = [2, 24, 16], strides = [1, 1, 1]} : vector<2x24x96xf32> to vector<2x24x16xf32>
    %45 = vector.extract_strided_slice %23 {offsets = [0, 0, 80], sizes = [2, 24, 16], strides = [1, 1, 1]} : vector<2x24x96xf32> to vector<2x24x16xf32>
    "tpu.trace_start"() <{level = 10 : i32, message = "bqd,bkd->bqk"}> : () -> ()
    %cst_22 = arith.constant dense<0.000000e+00> : vector<2x24x24xf32>
    %46 = tpu.matmul %43, %44, %cst_22 {dimension_numbers = #tpu.dot_dimension_numbers<[2], [2], [1], [1], [0, 0, 0, 1, 1, 1], [0], [0]>} : vector<2x24x16xf32>, vector<2x24x16xf32>, vector<2x24x24xf32> -> vector<2x24x24xf32>
    "tpu.trace_stop"() : () -> ()
    %cst_23 = arith.constant 2.500000e-01 : f32
    %47 = vector.broadcast %cst_23 : f32 to vector<2x24x24xf32>
    %48 = arith.mulf %46, %47 : vector<2x24x24xf32>
    %49 = vector.broadcast %7 : vector<2x1x24xf32> to vector<2x24x24xf32>
    %50 = arith.addf %48, %49 : vector<2x24x24xf32>
    %cst_24 = arith.constant dense<0xFF800000> : vector<2x24xf32>
    %51 = vector.multi_reduction <maximumf>, %50, %cst_24 [2] : vector<2x24x24xf32> to vector<2x24xf32>
    %52 = vector.shape_cast %51 : vector<2x24xf32> to vector<2x24x1xf32>
    %53 = vector.broadcast %52 : vector<2x24x1xf32> to vector<2x24x24xf32>
    %54 = arith.subf %50, %53 : vector<2x24x24xf32>
    %55 = math.exp %54 : vector<2x24x24xf32>
    %cst_25 = arith.constant dense<0.000000e+00> : vector<2x24xf32>
    %56 = vector.multi_reduction <add>, %55, %cst_25 [2] : vector<2x24x24xf32> to vector<2x24xf32>
    %57 = vector.shape_cast %56 : vector<2x24xf32> to vector<2x24x1xf32>
    %58 = tpu.reciprocal %57 {approx = true} : vector<2x24x1xf32> -> vector<2x24x1xf32>
    %59 = vector.broadcast %58 : vector<2x24x1xf32> to vector<2x24x24xf32>
    %60 = arith.mulf %55, %59 : vector<2x24x24xf32>
    "tpu.trace_start"() <{level = 10 : i32, message = "bqk,bkd->bqd"}> : () -> ()
    %cst_26 = arith.constant dense<0.000000e+00> : vector<2x24x16xf32>
    %61 = tpu.matmul %60, %45, %cst_26 {dimension_numbers = #tpu.dot_dimension_numbers<[2], [1], [1], [2], [0, 0, 0, 1, 1, 2], [0], [0]>} : vector<2x24x24xf32>, vector<2x24x16xf32>, vector<2x24x16xf32> -> vector<2x24x16xf32>
    "tpu.trace_stop"() : () -> ()
    %62 = tpu.concatenate %42, %61 in 2 : vector<2x24x16xf32>, vector<2x24x16xf32> -> vector<2x24x32xf32>
    %63 = vector.shape_cast %62 : vector<2x24x32xf32> to vector<48x32xf32>
    %c0_27 = arith.constant 0 : index
    %c0_28 = arith.constant 0 : index
    %c0_29 = arith.constant 0 : index
    %64 = vector.load %arg6[%c0_27, %c0_28, %c0_29] : memref<2x32x32xf32, #tpu.memory_space<vmem>>, vector<1x32x32xf32>
    %65 = vector.shape_cast %64 : vector<1x32x32xf32> to vector<32x32xf32>
    %cst_30 = arith.constant dense<0.000000e+00> : vector<48x32xf32>
    %66 = tpu.matmul %63, %65, %cst_30 {dimension_numbers = #tpu.dot_dimension_numbers<[1], [0], [0], [1], [0, 0, 1, 1], [], []>} : vector<48x32xf32>, vector<32x32xf32>, vector<48x32xf32> -> vector<48x32xf32>
    %67 = vector.broadcast %11 : vector<1x32xf32> to vector<48x32xf32>
    %68 = arith.addf %66, %67 : vector<48x32xf32>
    %69 = arith.addf %6, %68 : vector<48x32xf32>
    %cst_31 = arith.constant dense<0.000000e+00> : vector<48xf32>
    %70 = vector.multi_reduction <add>, %69, %cst_31 [1] : vector<48x32xf32> to vector<48xf32>
    %71 = vector.shape_cast %70 : vector<48xf32> to vector<48x1xf32>
    %cst_32 = arith.constant 3.200000e+01 : f32
    %72 = vector.broadcast %cst_32 : f32 to vector<48x1xf32>
    %73 = arith.divf %71, %72 : vector<48x1xf32>
    %74 = vector.broadcast %73 : vector<48x1xf32> to vector<48x32xf32>
    %75 = arith.subf %69, %74 : vector<48x32xf32>
    %76 = arith.mulf %75, %75 : vector<48x32xf32>
    %cst_33 = arith.constant dense<0.000000e+00> : vector<48xf32>
    %77 = vector.multi_reduction <add>, %76, %cst_33 [1] : vector<48x32xf32> to vector<48xf32>
    %78 = vector.shape_cast %77 : vector<48xf32> to vector<48x1xf32>
    %cst_34 = arith.constant 3.200000e+01 : f32
    %79 = vector.broadcast %cst_34 : f32 to vector<48x1xf32>
    %80 = arith.divf %78, %79 : vector<48x1xf32>
    %81 = vector.broadcast %73 : vector<48x1xf32> to vector<48x32xf32>
    %82 = arith.subf %69, %81 : vector<48x32xf32>
    %cst_35 = arith.constant 9.99999974E-6 : f32
    %83 = vector.broadcast %cst_35 : f32 to vector<48x1xf32>
    %84 = arith.addf %80, %83 : vector<48x1xf32>
    %85 = math.rsqrt %84 : vector<48x1xf32>
    %86 = vector.broadcast %85 : vector<48x1xf32> to vector<48x32xf32>
    %87 = arith.mulf %82, %86 : vector<48x32xf32>
    %88 = vector.broadcast %12 : vector<1x32xf32> to vector<48x32xf32>
    %89 = arith.mulf %87, %88 : vector<48x32xf32>
    %90 = vector.broadcast %13 : vector<1x32xf32> to vector<48x32xf32>
    %91 = arith.addf %89, %90 : vector<48x32xf32>
    %c0_36 = arith.constant 0 : index
    %c0_37 = arith.constant 0 : index
    %c0_38 = arith.constant 0 : index
    %92 = vector.load %arg7[%c0_36, %c0_37, %c0_38] : memref<2x32x64xf32, #tpu.memory_space<vmem>>, vector<1x32x64xf32>
    %93 = vector.shape_cast %92 : vector<1x32x64xf32> to vector<32x64xf32>
    %cst_39 = arith.constant dense<0.000000e+00> : vector<48x64xf32>
    %94 = tpu.matmul %91, %93, %cst_39 {dimension_numbers = #tpu.dot_dimension_numbers<[1], [0], [0], [1], [0, 0, 1, 1], [], []>} : vector<48x32xf32>, vector<32x64xf32>, vector<48x64xf32> -> vector<48x64xf32>
    %95 = vector.broadcast %14 : vector<1x64xf32> to vector<48x64xf32>
    %96 = arith.addf %94, %95 : vector<48x64xf32>
    %cst_40 = arith.constant 0.000000e+00 : f32
    %97 = vector.broadcast %cst_40 : f32 to vector<48x64xf32>
    %98 = arith.maximumf %96, %97 : vector<48x64xf32>
    %c0_41 = arith.constant 0 : index
    %c0_42 = arith.constant 0 : index
    %c0_43 = arith.constant 0 : index
    %99 = vector.load %arg8[%c0_41, %c0_42, %c0_43] : memref<2x64x32xf32, #tpu.memory_space<vmem>>, vector<1x64x32xf32>
    %100 = vector.shape_cast %99 : vector<1x64x32xf32> to vector<64x32xf32>
    %cst_44 = arith.constant dense<0.000000e+00> : vector<48x32xf32>
    %101 = tpu.matmul %98, %100, %cst_44 {dimension_numbers = #tpu.dot_dimension_numbers<[1], [0], [0], [1], [0, 0, 1, 1], [], []>} : vector<48x64xf32>, vector<64x32xf32>, vector<48x32xf32> -> vector<48x32xf32>
    %102 = vector.broadcast %15 : vector<1x32xf32> to vector<48x32xf32>
    %103 = arith.addf %101, %102 : vector<48x32xf32>
    %104 = arith.addf %91, %103 : vector<48x32xf32>
    %cst_45 = arith.constant dense<0.000000e+00> : vector<48xf32>
    %105 = vector.multi_reduction <add>, %104, %cst_45 [1] : vector<48x32xf32> to vector<48xf32>
    %106 = vector.shape_cast %105 : vector<48xf32> to vector<48x1xf32>
    %cst_46 = arith.constant 3.200000e+01 : f32
    %107 = vector.broadcast %cst_46 : f32 to vector<48x1xf32>
    %108 = arith.divf %106, %107 : vector<48x1xf32>
    %109 = vector.broadcast %108 : vector<48x1xf32> to vector<48x32xf32>
    %110 = arith.subf %104, %109 : vector<48x32xf32>
    %111 = arith.mulf %110, %110 : vector<48x32xf32>
    %cst_47 = arith.constant dense<0.000000e+00> : vector<48xf32>
    %112 = vector.multi_reduction <add>, %111, %cst_47 [1] : vector<48x32xf32> to vector<48xf32>
    %113 = vector.shape_cast %112 : vector<48xf32> to vector<48x1xf32>
    %cst_48 = arith.constant 3.200000e+01 : f32
    %114 = vector.broadcast %cst_48 : f32 to vector<48x1xf32>
    %115 = arith.divf %113, %114 : vector<48x1xf32>
    %116 = vector.broadcast %108 : vector<48x1xf32> to vector<48x32xf32>
    %117 = arith.subf %104, %116 : vector<48x32xf32>
    %cst_49 = arith.constant 9.99999974E-6 : f32
    %118 = vector.broadcast %cst_49 : f32 to vector<48x1xf32>
    %119 = arith.addf %115, %118 : vector<48x1xf32>
    %120 = math.rsqrt %119 : vector<48x1xf32>
    %121 = vector.broadcast %120 : vector<48x1xf32> to vector<48x32xf32>
    %122 = arith.mulf %117, %121 : vector<48x32xf32>
    %123 = vector.broadcast %16 : vector<1x32xf32> to vector<48x32xf32>
    %124 = arith.mulf %122, %123 : vector<48x32xf32>
    %125 = vector.broadcast %17 : vector<1x32xf32> to vector<48x32xf32>
    %126 = arith.addf %124, %125 : vector<48x32xf32>
    %c1 = arith.constant 1 : index
    %c0_50 = arith.constant 0 : index
    %c0_51 = arith.constant 0 : index
    %127 = vector.load %arg9[%c1, %c0_50, %c0_51] : memref<2x8x96xf32, #tpu.memory_space<vmem>>, vector<1x8x96xf32>
    %128 = vector.shape_cast %127 : vector<1x8x96xf32> to vector<8x96xf32>
    %129 = vector.extract_strided_slice %128 {offsets = [0, 0], sizes = [1, 96], strides = [1, 1]} : vector<8x96xf32> to vector<1x96xf32>
    %130 = vector.extract_strided_slice %128 {offsets = [1, 0], sizes = [1, 32], strides = [1, 1]} : vector<8x96xf32> to vector<1x32xf32>
    %131 = vector.extract_strided_slice %128 {offsets = [2, 0], sizes = [1, 32], strides = [1, 1]} : vector<8x96xf32> to vector<1x32xf32>
    %132 = vector.extract_strided_slice %128 {offsets = [3, 0], sizes = [1, 32], strides = [1, 1]} : vector<8x96xf32> to vector<1x32xf32>
    %133 = vector.extract_strided_slice %128 {offsets = [4, 0], sizes = [1, 64], strides = [1, 1]} : vector<8x96xf32> to vector<1x64xf32>
    %134 = vector.extract_strided_slice %128 {offsets = [5, 0], sizes = [1, 32], strides = [1, 1]} : vector<8x96xf32> to vector<1x32xf32>
    %135 = vector.extract_strided_slice %128 {offsets = [6, 0], sizes = [1, 32], strides = [1, 1]} : vector<8x96xf32> to vector<1x32xf32>
    %136 = vector.extract_strided_slice %128 {offsets = [7, 0], sizes = [1, 32], strides = [1, 1]} : vector<8x96xf32> to vector<1x32xf32>
    %c1_52 = arith.constant 1 : index
    %c0_53 = arith.constant 0 : index
    %c0_54 = arith.constant 0 : index
    %137 = vector.load %arg5[%c1_52, %c0_53, %c0_54] : memref<2x32x96xf32, #tpu.memory_space<vmem>>, vector<1x32x96xf32>
    %138 = vector.shape_cast %137 : vector<1x32x96xf32> to vector<32x96xf32>
    %cst_55 = arith.constant dense<0.000000e+00> : vector<48x96xf32>
    %139 = tpu.matmul %126, %138, %cst_55 {dimension_numbers = #tpu.dot_dimension_numbers<[1], [0], [0], [1], [0, 0, 1, 1], [], []>} : vector<48x32xf32>, vector<32x96xf32>, vector<48x96xf32> -> vector<48x96xf32>
    %140 = vector.broadcast %129 : vector<1x96xf32> to vector<48x96xf32>
    %141 = arith.addf %139, %140 : vector<48x96xf32>
    %142 = vector.shape_cast %141 : vector<48x96xf32> to vector<2x24x96xf32>
    %143 = vector.extract_strided_slice %142 {offsets = [0, 0, 0], sizes = [2, 24, 16], strides = [1, 1, 1]} : vector<2x24x96xf32> to vector<2x24x16xf32>
    %144 = vector.extract_strided_slice %142 {offsets = [0, 0, 32], sizes = [2, 24, 16], strides = [1, 1, 1]} : vector<2x24x96xf32> to vector<2x24x16xf32>
    %145 = vector.extract_strided_slice %142 {offsets = [0, 0, 64], sizes = [2, 24, 16], strides = [1, 1, 1]} : vector<2x24x96xf32> to vector<2x24x16xf32>
    "tpu.trace_start"() <{level = 10 : i32, message = "bqd,bkd->bqk"}> : () -> ()
    %cst_56 = arith.constant dense<0.000000e+00> : vector<2x24x24xf32>
    %146 = tpu.matmul %143, %144, %cst_56 {dimension_numbers = #tpu.dot_dimension_numbers<[2], [2], [1], [1], [0, 0, 0, 1, 1, 1], [0], [0]>} : vector<2x24x16xf32>, vector<2x24x16xf32>, vector<2x24x24xf32> -> vector<2x24x24xf32>
    "tpu.trace_stop"() : () -> ()
    %cst_57 = arith.constant 2.500000e-01 : f32
    %147 = vector.broadcast %cst_57 : f32 to vector<2x24x24xf32>
    %148 = arith.mulf %146, %147 : vector<2x24x24xf32>
    %149 = vector.broadcast %7 : vector<2x1x24xf32> to vector<2x24x24xf32>
    %150 = arith.addf %148, %149 : vector<2x24x24xf32>
    %cst_58 = arith.constant dense<0xFF800000> : vector<2x24xf32>
    %151 = vector.multi_reduction <maximumf>, %150, %cst_58 [2] : vector<2x24x24xf32> to vector<2x24xf32>
    %152 = vector.shape_cast %151 : vector<2x24xf32> to vector<2x24x1xf32>
    %153 = vector.broadcast %152 : vector<2x24x1xf32> to vector<2x24x24xf32>
    %154 = arith.subf %150, %153 : vector<2x24x24xf32>
    %155 = math.exp %154 : vector<2x24x24xf32>
    %cst_59 = arith.constant dense<0.000000e+00> : vector<2x24xf32>
    %156 = vector.multi_reduction <add>, %155, %cst_59 [2] : vector<2x24x24xf32> to vector<2x24xf32>
    %157 = vector.shape_cast %156 : vector<2x24xf32> to vector<2x24x1xf32>
    %158 = tpu.reciprocal %157 {approx = true} : vector<2x24x1xf32> -> vector<2x24x1xf32>
    %159 = vector.broadcast %158 : vector<2x24x1xf32> to vector<2x24x24xf32>
    %160 = arith.mulf %155, %159 : vector<2x24x24xf32>
    "tpu.trace_start"() <{level = 10 : i32, message = "bqk,bkd->bqd"}> : () -> ()
    %cst_60 = arith.constant dense<0.000000e+00> : vector<2x24x16xf32>
    %161 = tpu.matmul %160, %145, %cst_60 {dimension_numbers = #tpu.dot_dimension_numbers<[2], [1], [1], [2], [0, 0, 0, 1, 1, 2], [0], [0]>} : vector<2x24x24xf32>, vector<2x24x16xf32>, vector<2x24x16xf32> -> vector<2x24x16xf32>
    "tpu.trace_stop"() : () -> ()
    %162 = vector.extract_strided_slice %142 {offsets = [0, 0, 16], sizes = [2, 24, 16], strides = [1, 1, 1]} : vector<2x24x96xf32> to vector<2x24x16xf32>
    %163 = vector.extract_strided_slice %142 {offsets = [0, 0, 48], sizes = [2, 24, 16], strides = [1, 1, 1]} : vector<2x24x96xf32> to vector<2x24x16xf32>
    %164 = vector.extract_strided_slice %142 {offsets = [0, 0, 80], sizes = [2, 24, 16], strides = [1, 1, 1]} : vector<2x24x96xf32> to vector<2x24x16xf32>
    "tpu.trace_start"() <{level = 10 : i32, message = "bqd,bkd->bqk"}> : () -> ()
    %cst_61 = arith.constant dense<0.000000e+00> : vector<2x24x24xf32>
    %165 = tpu.matmul %162, %163, %cst_61 {dimension_numbers = #tpu.dot_dimension_numbers<[2], [2], [1], [1], [0, 0, 0, 1, 1, 1], [0], [0]>} : vector<2x24x16xf32>, vector<2x24x16xf32>, vector<2x24x24xf32> -> vector<2x24x24xf32>
    "tpu.trace_stop"() : () -> ()
    %cst_62 = arith.constant 2.500000e-01 : f32
    %166 = vector.broadcast %cst_62 : f32 to vector<2x24x24xf32>
    %167 = arith.mulf %165, %166 : vector<2x24x24xf32>
    %168 = vector.broadcast %7 : vector<2x1x24xf32> to vector<2x24x24xf32>
    %169 = arith.addf %167, %168 : vector<2x24x24xf32>
    %cst_63 = arith.constant dense<0xFF800000> : vector<2x24xf32>
    %170 = vector.multi_reduction <maximumf>, %169, %cst_63 [2] : vector<2x24x24xf32> to vector<2x24xf32>
    %171 = vector.shape_cast %170 : vector<2x24xf32> to vector<2x24x1xf32>
    %172 = vector.broadcast %171 : vector<2x24x1xf32> to vector<2x24x24xf32>
    %173 = arith.subf %169, %172 : vector<2x24x24xf32>
    %174 = math.exp %173 : vector<2x24x24xf32>
    %cst_64 = arith.constant dense<0.000000e+00> : vector<2x24xf32>
    %175 = vector.multi_reduction <add>, %174, %cst_64 [2] : vector<2x24x24xf32> to vector<2x24xf32>
    %176 = vector.shape_cast %175 : vector<2x24xf32> to vector<2x24x1xf32>
    %177 = tpu.reciprocal %176 {approx = true} : vector<2x24x1xf32> -> vector<2x24x1xf32>
    %178 = vector.broadcast %177 : vector<2x24x1xf32> to vector<2x24x24xf32>
    %179 = arith.mulf %174, %178 : vector<2x24x24xf32>
    "tpu.trace_start"() <{level = 10 : i32, message = "bqk,bkd->bqd"}> : () -> ()
    %cst_65 = arith.constant dense<0.000000e+00> : vector<2x24x16xf32>
    %180 = tpu.matmul %179, %164, %cst_65 {dimension_numbers = #tpu.dot_dimension_numbers<[2], [1], [1], [2], [0, 0, 0, 1, 1, 2], [0], [0]>} : vector<2x24x24xf32>, vector<2x24x16xf32>, vector<2x24x16xf32> -> vector<2x24x16xf32>
    "tpu.trace_stop"() : () -> ()
    %181 = tpu.concatenate %161, %180 in 2 : vector<2x24x16xf32>, vector<2x24x16xf32> -> vector<2x24x32xf32>
    %182 = vector.shape_cast %181 : vector<2x24x32xf32> to vector<48x32xf32>
    %c1_66 = arith.constant 1 : index
    %c0_67 = arith.constant 0 : index
    %c0_68 = arith.constant 0 : index
    %183 = vector.load %arg6[%c1_66, %c0_67, %c0_68] : memref<2x32x32xf32, #tpu.memory_space<vmem>>, vector<1x32x32xf32>
    %184 = vector.shape_cast %183 : vector<1x32x32xf32> to vector<32x32xf32>
    %cst_69 = arith.constant dense<0.000000e+00> : vector<48x32xf32>
    %185 = tpu.matmul %182, %184, %cst_69 {dimension_numbers = #tpu.dot_dimension_numbers<[1], [0], [0], [1], [0, 0, 1, 1], [], []>} : vector<48x32xf32>, vector<32x32xf32>, vector<48x32xf32> -> vector<48x32xf32>
    %186 = vector.broadcast %130 : vector<1x32xf32> to vector<48x32xf32>
    %187 = arith.addf %185, %186 : vector<48x32xf32>
    %188 = arith.addf %126, %187 : vector<48x32xf32>
    %cst_70 = arith.constant dense<0.000000e+00> : vector<48xf32>
    %189 = vector.multi_reduction <add>, %188, %cst_70 [1] : vector<48x32xf32> to vector<48xf32>
    %190 = vector.shape_cast %189 : vector<48xf32> to vector<48x1xf32>
    %cst_71 = arith.constant 3.200000e+01 : f32
    %191 = vector.broadcast %cst_71 : f32 to vector<48x1xf32>
    %192 = arith.divf %190, %191 : vector<48x1xf32>
    %193 = vector.broadcast %192 : vector<48x1xf32> to vector<48x32xf32>
    %194 = arith.subf %188, %193 : vector<48x32xf32>
    %195 = arith.mulf %194, %194 : vector<48x32xf32>
    %cst_72 = arith.constant dense<0.000000e+00> : vector<48xf32>
    %196 = vector.multi_reduction <add>, %195, %cst_72 [1] : vector<48x32xf32> to vector<48xf32>
    %197 = vector.shape_cast %196 : vector<48xf32> to vector<48x1xf32>
    %cst_73 = arith.constant 3.200000e+01 : f32
    %198 = vector.broadcast %cst_73 : f32 to vector<48x1xf32>
    %199 = arith.divf %197, %198 : vector<48x1xf32>
    %200 = vector.broadcast %192 : vector<48x1xf32> to vector<48x32xf32>
    %201 = arith.subf %188, %200 : vector<48x32xf32>
    %cst_74 = arith.constant 9.99999974E-6 : f32
    %202 = vector.broadcast %cst_74 : f32 to vector<48x1xf32>
    %203 = arith.addf %199, %202 : vector<48x1xf32>
    %204 = math.rsqrt %203 : vector<48x1xf32>
    %205 = vector.broadcast %204 : vector<48x1xf32> to vector<48x32xf32>
    %206 = arith.mulf %201, %205 : vector<48x32xf32>
    %207 = vector.broadcast %131 : vector<1x32xf32> to vector<48x32xf32>
    %208 = arith.mulf %206, %207 : vector<48x32xf32>
    %209 = vector.broadcast %132 : vector<1x32xf32> to vector<48x32xf32>
    %210 = arith.addf %208, %209 : vector<48x32xf32>
    %c1_75 = arith.constant 1 : index
    %c0_76 = arith.constant 0 : index
    %c0_77 = arith.constant 0 : index
    %211 = vector.load %arg7[%c1_75, %c0_76, %c0_77] : memref<2x32x64xf32, #tpu.memory_space<vmem>>, vector<1x32x64xf32>
    %212 = vector.shape_cast %211 : vector<1x32x64xf32> to vector<32x64xf32>
    %cst_78 = arith.constant dense<0.000000e+00> : vector<48x64xf32>
    %213 = tpu.matmul %210, %212, %cst_78 {dimension_numbers = #tpu.dot_dimension_numbers<[1], [0], [0], [1], [0, 0, 1, 1], [], []>} : vector<48x32xf32>, vector<32x64xf32>, vector<48x64xf32> -> vector<48x64xf32>
    %214 = vector.broadcast %133 : vector<1x64xf32> to vector<48x64xf32>
    %215 = arith.addf %213, %214 : vector<48x64xf32>
    %cst_79 = arith.constant 0.000000e+00 : f32
    %216 = vector.broadcast %cst_79 : f32 to vector<48x64xf32>
    %217 = arith.maximumf %215, %216 : vector<48x64xf32>
    %c1_80 = arith.constant 1 : index
    %c0_81 = arith.constant 0 : index
    %c0_82 = arith.constant 0 : index
    %218 = vector.load %arg8[%c1_80, %c0_81, %c0_82] : memref<2x64x32xf32, #tpu.memory_space<vmem>>, vector<1x64x32xf32>
    %219 = vector.shape_cast %218 : vector<1x64x32xf32> to vector<64x32xf32>
    %cst_83 = arith.constant dense<0.000000e+00> : vector<48x32xf32>
    %220 = tpu.matmul %217, %219, %cst_83 {dimension_numbers = #tpu.dot_dimension_numbers<[1], [0], [0], [1], [0, 0, 1, 1], [], []>} : vector<48x64xf32>, vector<64x32xf32>, vector<48x32xf32> -> vector<48x32xf32>
    %221 = vector.broadcast %134 : vector<1x32xf32> to vector<48x32xf32>
    %222 = arith.addf %220, %221 : vector<48x32xf32>
    %223 = arith.addf %210, %222 : vector<48x32xf32>
    %cst_84 = arith.constant dense<0.000000e+00> : vector<48xf32>
    %224 = vector.multi_reduction <add>, %223, %cst_84 [1] : vector<48x32xf32> to vector<48xf32>
    %225 = vector.shape_cast %224 : vector<48xf32> to vector<48x1xf32>
    %cst_85 = arith.constant 3.200000e+01 : f32
    %226 = vector.broadcast %cst_85 : f32 to vector<48x1xf32>
    %227 = arith.divf %225, %226 : vector<48x1xf32>
    %228 = vector.broadcast %227 : vector<48x1xf32> to vector<48x32xf32>
    %229 = arith.subf %223, %228 : vector<48x32xf32>
    %230 = arith.mulf %229, %229 : vector<48x32xf32>
    %cst_86 = arith.constant dense<0.000000e+00> : vector<48xf32>
    %231 = vector.multi_reduction <add>, %230, %cst_86 [1] : vector<48x32xf32> to vector<48xf32>
    %232 = vector.shape_cast %231 : vector<48xf32> to vector<48x1xf32>
    %cst_87 = arith.constant 3.200000e+01 : f32
    %233 = vector.broadcast %cst_87 : f32 to vector<48x1xf32>
    %234 = arith.divf %232, %233 : vector<48x1xf32>
    %235 = vector.broadcast %227 : vector<48x1xf32> to vector<48x32xf32>
    %236 = arith.subf %223, %235 : vector<48x32xf32>
    %cst_88 = arith.constant 9.99999974E-6 : f32
    %237 = vector.broadcast %cst_88 : f32 to vector<48x1xf32>
    %238 = arith.addf %234, %237 : vector<48x1xf32>
    %239 = math.rsqrt %238 : vector<48x1xf32>
    %240 = vector.broadcast %239 : vector<48x1xf32> to vector<48x32xf32>
    %241 = arith.mulf %236, %240 : vector<48x32xf32>
    %242 = vector.broadcast %135 : vector<1x32xf32> to vector<48x32xf32>
    %243 = arith.mulf %241, %242 : vector<48x32xf32>
    %244 = vector.broadcast %136 : vector<1x32xf32> to vector<48x32xf32>
    %245 = arith.addf %243, %244 : vector<48x32xf32>
    %246 = vector.shape_cast %245 : vector<48x32xf32> to vector<2x24x32xf32>
    %c0_89 = arith.constant 0 : index
    %c0_90 = arith.constant 0 : index
    %c0_91 = arith.constant 0 : index
    %247 = vector.load %arg3[%c0_89, %c0_90, %c0_91] : memref<2x24x1xf32, #tpu.memory_space<vmem>>, vector<2x24x1xf32>
    %248 = vector.broadcast %247 : vector<2x24x1xf32> to vector<2x24x32xf32>
    %249 = arith.mulf %246, %248 : vector<2x24x32xf32>
    %cst_92 = arith.constant dense<0.000000e+00> : vector<2x32xf32>
    %250 = vector.multi_reduction <add>, %249, %cst_92 [1] : vector<2x24x32xf32> to vector<2x32xf32>
    %c0_93 = arith.constant 0 : index
    %c0_94 = arith.constant 0 : index
    %c0_95 = arith.constant 0 : index
    %251 = vector.load %arg10[%c0_93, %c0_94, %c0_95] : memref<2x32x32xf32, #tpu.memory_space<vmem>>, vector<1x32x32xf32>
    %252 = vector.shape_cast %251 : vector<1x32x32xf32> to vector<32x32xf32>
    %cst_96 = arith.constant dense<0.000000e+00> : vector<2x32xf32>
    %253 = tpu.matmul %250, %252, %cst_96 {dimension_numbers = #tpu.dot_dimension_numbers<[1], [0], [0], [1], [0, 0, 1, 1], [], []>} : vector<2x32xf32>, vector<32x32xf32>, vector<2x32xf32> -> vector<2x32xf32>
    %c0_97 = arith.constant 0 : index
    %c0_98 = arith.constant 0 : index
    %c0_99 = arith.constant 0 : index
    %254 = vector.load %arg11[%c0_97, %c0_98, %c0_99] : memref<2x1x32xf32, #tpu.memory_space<vmem>>, vector<1x1x32xf32>
    %255 = vector.shape_cast %254 : vector<1x1x32xf32> to vector<1x32xf32>
    %256 = vector.broadcast %255 : vector<1x32xf32> to vector<2x32xf32>
    %257 = arith.addf %253, %256 : vector<2x32xf32>
    %cst_100 = arith.constant 0.000000e+00 : f32
    %258 = vector.broadcast %cst_100 : f32 to vector<2x32xf32>
    %259 = arith.maximumf %257, %258 : vector<2x32xf32>
    %c1_101 = arith.constant 1 : index
    %c0_102 = arith.constant 0 : index
    %c0_103 = arith.constant 0 : index
    %260 = vector.load %arg10[%c1_101, %c0_102, %c0_103] : memref<2x32x32xf32, #tpu.memory_space<vmem>>, vector<1x32x32xf32>
    %261 = vector.shape_cast %260 : vector<1x32x32xf32> to vector<32x32xf32>
    %cst_104 = arith.constant dense<0.000000e+00> : vector<2x32xf32>
    %262 = tpu.matmul %259, %261, %cst_104 {dimension_numbers = #tpu.dot_dimension_numbers<[1], [0], [0], [1], [0, 0, 1, 1], [], []>} : vector<2x32xf32>, vector<32x32xf32>, vector<2x32xf32> -> vector<2x32xf32>
    %c1_105 = arith.constant 1 : index
    %c0_106 = arith.constant 0 : index
    %c0_107 = arith.constant 0 : index
    %263 = vector.load %arg11[%c1_105, %c0_106, %c0_107] : memref<2x1x32xf32, #tpu.memory_space<vmem>>, vector<1x1x32xf32>
    %264 = vector.shape_cast %263 : vector<1x1x32xf32> to vector<1x32xf32>
    %265 = vector.broadcast %264 : vector<1x32xf32> to vector<2x32xf32>
    %266 = arith.addf %262, %265 : vector<2x32xf32>
    %267 = vector.extract_strided_slice %266 {offsets = [0, 0], sizes = [2, 2], strides = [1, 1]} : vector<2x32xf32> to vector<2x2xf32>
    %c0_108 = arith.constant 0 : index
    %c0_109 = arith.constant 0 : index
    %268 = vector.load %arg12[%c0_108, %c0_109] : memref<2x2xf32, #tpu.memory_space<vmem>>, vector<2x2xf32>
    tpu.vector_store %arg12[%c0_108, %c0_109], %267 {strides = array<i32>} : memref<2x2xf32, #tpu.memory_space<vmem>>, vector<2x2xf32>,
    return
  }
}

</mosaic_0001>

<bundles_post_ra>
// kernel: transformer_forward.1
= control target key start
LH: loop header
LB: loop body
LE: loop exit
PB: predicated region body
PF: predicated region fallthrough
CT: control target
= control target key end

     0   :  { %vm55_vm0 = vcmask 64512   ;;  %s6254_s0 = inlined_call_operand.vmem [shape: f32[2,24,8], index: 0, kind: input, shape index: {}]   ;;  %s6255_s1 = inlined_call_operand.vmem [shape: f32[2,24,32], index: 1, kind: input, shape index: {}]   ;;  %s6256_s2 = inlined_call_operand.vmem [shape: f32[2,1,24], index: 2, kind: input, shape index: {}]   ;;  %s6257_s3 = inlined_call_operand.vmem [shape: f32[2,24,1], index: 3, kind: input, shape index: {}]   ;;  %s6258_s4 = inlined_call_operand.vmem [shape: f32[8,32], index: 4, kind: input, shape index: {}]   ;;  %s6259_s5 = inlined_call_operand.vmem [shape: f32[2,32,96], index: 5, kind: input, shape index: {}]   ;;  %s6260_s6 = inlined_call_operand.vmem [shape: f32[2,32,32], index: 6, kind: input, shape index: {}]   ;;  %s6261_s7 = inlined_call_operand.vmem [shape: f32[2,32,64], index: 7, kind: input, shape index: {}]   ;;  %s6262_s8 = inlined_call_operand.vmem [shape: f32[2,64,32], index: 8, kind: input, shape index: {}]   ;;  %s6263_s9 = inlined_call_operand.vmem [shape: f32[2,8,96], index: 9, kind: input, shape index: {}]   ;;  %s6264_s10 = inlined_call_operand.vmem [shape: f32[2,32,32], index: 10, kind: input, shape index: {}]   ;;  %s6265_s11 = inlined_call_operand.vmem [shape: f32[2,1,32], index: 11, kind: input, shape index: {}]   ;;  %s6266_s12 = inlined_call_operand.hbm [shape: f32[2,2], index: 12, kind: output, shape index: {}]  }
   0x1   :  { %v48_v0 = vld [vmem:[%s6258_s4] sm:$0xff]  ;;  %v43_v2 = vld [vmem:[%s6254_s0 + $0x8] sm:$0xff]  ;;  %v44_v3 = vld [vmem:[%s6254_s0 + $0x10] sm:$0xff] }
   0x2   :  { %v42_v1 = vld [vmem:[%s6254_s0] sm:$0xff]  ;;  %4188 = vmatprep.subr.mxu0 %v48_v0  ;;  %v173_v5 = vld [vmem:[%s6259_s5 + $0x8] sm:$0xff] }
   0x3   :  { %4190 = vmatprep.mubr.msk.f32.mxu0 %vm55_vm0, %v42_v1  ;;  %4189 = vmatpush3.msra.mxu0 %v48_v0  ;;  %v172_v4 = vld [vmem:[%s6259_s5] sm:$0xff] }
   0x4   :  { %4191 = vmatmul.mubr.msk.f32.vlgmr.msra.gmra.mrb[0].mxu0 %vm55_vm0, %v43_v2  ;;  %v4613_v6 = vpack.c.bf16 %v173_v5, %v172_v4 }
   0x5   :  { %17 = vsyncpa [#allocation3], 0  ;;  %4193 = vmatprep.mubr.msk.f32.mxu0 %vm55_vm0, %v44_v3  ;;  %v45_v7 = vld [vmem:[%s6254_s0 + $0x18] sm:$0xff]  ;;  %v46_v8 = vld [vmem:[%s6254_s0 + $0x20] sm:$0xff]  ;;  %vm180_vm1 = vcmask 261120   ;;  %v176_v31 = vlaneseq  ;;  %v5026_v35 = vmov 0.0|0.0  }
   0x6   :  { %4614 = vmatprep.subr.bf16.mxu1 %v4613_v6  ;;  %v47_v9 = vld [vmem:[%s6254_s0 + $0x28] sm:$0xff]  ;;  %v174_v10 = vld [vmem:[%s6259_s5 + $0x10] sm:$0xff]  ;;  %v175_v11 = vld [vmem:[%s6259_s5 + $0x18] sm:$0xff]  ;;  %4621 = vmatprep.subr.bf16.mxu0 %v5026_v35  ;;  %s5027_s17 = smov 96   ;;  %vm5028_vm2 = vmmov 0   ;;  %v5029_v45 = vmov 0.0  }
   0x7   :  { %4616 = vmatpush3.bf16.msra.mxu1 %v4613_v6  ;;  %v4617_v12 = vpack.c.bf16 %v175_v11, %v174_v10  ;;  %v49_v13 = vld [vmem:[%s6255_s1] sm:$0xff]  ;;  %v50_v14 = vld [vmem:[%s6255_s1 + $0x8] sm:$0xff]  ;;  %v51_v19 = vld [vmem:[%s6255_s1 + $0x10] sm:$0xff]  ;;  %v5183_v32 = vshrl.u32 %v176_v31, 7  ;;  %vm303_vm3 = vcmask 130048   ;;  %vm521_vm5 = vcmask 195584  }
   0x8   :  { %4194 = vmatmul.mubr.msk.f32.gmra.mrb[2].mxu0 %vm55_vm0, %v45_v7  ;;  %v52_v20 = vld [vmem:[%s6255_s1 + $0x18] sm:$0xff]  ;;  %v53_v25 = vld [vmem:[%s6255_s1 + $0x20] sm:$0xff]  ;;  %v54_v26 = vld [vmem:[%s6255_s1 + $0x28] sm:$0xff]  ;;  %s5030_s22 = smov 64   ;;  %s5031_s23 = smov 80   ;;  %vm1661_vm6 = vcmask 523264  }
   0x9   :  { %4196 = vmatprep.mubr.msk.f32.mxu0 %vm55_vm0, %v46_v8  ;;  %4618 = vmatprep.subr.bf16.mxu1 %v4617_v12  ;;  %v178_v33 = vsub.s32 0, %v5183_v32  ;;  %v5189_v34 = vld [vmem:[%s6263_s9] sm:$0xff]  ;;  %vm5230_vm4 = vmpackc.low %vm303_vm3, %vm303_vm3  ;;  %s5032_s24 = smov 112   ;;  %s5033_s25 = smov 48   ;;  %vm3652_vm7 = vcmask 1041409   ;;  %vm3813_vm8 = vcmask 9216  }
   0xa   :  { %v5271_v0 = vld [vmem:[%s6256_s2] ss:$0 sm:$0xff]  ;;  %v5279_v11 = vld [vmem:[%s6256_s2 + $0x1] ss:$0 sm:$0xff]  ;;  %s5034_s14 = smov 16   ;;  %s5036_s30 = smov [#allocation2]  }
   0xb   :  { %4620 = vmatpush3.bf16.msra.mxu1 %v4617_v12  ;;  %v179_v36 = vrot.slane %v5189_v34, %v178_v33  ;;  %s3821_s4 = sshll.u32 %s5036_s30, 4  ;;  %s3822_s4 = int_to_ptr.vmem [resolvable:$true] %s3821_s4 }
   0xc   :  { %4197 = vmatmul.mubr.msk.f32.gmra.mrb[4].mxu0 %vm55_vm0, %v47_v9  ;;  %4625 = vmatprep.subr.bf16.mxu1 %v5026_v35  ;;  %p5007_p1 = scmp.lt.s32.totalorder %s3822_s4, %s3822_s4 }
   0xd   :  { %4222 = vmatprep.mubr.msk.f32.mxu0 %vm5028_vm2, %v5029_v45 }
  0xd7   :  { %v4192_v15 = vpop.f32.mrb[0].mxu0 }
  0xd8   :  { %v140_v16 = vpop.f32.mrb[1].mxu0  ;;  %v5149_v18 = vadd.f32 %v4192_v15, %v50_v14 }
  0xd9   :  { %v5147_v17 = vadd.f32 %v140_v16, %v49_v13 }
  0xdb   :  { %v4195_v21 = vpop.f32.mrb[2].mxu0  ;;  %4207 = vmatprep.mubr.msk.f32.mxu1 %vm180_vm1, %v5147_v17 }
  0xdc   :  { %v150_v22 = vpop.f32.mrb[3].mxu0  ;;  %4208 = vmatmul.mubr.msk.f32.vlgmr.msra.gmra.mrb[0].mxu1 %vm180_vm1, %v5149_v18  ;;  %v5163_v24 = vadd.f32 %v4195_v21, %v52_v20 }
  0xdd   :  { %v5161_v23 = vadd.f32 %v150_v22, %v51_v19 }
  0xdf   :  { %v4198_v27 = vpop.f32.mrb[4].mxu0  ;;  %4210 = vmatprep.mubr.msk.f32.mxu1 %vm180_vm1, %v5161_v23 }
  0xe0   :  { %v160_v28 = vpop.f32.mrb[5].mxu0  ;;  %4211 = vmatmul.mubr.msk.f32.gmra.mrb[2].mxu1 %vm180_vm1, %v5163_v24  ;;  %v5177_v30 = vadd.f32 %v4198_v27, %v54_v26 }
  0xe1   :  { %v5175_v29 = vadd.f32 %v160_v28, %v53_v25 }
  0xe3   :  { %4213 = vmatprep.mubr.msk.f32.mxu1 %vm180_vm1, %v5175_v29 }
  0xe4   :  { %4214 = vmatmul.mubr.msk.f32.gmra.mrb[4].mxu1 %vm180_vm1, %v5177_v30 }
  0xe5   :  { %4237 = vmatprep.mubr.msk.f32.mxu1 %vm5028_vm2, %v5029_v45 }
 0x1af   :  { %v4209_v37 = vpop.f32.mrb[0].mxu1 }
 0x1b0   :  { %v5196_v38 = vadd.f32 %v4209_v37, %v179_v36  ;;  %v265_v39 = vpop.f32.mrb[1].mxu1 }
 0x1b1   :  { %v5198_v40 = vadd.f32 %v265_v39, %v179_v36 }
 0x1b3   :  { %v4212_v41 = vpop.f32.mrb[2].mxu1  ;;  %v5202_v42 = vpack.i.bf16 %v5196_v38, %v5198_v40 }
 0x1b4   :  { %v275_v43 = vpop.f32.mrb[3].mxu1  ;;  %v5216_v49 = vadd.f32 %v4212_v41, %v179_v36 }
 0x1b5   :  { %v5204_v44 = vadd.f32 %v275_v43, %v179_v36  ;;  %4773 = vrot.lane.b32.xlu0 %v5202_v42, %s5027_s17 }
 0x1b7   :  { %v4215_v46 = vpop.f32.mrb[4].mxu1  ;;  %301 = vrot.lane.b32.xlu1 %v5204_v44, %s5027_s17 }
 0x1b8   :  { %v5214_v47 = vadd.f32 %v4215_v46, %v179_v36  ;;  %v285_v48 = vpop.f32.mrb[5].mxu1 }
 0x1b9   :  { %v5218_v50 = vadd.f32 %v285_v48, %v179_v36 }
 0x1bb   :  { %403 = vrot.lane.b32.xlu1 %v5214_v47, %s5027_s17  ;;  %v5224_v51 = vpack.i.bf16 %v5218_v50, %v5216_v49 }
 0x1bd   :  { %4778 = vrot.lane.b32.xlu0 %v5224_v51, %s5027_s17 }
 0x227   :  { %v4774_v52 = vpop.permute.xlu0 %4773 }
 0x228   :  { %v4776_v53 = vunpack.i.h.bf16 %v4774_v52  ;;  %v4775_v54 = vunpack.i.l.bf16 %v4774_v52 }
 0x229   :  { %v302_v61 = vpop.permute.xlu1 %301 }
 0x22a   :  { %v4622_v56 = vpack.c.bf16 %v4776_v53, %v4775_v54 }
 0x22c   :  { %4624 = vmatpush3.bf16.xpose.msk.msra.mxu0 %vm5230_vm4, %v4622_v56 }
 0x22d   :  { %4220 = vmatprep.subr.mxu0 %v5029_v45  ;;  %v404_v62 = vpop.permute.xlu1 %403 }
 0x22f   :  { %v4779_v57 = vpop.permute.xlu0 %4778 }
 0x230   :  { %v4781_v58 = vunpack.i.h.bf16 %v4779_v57  ;;  %v4780_v59 = vunpack.i.l.bf16 %v4779_v57 }
 0x232   :  { %v4626_v60 = vpack.c.bf16 %v4781_v58, %v4780_v59 }
 0x234   :  { %4221 = vmatpush3.xpose.msk.msra.mxu0 %vm303_vm3, %v302_v61  ;;  %4628 = vmatpush3.bf16.xpose.msk.msra.mxu1 %vm5230_vm4, %v4626_v60 }
 0x235   :  { %4235 = vmatprep.subr.mxu1 %v5029_v45  ;;  %4629 = vmatprep.subr.bf16.mxu0 %v5026_v35 }
 0x237   :  { %4223 = vmatmul.mubr.msk.f32.vlgmr.msra.gmra.mrb[6].mxu0 %vm303_vm3, %v5198_v40 }
 0x238   :  { %4225 = vmatprep.mubr.msk.f32.mxu0 %vm5028_vm2, %v5029_v45 }
 0x23b   :  { %4226 = vmatmul.mubr.msk.f32.gmra.mrb[8].mxu0 %vm303_vm3, %v5196_v38 }
 0x23c   :  { %4236 = vmatpush3.xpose.msk.msra.mxu1 %vm303_vm3, %v404_v62  ;;  %4228 = vmatprep.mubr.msk.f32.mxu0 %vm5028_vm2, %v5029_v45 }
 0x23d   :  { %4632 = vmatprep.subr.bf16.mxu1 %v5026_v35 }
 0x23f   :  { %4229 = vmatmul.mubr.msk.f32.gmra.mrb[10].mxu0 %vm303_vm3, %v5204_v44  ;;  %4238 = vmatmul.mubr.msk.f32.vlgmr.msra.gmra.mrb[6].mxu1 %vm303_vm3, %v5216_v49 }
 0x240   :  { %4240 = vmatprep.mubr.msk.f32.mxu1 %vm5028_vm2, %v5029_v45  ;;  %4252 = vmatprep.mubr.msk.f32.mxu0 %vm5028_vm2, %v5029_v45 }
 0x243   :  { %4241 = vmatmul.mubr.msk.f32.gmra.mrb[8].mxu1 %vm303_vm3, %v5218_v50 }
 0x244   :  { %4243 = vmatprep.mubr.msk.f32.mxu1 %vm5028_vm2, %v5029_v45 }
 0x247   :  { %4244 = vmatmul.mubr.msk.f32.gmra.mrb[10].mxu1 %vm303_vm3, %v5214_v47 }
 0x248   :  { %4267 = vmatprep.mubr.msk.f32.mxu1 %vm5028_vm2, %v5029_v45 }
 0x30a   :  { %v382_v63 = vpop.f32.mrb[6].mxu0 }
 0x30b   :  { %v497_v1 = vmul.f32 0.25, %v382_v63  ;;  %v4224_v2 = vpop.f32.mrb[7].mxu0 }
 0x30d   :  { %v515_v3 = vadd.f32 %v5271_v0, %v497_v1 }
 0x30e   :  { %v387_v4 = vpop.f32.mrb[8].mxu0 }
 0x30f   :  { %v498_v5 = vmul.f32 0.25, %v387_v4  ;;  %v4227_v6 = vpop.f32.mrb[9].mxu0  ;;  %v522_v7 = vsel %vm521_vm5, %v515_v3, -inf }
 0x310   :  { %523 = vmax.xlane.f32.xlu0 %v522_v7 }
 0x311   :  { %v516_v8 = vadd.f32 %v5271_v0, %v498_v5 }
 0x312   :  { %v392_v9 = vpop.f32.mrb[10].mxu0  ;;  %v483_v10 = vpop.f32.mrb[6].mxu1 }
 0x313   :  { %v499_v12 = vmul.f32 0.25, %v392_v9  ;;  %v500_v13 = vmul.f32 0.25, %v483_v10  ;;  %v4230_v14 = vpop.f32.mrb[11].mxu0  ;;  %v4239_v15 = vpop.f32.mrb[7].mxu1  ;;  %v525_v16 = vsel %vm521_vm5, %v516_v8, -inf }
 0x314   :  { %526 = vmax.xlane.f32.xlu1 %v525_v16 }
 0x315   :  { %v518_v19 = vadd.f32 %v5279_v11, %v500_v13  ;;  %v517_v26 = vadd.f32 %v5271_v0, %v499_v12 }
 0x316   :  { %v488_v20 = vpop.f32.mrb[8].mxu1 }
 0x317   :  { %v501_v21 = vmul.f32 0.25, %v488_v20  ;;  %v4242_v22 = vpop.f32.mrb[9].mxu1  ;;  %v531_v25 = vsel %vm521_vm5, %v518_v19, -inf  ;;  %v528_v37 = vsel %vm521_vm5, %v517_v26, -inf }
 0x318   :  { %532 = vmax.xlane.f32.xlu0 %v531_v25 }
 0x319   :  { %v519_v27 = vadd.f32 %v5279_v11, %v501_v21 }
 0x31a   :  { %v493_v28 = vpop.f32.mrb[10].mxu1 }
 0x31b   :  { %v4245_v31 = vpop.f32.mrb[11].mxu1  ;;  %v534_v36 = vsel %vm521_vm5, %v519_v27, -inf  ;;  %v502_v39 = vmul.f32 0.25, %v493_v28 }
 0x31c   :  { %535 = vmax.xlane.f32.xlu1 %v534_v36  ;;  %529 = vmax.xlane.f32.xlu0 %v528_v37 }
 0x31d   :  { %v5303_v41 = vadd.f32 %v5279_v11, %v502_v39 }
 0x31f   :  { %v537_v43 = vsel %vm521_vm5, %v5303_v41, -inf }
 0x32d   :  { %4783 = vrot.lane.b32.xlu1 %v5202_v42, %s5030_s22 }
 0x331   :  { %592 = vrot.lane.b32.xlu1 %v5204_v44, %s5030_s22 }
 0x332   :  { %4788 = vrot.lane.b32.xlu0 %v5224_v51, %s5030_s22 }
 0x335   :  { %690 = vrot.lane.b32.xlu1 %v5214_v47, %s5030_s22 }
 0x336   :  { %4793 = vrot.lane.b32.xlu0 %v5202_v42, %s5031_s23 }
 0x339   :  { %4798 = vrot.lane.b32.xlu1 %v5224_v51, %s5031_s23 }
 0x33d   :  { %784 = vrot.lane.b32.xlu1 %v5198_v40, %s5032_s24 }
 0x355   :  { %538 = vmax.xlane.f32.xlu0 %v537_v43 }
 0x36b   :  { %794 = vrot.lane.b32.xlu0 %v5204_v44, %s5031_s23 }
 0x39d   :  { %v524_v46 = vpop.xlane.xlu0 %523 }
 0x39e   :  { %v540_v48 = vsub.f32 %v515_v3, %v524_v46 }
 0x3a0   :  { %v546_v52 = vmul.f32 1.442695, %v540_v48 }
 0x3a1   :  { %v527_v53 = vpop.xlane.xlu1 %526 }
 0x3a2   :  { %4854 = vpow2.f32 %v546_v52  ;;  %v541_v54 = vsub.f32 %v516_v8, %v527_v53 }
 0x3a4   :  { %v548_v56 = vmul.f32 1.442695, %v541_v54 }
 0x3a5   :  { %v533_v57 = vpop.xlane.xlu0 %532 }
 0x3a6   :  { %4856 = vpow2.f32 %v548_v56  ;;  %v543_v40 = vsub.f32 %v518_v19, %v533_v57 }
 0x3a8   :  { %v552_v58 = vmul.f32 1.442695, %v543_v40 }
 0x3a9   :  { %v536_v59 = vpop.xlane.xlu1 %535  ;;  %v530_v60 = vpop.xlane.xlu0 %529 }
 0x3aa   :  { %4858 = vpow2.f32 %v552_v58  ;;  %v544_v61 = vsub.f32 %v519_v27, %v536_v59  ;;  %v542_v62 = vsub.f32 %v517_v26, %v530_v60 }
 0x3ac   :  { %v5309_v63 = vpop.eup %4854  ;;  %v554_v1 = vmul.f32 1.442695, %v544_v61  ;;  %v550_v2 = vmul.f32 1.442695, %v542_v62 }
 0x3ad   :  { %v4784_v4 = vpop.permute.xlu1 %4783  ;;  %v4789_v3 = vpop.permute.xlu0 %4788  ;;  %v558_v5 = vsel %vm521_vm5, %v5309_v63, 0.0 }
 0x3ae   :  { %4860 = vpow2.f32 %v554_v1  ;;  %v4786_v6 = vunpack.i.h.bf16 %v4784_v4  ;;  %v4785_v7 = vunpack.i.l.bf16 %v4784_v4  ;;  %v4791_v8 = vunpack.i.h.bf16 %v4789_v3  ;;  %559 = vadd.xlane.f32.xlu1 %v558_v5 }
 0x3af   :  { %4862 = vpow2.f32 %v550_v2  ;;  %v4790_v9 = vunpack.i.l.bf16 %v4789_v3 }
 0x3b0   :  { %v4857_v10 = vpop.eup %4856  ;;  %v4630_v12 = vpack.c.bf16 %v4786_v6, %v4785_v7 }
 0x3b1   :  { %v4633_v13 = vpack.c.bf16 %v4791_v8, %v4790_v9  ;;  %v593_v14 = vpop.permute.xlu1 %592  ;;  %v561_v15 = vsel %vm521_vm5, %v4857_v10, 0.0  ;;  %v4794_v27 = vpop.permute.xlu0 %4793 }
 0x3b2   :  { %4631 = vmatpush3.bf16.msra.mxu0 %v4630_v12  ;;  %562 = vadd.xlane.f32.xlu0 %v561_v15  ;;  %v4796_v53 = vunpack.i.h.bf16 %v4794_v27  ;;  %v4795_v54 = vunpack.i.l.bf16 %v4794_v27 }
 0x3b3   :  { %4634 = vmatpush3.bf16.msra.mxu1 %v4633_v13  ;;  %4250 = vmatprep.subr.mxu0 %v5029_v45 }
 0x3b4   :  { %v4859_v16 = vpop.eup %4858  ;;  %4265 = vmatprep.subr.mxu1 %v5029_v45  ;;  %v4636_v58 = vpack.c.bf16 %v4796_v53, %v4795_v54 }
 0x3b5   :  { %v691_v19 = vpop.permute.xlu1 %690  ;;  %v567_v20 = vsel %vm521_vm5, %v4859_v16, 0.0 }
 0x3b6   :  { %568 = vadd.xlane.f32.xlu1 %v567_v20  ;;  %4251 = vmatpush3.msra.mxu0 %v593_v14 }
 0x3b7   :  { %4266 = vmatpush3.msra.mxu1 %v691_v19  ;;  %4635 = vmatprep.subr.bf16.mxu0 %v5026_v35 }
 0x3b8   :  { %v4861_v21 = vpop.eup %4860  ;;  %4639 = vmatprep.subr.bf16.mxu1 %v5026_v35 }
 0x3b9   :  { %v4863_v22 = vpop.eup %4862  ;;  %v570_v25 = vsel %vm521_vm5, %v4861_v21, 0.0  ;;  %v4799_v39 = vpop.permute.xlu1 %4798 }
 0x3ba   :  { %571 = vadd.xlane.f32.xlu1 %v570_v25  ;;  %v564_v26 = vsel %vm521_vm5, %v4863_v22, 0.0  ;;  %v4801_v60 = vunpack.i.h.bf16 %v4799_v39  ;;  %v4800_v61 = vunpack.i.l.bf16 %v4799_v39 }
 0x3bb   :  { %565 = vadd.xlane.f32.xlu0 %v564_v26 }
 0x3bc   :  { %v4640_v1 = vpack.c.bf16 %v4801_v60, %v4800_v61 }
 0x3bd   :  { %v785_v43 = vpop.permute.xlu1 %784 }
 0x3cb   :  { %786 = vrot.lane.b32.xlu1 %v5196_v38, %s5032_s24 }
 0x3cf   :  { %788 = vrot.lane.b32.xlu1 %v5204_v44, %s5032_s24 }
 0x3d1   :  { %898 = vrot.lane.b32.xlu0 %v5214_v47, %s5031_s23 }
 0x3d3   :  { %892 = vrot.lane.b32.xlu1 %v5214_v47, %s5032_s24 }
 0x3e2   :  { %v539_v28 = vpop.xlane.xlu0 %538 }
 0x3e3   :  { %v545_v31 = vsub.f32 %v5303_v41, %v539_v28 }
 0x3e5   :  { %v556_v36 = vmul.f32 1.442695, %v545_v31 }
 0x3e6   :  { %v795_v46 = vpop.permute.xlu0 %794 }
 0x3e7   :  { %4864 = vpow2.f32 %v556_v36 }
 0x3f1   :  { %v5330_v37 = vpop.eup %4864 }
 0x3f2   :  { %v573_v38 = vsel %vm521_vm5, %v5330_v37, 0.0 }
 0x3f3   :  { %574 = vadd.xlane.f32.xlu0 %v573_v38 }
 0x409   :  { %888 = vrot.lane.b32.xlu0 %v5216_v49, %s5032_s24 }
 0x40d   :  { %890 = vrot.lane.b32.xlu0 %v5218_v50, %s5032_s24 }
 0x43b   :  { %v560_v48 = vpop.xlane.xlu1 %559 }
 0x43c   :  { %4866 = vrcp.f32 %v560_v48 }
 0x43f   :  { %v563_v41 = vpop.xlane.xlu0 %562 }
 0x440   :  { %4868 = vrcp.f32 %v563_v41 }
 0x443   :  { %v569_v52 = vpop.xlane.xlu1 %568 }
 0x444   :  { %4870 = vrcp.f32 %v569_v52 }
 0x446   :  { %v4867_v56 = vpop.eup %4866 }
 0x447   :  { %v582_v57 = vmul.f32 %v4867_v56, %v5309_v63  ;;  %v572_v40 = vpop.xlane.xlu1 %571 }
 0x448   :  { %4872 = vrcp.f32 %v572_v40  ;;  %v566_v49 = vpop.xlane.xlu0 %565 }
 0x449   :  { %4874 = vrcp.f32 %v566_v49  ;;  %4253 = vmatmul.mubr.msk.f32.vlgmr.msra.gmra.mrb[12].mxu0 %vm521_vm5, %v582_v57 }
 0x44a   :  { %v4869_v50 = vpop.eup %4868  ;;  %4638 = vmatpush3.bf16.xpose.msk.msra.mxu0 %vm5230_vm4, %v4636_v58  ;;  %4255 = vmatprep.mubr.msk.f32.mxu0 %vm5028_vm2, %v5029_v45 }
 0x44b   :  { %v583_v59 = vmul.f32 %v4869_v50, %v4857_v10  ;;  %4280 = vmatprep.subr.mxu0 %v5029_v45  ;;  %v787_v7 = vpop.permute.xlu1 %786 }
 0x44c   :  { %v899_v6 = vpop.permute.xlu0 %898 }
 0x44d   :  { %4256 = vmatmul.mubr.msk.f32.gmra.mrb[14].mxu0 %vm521_vm5, %v583_v59 }
 0x44e   :  { %v4871_v62 = vpop.eup %4870  ;;  %4258 = vmatprep.mubr.msk.f32.mxu0 %vm5028_vm2, %v5029_v45 }
 0x44f   :  { %v585_v63 = vmul.f32 %v4871_v62, %v4859_v16  ;;  %v789_v8 = vpop.permute.xlu1 %788 }
 0x451   :  { %4268 = vmatmul.mubr.msk.f32.vlgmr.msra.gmra.mrb[12].mxu1 %vm521_vm5, %v585_v63 }
 0x452   :  { %v4873_v2 = vpop.eup %4872  ;;  %4281 = vmatpush3.xpose.msk.msra.mxu0 %vm303_vm3, %v795_v46  ;;  %4642 = vmatpush3.bf16.xpose.msk.msra.mxu1 %vm5230_vm4, %v4640_v1 }
 0x453   :  { %v4875_v4 = vpop.eup %4874  ;;  %4270 = vmatprep.mubr.msk.f32.mxu1 %vm5028_vm2, %v5029_v45  ;;  %v586_v3 = vmul.f32 %v4873_v2, %v4861_v21  ;;  %4295 = vmatprep.subr.mxu1 %v5029_v45  ;;  %v893_v15 = vpop.permute.xlu1 %892 }
 0x454   :  { %v584_v5 = vmul.f32 %v4875_v4, %v4863_v22  ;;  %4643 = vmatprep.subr.bf16.mxu0 %v5026_v35 }
 0x455   :  { %4271 = vmatmul.mubr.msk.f32.gmra.mrb[14].mxu1 %vm521_vm5, %v586_v3 }
 0x456   :  { %4259 = vmatmul.mubr.msk.f32.gmra.mrb[16].mxu0 %vm521_vm5, %v584_v5  ;;  %4273 = vmatprep.mubr.msk.f32.mxu1 %vm5028_vm2, %v5029_v45 }
 0x457   :  { %4282 = vmatprep.mubr.msk.f32.mxu0 %vm5028_vm2, %v5029_v45 }
 0x45a   :  { %4283 = vmatmul.mubr.msk.f32.vlgmr.msra.gmra.mrb[18].mxu0 %vm303_vm3, %v785_v43  ;;  %4296 = vmatpush3.xpose.msk.msra.mxu1 %vm303_vm3, %v899_v6 }
 0x45b   :  { %4285 = vmatprep.mubr.msk.f32.mxu0 %vm5028_vm2, %v5029_v45  ;;  %4646 = vmatprep.subr.bf16.mxu1 %v5026_v35 }
 0x45e   :  { %4286 = vmatmul.mubr.msk.f32.gmra.mrb[20].mxu0 %vm303_vm3, %v787_v7 }
 0x45f   :  { %4288 = vmatprep.mubr.msk.f32.mxu0 %vm5028_vm2, %v5029_v45 }
 0x462   :  { %4289 = vmatmul.mubr.msk.f32.gmra.mrb[22].mxu0 %vm303_vm3, %v789_v8 }
 0x463   :  { %4312 = vmatprep.mubr.msk.f32.mxu0 %vm5028_vm2, %v5029_v45 }
 0x480   :  { %v575_v9 = vpop.xlane.xlu0 %574 }
 0x481   :  { %4876 = vrcp.f32 %v575_v9 }
 0x484   :  { %v889_v13 = vpop.permute.xlu0 %888 }
 0x488   :  { %v891_v14 = vpop.permute.xlu0 %890 }
 0x48b   :  { %v4877_v10 = vpop.eup %4876 }
 0x48c   :  { %v587_v12 = vmul.f32 %v4877_v10, %v5330_v37 }
 0x48e   :  { %4274 = vmatmul.mubr.msk.f32.gmra.mrb[16].mxu1 %vm521_vm5, %v587_v12 }
 0x48f   :  { %4297 = vmatprep.mubr.msk.f32.mxu1 %vm5028_vm2, %v5029_v45 }
 0x492   :  { %4298 = vmatmul.mubr.msk.f32.vlgmr.msra.gmra.mrb[18].mxu1 %vm303_vm3, %v889_v13 }
 0x493   :  { %4300 = vmatprep.mubr.msk.f32.mxu1 %vm5028_vm2, %v5029_v45 }
 0x496   :  { %4301 = vmatmul.mubr.msk.f32.gmra.mrb[20].mxu1 %vm303_vm3, %v891_v14 }
 0x497   :  { %4303 = vmatprep.mubr.msk.f32.mxu1 %vm5028_vm2, %v5029_v45 }
 0x49a   :  { %4304 = vmatmul.mubr.msk.f32.gmra.mrb[22].mxu1 %vm303_vm3, %v893_v15 }
 0x49b   :  { %4327 = vmatprep.mubr.msk.f32.mxu1 %vm5028_vm2, %v5029_v45 }
 0x51c   :  { %v5386_v16 = vpop.f32.mrb[12].mxu0 }
 0x51d   :  { %v4254_v19 = vpop.f32.mrb[13].mxu0 }
 0x520   :  { %v5388_v20 = vpop.f32.mrb[14].mxu0 }
 0x521   :  { %v4257_v21 = vpop.f32.mrb[15].mxu0 }
 0x524   :  { %v5390_v22 = vpop.f32.mrb[12].mxu1 }
 0x525   :  { %v4269_v25 = vpop.f32.mrb[13].mxu1 }
 0x528   :  { %v5392_v26 = vpop.f32.mrb[14].mxu1 }
 0x529   :  { %v5394_v27 = vpop.f32.mrb[16].mxu0  ;;  %v4272_v28 = vpop.f32.mrb[15].mxu1 }
 0x52a   :  { %v4260_v31 = vpop.f32.mrb[17].mxu0 }
 0x52d   :  { %v874_v36 = vpop.f32.mrb[18].mxu0 }
 0x52e   :  { %v992_v37 = vmul.f32 0.25, %v874_v36  ;;  %v4284_v38 = vpop.f32.mrb[19].mxu0 }
 0x530   :  { %v998_v39 = vadd.f32 %v5271_v0, %v992_v37 }
 0x531   :  { %v879_v43 = vpop.f32.mrb[20].mxu0 }
 0x532   :  { %v993_v46 = vmul.f32 0.25, %v879_v43  ;;  %v4287_v48 = vpop.f32.mrb[21].mxu0  ;;  %v1004_v41 = vsel %vm521_vm5, %v998_v39, -inf }
 0x533   :  { %1005 = vmax.xlane.f32.xlu0 %v1004_v41 }
 0x534   :  { %v999_v52 = vadd.f32 %v5271_v0, %v993_v46 }
 0x535   :  { %v884_v53 = vpop.f32.mrb[22].mxu0 }
 0x536   :  { %v4290_v54 = vpop.f32.mrb[23].mxu0  ;;  %v1007_v56 = vsel %vm521_vm5, %v999_v52, -inf  ;;  %v994_v49 = vmul.f32 0.25, %v884_v53 }
 0x537   :  { %1008 = vmax.xlane.f32.xlu1 %v1007_v56 }
 0x538   :  { %v1000_v2 = vadd.f32 %v5271_v0, %v994_v49 }
 0x53a   :  { %v1010_v8 = vsel %vm521_vm5, %v1000_v2, -inf }
 0x561   :  { %v5400_v57 = vpop.f32.mrb[16].mxu1 }
 0x562   :  { %v4275_v40 = vpop.f32.mrb[17].mxu1 }
 0x565   :  { %v978_v58 = vpop.f32.mrb[18].mxu1 }
 0x566   :  { %v995_v50 = vmul.f32 0.25, %v978_v58  ;;  %v4299_v59 = vpop.f32.mrb[19].mxu1 }
 0x568   :  { %v1001_v60 = vadd.f32 %v5279_v11, %v995_v50 }
 0x569   :  { %v983_v61 = vpop.f32.mrb[20].mxu1 }
 0x56a   :  { %v996_v62 = vmul.f32 0.25, %v983_v61  ;;  %v4302_v63 = vpop.f32.mrb[21].mxu1  ;;  %v1013_v1 = vsel %vm521_vm5, %v1001_v60, -inf }
 0x56b   :  { %1014 = vmax.xlane.f32.xlu0 %v1013_v1 }
 0x56c   :  { %v1002_v4 = vadd.f32 %v5279_v11, %v996_v62 }
 0x56d   :  { %v988_v3 = vpop.f32.mrb[22].mxu1 }
 0x56e   :  { %v997_v5 = vmul.f32 0.25, %v988_v3  ;;  %v4305_v6 = vpop.f32.mrb[23].mxu1  ;;  %v1016_v7 = vsel %vm521_vm5, %v1002_v4, -inf }
 0x56f   :  { %1017 = vmax.xlane.f32.xlu1 %v1016_v7  ;;  %1011 = vmax.xlane.f32.xlu0 %v1010_v8 }
 0x570   :  { %v1003_v9 = vadd.f32 %v5279_v11, %v997_v5 }
 0x572   :  { %v1019_v10 = vsel %vm521_vm5, %v1003_v9, -inf }
 0x573   :  { %1020 = vmax.xlane.f32.xlu0 %v1019_v10 }
 0x580   :  { %4803 = vrot.lane.b32.xlu1 %v5202_v42, %s5033_s25 }
 0x5c0   :  { %v1006_v0 = vpop.xlane.xlu0 %1005 }
 0x5c1   :  { %v1022_v12 = vsub.f32 %v998_v39, %v1006_v0 }
 0x5c3   :  { %v1028_v13 = vmul.f32 1.442695, %v1022_v12 }
 0x5c4   :  { %v1009_v14 = vpop.xlane.xlu1 %1008 }
 0x5c5   :  { %4878 = vpow2.f32 %v1028_v13  ;;  %v1023_v15 = vsub.f32 %v999_v52, %v1009_v14 }
 0x5c7   :  { %v1030_v19 = vmul.f32 1.442695, %v1023_v15 }
 0x5c9   :  { %4880 = vpow2.f32 %v1030_v19 }
 0x5cf   :  { %v4879_v21 = vpop.eup %4878 }
 0x5d0   :  { %v1040_v25 = vsel %vm521_vm5, %v4879_v21, 0.0 }
 0x5d1   :  { %1041 = vadd.xlane.f32.xlu1 %v1040_v25 }
 0x5d3   :  { %v4881_v11 = vpop.eup %4880 }
 0x5d4   :  { %v1043_v28 = vsel %vm521_vm5, %v4881_v11, 0.0 }
 0x5d5   :  { %1044 = vadd.xlane.f32.xlu0 %v1043_v28 }
 0x5f8   :  { %v1015_v31 = vpop.xlane.xlu0 %1014 }
 0x5f9   :  { %v1025_v36 = vsub.f32 %v1001_v60, %v1015_v31 }
 0x5fb   :  { %v1034_v37 = vmul.f32 1.442695, %v1025_v36 }
 0x5fc   :  { %v1018_v42 = vpop.xlane.xlu1 %1017  ;;  %v1012_v38 = vpop.xlane.xlu0 %1011 }
 0x5fd   :  { %4882 = vpow2.f32 %v1034_v37  ;;  %v1026_v39 = vsub.f32 %v1002_v4, %v1018_v42  ;;  %v1024_v43 = vsub.f32 %v1000_v2, %v1012_v38  ;;  %v1296_v37 = vld [vmem:[%s6260_s6] sm:$0xff]  ;;  %v1297_v42 = vld [vmem:[%s6260_s6 + $0x8] sm:$0xff] }
 0x5fe   :  { %v4649_v38 = vpack.c.bf16 %v1297_v42, %v1296_v37 }
 0x5ff   :  { %v1036_v46 = vmul.f32 1.442695, %v1026_v39  ;;  %v1032_v48 = vmul.f32 1.442695, %v1024_v43  ;;  %v1298_v39 = vld [vmem:[%s6260_s6 + $0x10] sm:$0xff]  ;;  %v1299_v43 = vld [vmem:[%s6260_s6 + $0x18] sm:$0xff] }
 0x600   :  { %v4804_v41 = vpop.permute.xlu1 %4803  ;;  %v1021_v52 = vpop.xlane.xlu0 %1020 }
 0x601   :  { %4884 = vpow2.f32 %v1036_v46  ;;  %v4806_v53 = vunpack.i.h.bf16 %v4804_v41  ;;  %v4805_v54 = vunpack.i.l.bf16 %v4804_v41  ;;  %v1027_v56 = vsub.f32 %v1003_v9, %v1021_v52 }
 0x602   :  { %4886 = vpow2.f32 %v1032_v48  ;;  %v4653_v46 = vpack.c.bf16 %v1299_v43, %v1298_v39 }
 0x603   :  { %v4644_v40 = vpack.c.bf16 %v4806_v53, %v4805_v54  ;;  %v1038_v58 = vmul.f32 1.442695, %v1027_v56 }
 0x605   :  { %4888 = vpow2.f32 %v1038_v58  ;;  %4645 = vmatpush3.bf16.msra.mxu0 %v4644_v40 }
 0x606   :  { %4310 = vmatprep.subr.mxu0 %v5029_v45 }
 0x607   :  { %v4883_v49 = vpop.eup %4882 }
 0x608   :  { %v1049_v50 = vsel %vm521_vm5, %v4883_v49, 0.0 }
 0x609   :  { %1050 = vadd.xlane.f32.xlu1 %v1049_v50 }
 0x60b   :  { %v4885_v59 = vpop.eup %4884 }
 0x60c   :  { %v4887_v60 = vpop.eup %4886  ;;  %v1052_v61 = vsel %vm521_vm5, %v4885_v59, 0.0 }
 0x60d   :  { %1053 = vadd.xlane.f32.xlu1 %v1052_v61  ;;  %v1046_v62 = vsel %vm521_vm5, %v4887_v60, 0.0 }
 0x60e   :  { %1047 = vadd.xlane.f32.xlu0 %v1046_v62 }
 0x60f   :  { %v4889_v63 = vpop.eup %4888 }
 0x610   :  { %v1055_v1 = vsel %vm521_vm5, %v4889_v63, 0.0 }
 0x612   :  { %1056 = vadd.xlane.f32.xlu0 %v1055_v1 }
 0x61e   :  { %1074 = vrot.lane.b32.xlu1 %v5204_v44, %s5033_s25 }
 0x622   :  { %1172 = vrot.lane.b32.xlu1 %v5214_v47, %s5033_s25 }
 0x628   :  { %4808 = vrot.lane.b32.xlu0 %v5224_v51, %s5033_s25 }
 0x65e   :  { %v1042_v2 = vpop.xlane.xlu1 %1041 }
 0x65f   :  { %4890 = vrcp.f32 %v1042_v2 }
 0x662   :  { %v1045_v4 = vpop.xlane.xlu0 %1044 }
 0x663   :  { %4892 = vrcp.f32 %v1045_v4 }
 0x669   :  { %v4891_v6 = vpop.eup %4890 }
 0x66a   :  { %v1064_v8 = vmul.f32 %v4891_v6, %v4879_v21 }
 0x66d   :  { %v4893_v10 = vpop.eup %4892 }
 0x66e   :  { %v1065_v47 = vmul.f32 %v4893_v10, %v4881_v11 }
 0x696   :  { %v1051_v3 = vpop.xlane.xlu1 %1050 }
 0x69a   :  { %v1054_v5 = vpop.xlane.xlu1 %1053 }
 0x69b   :  { %v1048_v7 = vpop.xlane.xlu0 %1047 }
 0x69c   :  { %4894 = vrcp.f32 %v1048_v7 }
 0x69d   :  { %4896 = vrcp.f32 %v1051_v3 }
 0x69e   :  { %v1075_v9 = vpop.permute.xlu1 %1074  ;;  %4898 = vrcp.f32 %v1054_v5 }
 0x69f   :  { %v1057_v44 = vpop.xlane.xlu0 %1056  ;;  %4311 = vmatpush3.msra.mxu0 %v1075_v9 }
 0x6a0   :  { %4313 = vmatmul.mubr.msk.f32.vlgmr.msra.gmra.mrb[24].mxu0 %vm521_vm5, %v1064_v8  ;;  %4900 = vrcp.f32 %v1057_v44  ;;  %4650 = vmatprep.subr.bf16.mxu0 %v4649_v38 }
 0x6a1   :  { %4315 = vmatprep.mubr.msk.f32.mxu0 %vm5028_vm2, %v5029_v45  ;;  %4652 = vmatpush3.bf16.msra.mxu0 %v4649_v38 }
 0x6a2   :  { %v1173_v25 = vpop.permute.xlu1 %1172  ;;  %4654 = vmatprep.subr.bf16.mxu0 %v4653_v46 }
 0x6a3   :  { %v4809_v51 = vpop.permute.xlu0 %4808 }
 0x6a4   :  { %v4811_v0 = vunpack.i.h.bf16 %v4809_v51  ;;  %v4810_v12 = vunpack.i.l.bf16 %v4809_v51  ;;  %4316 = vmatmul.mubr.msk.f32.gmra.mrb[26].mxu0 %vm521_vm5, %v1065_v47 }
 0x6a5   :  { %4318 = vmatprep.mubr.msk.f32.mxu0 %vm5028_vm2, %v5029_v45  ;;  %4656 = vmatpush3.bf16.msra.mxu0 %v4653_v46 }
 0x6a6   :  { %v4895_v13 = vpop.eup %4894  ;;  %v4647_v14 = vpack.c.bf16 %v4811_v0, %v4810_v12 }
 0x6a7   :  { %v1066_v15 = vmul.f32 %v4895_v13, %v4887_v60  ;;  %v4897_v19 = vpop.eup %4896 }
 0x6a8   :  { %4648 = vmatpush3.bf16.msra.mxu1 %v4647_v14  ;;  %v1067_v21 = vmul.f32 %v4897_v19, %v4883_v49  ;;  %v4899_v11 = vpop.eup %4898 }
 0x6a9   :  { %4319 = vmatmul.mubr.msk.f32.gmra.mrb[28].mxu0 %vm521_vm5, %v1066_v15  ;;  %4325 = vmatprep.subr.mxu1 %v5029_v45  ;;  %v1068_v28 = vmul.f32 %v4899_v11, %v4885_v59 }
 0x6aa   :  { %v4901_v31 = vpop.eup %4900 }
 0x6ab   :  { %v1069_v36 = vmul.f32 %v4901_v31, %v4889_v63 }
 0x6ac   :  { %4326 = vmatpush3.msra.mxu1 %v1173_v25 }
 0x6ad   :  { %4328 = vmatmul.mubr.msk.f32.vlgmr.msra.gmra.mrb[24].mxu1 %vm521_vm5, %v1067_v21 }
 0x6ae   :  { %4330 = vmatprep.mubr.msk.f32.mxu1 %vm5028_vm2, %v5029_v45 }
 0x6b1   :  { %4331 = vmatmul.mubr.msk.f32.gmra.mrb[26].mxu1 %vm521_vm5, %v1068_v28 }
 0x6b2   :  { %4333 = vmatprep.mubr.msk.f32.mxu1 %vm5028_vm2, %v5029_v45 }
 0x6b5   :  { %4334 = vmatmul.mubr.msk.f32.gmra.mrb[28].mxu1 %vm521_vm5, %v1069_v36 }
 0x773   :  { %v1154_v48 = vpop.f32.mrb[24].mxu0 }
 0x774   :  { %1272 = vrot.lane.b32.xlu0 %v1154_v48, %s5034_s14  ;;  %v4314_v41 = vpop.f32.mrb[25].mxu0 }
 0x777   :  { %v1159_v52 = vpop.f32.mrb[26].mxu0 }
 0x778   :  { %1274 = vrot.lane.b32.xlu1 %v1159_v52, %s5034_s14  ;;  %v4317_v53 = vpop.f32.mrb[27].mxu0 }
 0x77c   :  { %v1164_v54 = vpop.f32.mrb[28].mxu0 }
 0x77d   :  { %1276 = vrot.lane.b32.xlu0 %v1164_v54, %s5034_s14  ;;  %v4320_v56 = vpop.f32.mrb[29].mxu0 }
 0x780   :  { %v1252_v40 = vpop.f32.mrb[24].mxu1 }
 0x781   :  { %v4329_v58 = vpop.f32.mrb[25].mxu1  ;;  %1278 = vrot.lane.b32.xlu1 %v1252_v40, %s5034_s14 }
 0x784   :  { %v1257_v49 = vpop.f32.mrb[26].mxu1 }
 0x785   :  { %v4332_v50 = vpop.f32.mrb[27].mxu1  ;;  %1280 = vrot.lane.b32.xlu0 %v1257_v49, %s5034_s14 }
 0x788   :  { %v1262_v59 = vpop.f32.mrb[28].mxu1 }
 0x789   :  { %v4335_v60 = vpop.f32.mrb[29].mxu1  ;;  %1282 = vrot.lane.b32.xlu1 %v1262_v59, %s5034_s14 }
 0x7e6   :  { %v1273_v61 = vpop.permute.xlu0 %1272 }
 0x7e7   :  { %v1290_v62 = vsel %vm303_vm3, %v5386_v16, %v1273_v61 }
 0x7e8   :  { %4344 = vmatprep.mubr.msk.f32.mxu0 %vm180_vm1, %v1290_v62 }
 0x7ea   :  { %v1275_v63 = vpop.permute.xlu1 %1274 }
 0x7eb   :  { %v1291_v1 = vsel %vm303_vm3, %v5388_v20, %v1275_v63 }
 0x7ec   :  { %4345 = vmatmul.mubr.msk.f32.vlgmr.msra.gmra.mrb[30].mxu0 %vm180_vm1, %v1291_v1 }
 0x7ef   :  { %v1277_v2 = vpop.permute.xlu0 %1276 }
 0x7f0   :  { %v1292_v4 = vsel %vm303_vm3, %v5394_v27, %v1277_v2  ;;  %v1302_v27 = vsub.s32 1, %v5183_v32 }
 0x7f1   :  { %4347 = vmatprep.mubr.msk.f32.mxu0 %vm180_vm1, %v1292_v4 }
 0x7f3   :  { %v1279_v3 = vpop.permute.xlu1 %1278 }
 0x7f4   :  { %v1293_v5 = vsel %vm303_vm3, %v5390_v22, %v1279_v3  ;;  %v1303_v22 = vrot.slane %v5189_v34, %v1302_v27 }
 0x7f5   :  { %4348 = vmatmul.mubr.msk.f32.gmra.mrb[32].mxu0 %vm180_vm1, %v1293_v5 }
 0x7f7   :  { %v1281_v16 = vpop.permute.xlu0 %1280 }
 0x7f8   :  { %v1294_v6 = vsel %vm303_vm3, %v5392_v26, %v1281_v16 }
 0x7f9   :  { %4350 = vmatprep.mubr.msk.f32.mxu0 %vm180_vm1, %v1294_v6  ;;  %v1522_v6 = vld [vmem:[%s6261_s7] sm:$0xff] }
 0x7fb   :  { %v1283_v20 = vpop.permute.xlu1 %1282 }
 0x7fc   :  { %v1295_v7 = vsel %vm303_vm3, %v5400_v57, %v1283_v20  ;;  %v1523_v20 = vld [vmem:[%s6261_s7 + $0x8] sm:$0xff] }
 0x7fd   :  { %4351 = vmatmul.mubr.msk.f32.gmra.mrb[34].mxu0 %vm180_vm1, %v1295_v7  ;;  %v4657_v7 = vpack.c.bf16 %v1523_v20, %v1522_v6 }
 0x7ff   :  { %4658 = vmatprep.subr.bf16.mxu1 %v4657_v7 }
 0x800   :  { %4660 = vmatpush3.bf16.msra.mxu1 %v4657_v7 }
 0x8bf   :  { %v4346_v8 = vpop.f32.mrb[30].mxu0 }
 0x8c0   :  { %v1394_v9 = vadd.f32 %v4346_v8, %v1303_v22  ;;  %v1388_v10 = vpop.f32.mrb[31].mxu0  ;;  %v1525_v8 = vld [vmem:[%s6261_s7 + $0x18] sm:$0xff] }
 0x8c1   :  { %v1389_v44 = vadd.f32 %v1388_v10, %v1303_v22  ;;  %v1649_v10 = vld [vmem:[%s6262_s8] sm:$0xff] }
 0x8c2   :  { %v1418_v26 = vadd.f32 %v1394_v9, %v5149_v18 }
 0x8c3   :  { %v1417_v47 = vadd.f32 %v1389_v44, %v5147_v17  ;;  %v1650_v44 = vld [vmem:[%s6262_s8 + $0x8] sm:$0xff] }
 0x8c4   :  { %v1426_v51 = vsel %vm180_vm1, %v1418_v26, 0.0 }
 0x8c5   :  { %1427 = vadd.xlane.f32.xlu1 %v1426_v51  ;;  %v1423_v57 = vsel %vm180_vm1, %v1417_v47, 0.0  ;;  %v1652_v51 = vld [vmem:[%s6262_s8 + $0x18] sm:$0xff] }
 0x8c6   :  { %1424 = vadd.xlane.f32.xlu0 %v1423_v57 }
 0x8c8   :  { %v4349_v0 = vpop.f32.mrb[32].mxu0 }
 0x8c9   :  { %v1398_v12 = vpop.f32.mrb[33].mxu0  ;;  %v1404_v13 = vadd.f32 %v4349_v0, %v1303_v22  ;;  %v1653_v0 = vld [vmem:[%s6262_s8 + $0x20] sm:$0xff] }
 0x8ca   :  { %v1399_v14 = vadd.f32 %v1398_v12, %v1303_v22  ;;  %v1654_v12 = vld [vmem:[%s6262_s8 + $0x28] sm:$0xff] }
 0x8cb   :  { %v1420_v19 = vadd.f32 %v1404_v13, %v5163_v24  ;;  %v4673_v13 = vpack.c.bf16 %v1654_v12, %v1653_v0 }
 0x8cc   :  { %v1419_v34 = vadd.f32 %v1399_v14, %v5161_v23 }
 0x8cd   :  { %v1432_v11 = vsel %vm180_vm1, %v1420_v19, 0.0 }
 0x8ce   :  { %v1429_v15 = vsel %vm180_vm1, %v1419_v34, 0.0 }
 0x8cf   :  { %1430 = vadd.xlane.f32.xlu0 %v1429_v15 }
 0x8d0   :  { %v4352_v18 = vpop.f32.mrb[34].mxu0 }
 0x8d1   :  { %v1414_v21 = vadd.f32 %v4352_v18, %v1303_v22  ;;  %v1408_v17 = vpop.f32.mrb[35].mxu0 }
 0x8d2   :  { %v1409_v25 = vadd.f32 %v1408_v17, %v1303_v22  ;;  %v1524_v22 = vld [vmem:[%s6261_s7 + $0x10] sm:$0xff]  ;;  %v1504_v17 = vsub.s32 2, %v5183_v32 }
 0x8d3   :  { %1433 = vadd.xlane.f32.xlu0 %v1432_v11  ;;  %v1422_v28 = vadd.f32 %v1414_v21, %v5177_v30  ;;  %v4661_v9 = vpack.c.bf16 %v1525_v8, %v1524_v22 }
 0x8d4   :  { %v1421_v31 = vadd.f32 %v1409_v25, %v5175_v29 }
 0x8d5   :  { %v1438_v36 = vsel %vm180_vm1, %v1422_v28, 0.0  ;;  %4662 = vmatprep.subr.bf16.mxu1 %v4661_v9 }
 0x8d6   :  { %v1435_v23 = vsel %vm180_vm1, %v1421_v31, 0.0  ;;  %4664 = vmatpush3.bf16.msra.mxu1 %v4661_v9 }
 0x8d7   :  { %1436 = vadd.xlane.f32.xlu1 %v1435_v23  ;;  %1439 = vadd.xlane.f32.xlu0 %v1438_v36  ;;  %v5557_v36 = vld [vmem:[%s6263_s9] sm:$0xff] }
 0x8d8   :  { %v1505_v23 = vrot.slane %v5557_v36, %v1504_v17 }
 0x952   :  { %v1428_v37 = vpop.xlane.xlu1 %1427 }
 0x953   :  { %v1443_v24 = vmul.f32 0.03125, %v1428_v37  ;;  %v1425_v42 = vpop.xlane.xlu0 %1424 }
 0x954   :  { %v1442_v38 = vmul.f32 0.03125, %v1425_v42 }
 0x955   :  { %v5492_v39 = vsub.f32 %v1418_v26, %v1443_v24  ;;  %v1651_v26 = vld [vmem:[%s6262_s8 + $0x10] sm:$0xff] }
 0x956   :  { %v5494_v43 = vsub.f32 %v1417_v47, %v1442_v38  ;;  %v4665_v47 = vpack.c.bf16 %v1650_v44, %v1649_v10  ;;  %v4669_v57 = vpack.c.bf16 %v1652_v51, %v1651_v26  ;;  %v1528_v44 = vsub.s32 4, %v5183_v32 }
 0x957   :  { %v1455_v46 = vmul.f32 %v5492_v39, %v5492_v39 }
 0x958   :  { %v1454_v29 = vmul.f32 %v5494_v43, %v5494_v43  ;;  %4666 = vmatprep.subr.bf16.mxu0 %v4665_v47  ;;  %v1529_v26 = vrot.slane %v5557_v36, %v1528_v44 }
 0x959   :  { %v1463_v30 = vsel %vm180_vm1, %v1455_v46, 0.0  ;;  %4668 = vmatpush3.bf16.msra.mxu0 %v4665_v47 }
 0x95a   :  { %1464 = vadd.xlane.f32.xlu0 %v1463_v30  ;;  %v1460_v48 = vsel %vm180_vm1, %v1454_v29, 0.0  ;;  %4670 = vmatprep.subr.bf16.mxu0 %v4669_v57 }
 0x95b   :  { %1461 = vadd.xlane.f32.xlu1 %v1460_v48 }
 0x95c   :  { %v1431_v41 = vpop.xlane.xlu0 %1430 }
 0x95d   :  { %v1444_v52 = vmul.f32 0.03125, %v1431_v41  ;;  %4672 = vmatpush3.bf16.msra.mxu0 %v4669_v57 }
 0x95e   :  { %4674 = vmatprep.subr.bf16.mxu0 %v4673_v13 }
 0x95f   :  { %v5502_v53 = vsub.f32 %v1419_v34, %v1444_v52 }
 0x960   :  { %v1434_v54 = vpop.xlane.xlu0 %1433 }
 0x961   :  { %v1445_v56 = vmul.f32 0.03125, %v1434_v54  ;;  %v1456_v40 = vmul.f32 %v5502_v53, %v5502_v53  ;;  %4676 = vmatpush3.bf16.msra.mxu0 %v4673_v13 }
 0x963   :  { %v5506_v58 = vsub.f32 %v1420_v19, %v1445_v56  ;;  %v1466_v49 = vsel %vm180_vm1, %v1456_v40, 0.0 }
 0x964   :  { %v1437_v50 = vpop.xlane.xlu1 %1436  ;;  %1467 = vadd.xlane.f32.xlu1 %v1466_v49  ;;  %v1440_v59 = vpop.xlane.xlu0 %1439 }
 0x965   :  { %v1446_v60 = vmul.f32 0.03125, %v1437_v50  ;;  %v1447_v61 = vmul.f32 0.03125, %v1440_v59  ;;  %v1457_v62 = vmul.f32 %v5506_v58, %v5506_v58 }
 0x967   :  { %v5511_v63 = vsub.f32 %v1421_v31, %v1446_v60  ;;  %v5513_v1 = vsub.f32 %v1422_v28, %v1447_v61  ;;  %v1469_v2 = vsel %vm180_vm1, %v1457_v62, 0.0  ;;  %v1514_v28 = vsub.s32 3, %v5183_v32 }
 0x968   :  { %1470 = vadd.xlane.f32.xlu0 %v1469_v2 }
 0x969   :  { %v1458_v4 = vmul.f32 %v5511_v63, %v5511_v63  ;;  %v1459_v3 = vmul.f32 %v5513_v1, %v5513_v1  ;;  %v1515_v29 = vrot.slane %v5557_v36, %v1514_v28 }
 0x96b   :  { %v1472_v5 = vsel %vm180_vm1, %v1458_v4, 0.0  ;;  %v1475_v16 = vsel %vm180_vm1, %v1459_v3, 0.0 }
 0x96c   :  { %1473 = vadd.xlane.f32.xlu1 %v1472_v5  ;;  %1476 = vadd.xlane.f32.xlu0 %v1475_v16 }
 0x9e7   :  { %v1465_v14 = vpop.xlane.xlu0 %1464 }
 0x9e8   :  { %v1479_v34 = vmul.f32 0.03125, %v1465_v14  ;;  %v1462_v15 = vpop.xlane.xlu1 %1461 }
 0x9e9   :  { %v1478_v19 = vmul.f32 0.03125, %v1462_v15 }
 0x9ea   :  { %v1485_v18 = vadd.f32 1e-05, %v1479_v34 }
 0x9eb   :  { %v1484_v21 = vadd.f32 1e-05, %v1478_v19 }
 0x9ec   :  { %4902 = vrsqrt.f32 %v1485_v18 }
 0x9ed   :  { %4904 = vrsqrt.f32 %v1484_v21 }
 0x9f1   :  { %v1468_v25 = vpop.xlane.xlu1 %1467 }
 0x9f2   :  { %v1480_v11 = vmul.f32 0.03125, %v1468_v25 }
 0x9f4   :  { %v1486_v31 = vadd.f32 1e-05, %v1480_v11 }
 0x9f5   :  { %v1471_v37 = vpop.xlane.xlu0 %1470 }
 0x9f6   :  { %v4903_v24 = vpop.eup %4902  ;;  %4906 = vrsqrt.f32 %v1486_v31  ;;  %v1481_v42 = vmul.f32 0.03125, %v1471_v37 }
 0x9f7   :  { %v4905_v38 = vpop.eup %4904  ;;  %v1497_v46 = vmul.f32 %v4903_v24, %v5492_v39 }
 0x9f8   :  { %v1487_v30 = vadd.f32 1e-05, %v1481_v42  ;;  %v1496_v48 = vmul.f32 %v4905_v38, %v5494_v43  ;;  %v1659_v42 = vsub.s32 5, %v5183_v32 }
 0x9f9   :  { %v1507_v41 = vmul.f32 %v1505_v23, %v1497_v46  ;;  %v1474_v52 = vpop.xlane.xlu1 %1473  ;;  %v1477_v54 = vpop.xlane.xlu0 %1476 }
 0x9fa   :  { %4908 = vrsqrt.f32 %v1487_v30  ;;  %v1482_v56 = vmul.f32 0.03125, %v1474_v52  ;;  %v1483_v40 = vmul.f32 0.03125, %v1477_v54  ;;  %v1506_v49 = vmul.f32 %v1505_v23, %v1496_v48 }
 0x9fb   :  { %v5569_v61 = vadd.f32 %v1515_v29, %v1507_v41  ;;  %v1660_v38 = vrot.slane %v5557_v36, %v1659_v42 }
 0x9fc   :  { %v1488_v50 = vadd.f32 1e-05, %v1482_v56  ;;  %v1489_v59 = vadd.f32 1e-05, %v1483_v40  ;;  %v5567_v60 = vadd.f32 %v1515_v29, %v1506_v49 }
 0x9fe   :  { %4910 = vrsqrt.f32 %v1488_v50  ;;  %4361 = vmatprep.mubr.msk.f32.mxu1 %vm180_vm1, %v5567_v60 }
 0x9ff   :  { %4912 = vrsqrt.f32 %v1489_v59  ;;  %4362 = vmatmul.mubr.msk.f32.vlgmr.msra.gmra.mrb[30].mxu1 %vm180_vm1, %v5569_v61 }
 0xa00   :  { %v4907_v39 = vpop.eup %4906 }
 0xa01   :  { %v1498_v43 = vmul.f32 %v4907_v39, %v5502_v53 }
 0xa03   :  { %v1508_v62 = vmul.f32 %v1505_v23, %v1498_v43 }
 0xa04   :  { %v4909_v2 = vpop.eup %4908 }
 0xa05   :  { %v5576_v4 = vadd.f32 %v1515_v29, %v1508_v62  ;;  %v1499_v3 = vmul.f32 %v4909_v2, %v5506_v58  ;;  %v1655_v58 = vld [vmem:[%s6262_s8 + $0x30] sm:$0xff] }
 0xa07   :  { %4364 = vmatprep.mubr.msk.f32.mxu1 %vm180_vm1, %v5576_v4  ;;  %v1509_v5 = vmul.f32 %v1505_v23, %v1499_v3 }
 0xa08   :  { %v4911_v16 = vpop.eup %4910 }
 0xa09   :  { %v4913_v6 = vpop.eup %4912  ;;  %v1519_v20 = vadd.f32 %v1515_v29, %v1509_v5  ;;  %v1500_v7 = vmul.f32 %v4911_v16, %v5511_v63  ;;  %v1656_v63 = vld [vmem:[%s6262_s8 + $0x38] sm:$0xff] }
 0xa0a   :  { %v1501_v22 = vmul.f32 %v4913_v6, %v5513_v1  ;;  %v4677_v1 = vpack.c.bf16 %v1656_v63, %v1655_v58 }
 0xa0b   :  { %4365 = vmatmul.mubr.msk.f32.gmra.mrb[32].mxu1 %vm180_vm1, %v1519_v20  ;;  %v1510_v53 = vmul.f32 %v1505_v23, %v1500_v7 }
 0xa0c   :  { %v1511_v8 = vmul.f32 %v1505_v23, %v1501_v22  ;;  %4678 = vmatprep.subr.bf16.mxu0 %v4677_v1 }
 0xa0d   :  { %v5584_v9 = vadd.f32 %v1515_v29, %v1510_v53  ;;  %4680 = vmatpush3.bf16.msra.mxu0 %v4677_v1 }
 0xa0e   :  { %v5586_v10 = vadd.f32 %v1515_v29, %v1511_v8  ;;  %4689 = vmatprep.subr.bf16.mxu0 %v5026_v35 }
 0xa0f   :  { %4367 = vmatprep.mubr.msk.f32.mxu1 %vm180_vm1, %v5584_v9 }
 0xa10   :  { %4368 = vmatmul.mubr.msk.f32.gmra.mrb[34].mxu1 %vm180_vm1, %v5586_v10 }
 0xad2   :  { %v4363_v47 = vpop.f32.mrb[30].mxu1 }
 0xad3   :  { %v1620_v51 = vadd.f32 %v4363_v47, %v1529_v26  ;;  %v1614_v57 = vpop.f32.mrb[31].mxu1 }
 0xad4   :  { %v1615_v0 = vadd.f32 %v1614_v57, %v1529_v26 }
 0xad5   :  { %v1644_v13 = vmax.f32 %v1620_v51, 0.0 }
 0xad6   :  { %v1643_v12 = vmax.f32 %v1615_v0, 0.0 }
 0xad8   :  { %4386 = vmatprep.mubr.msk.f32.mxu0 %vm1661_vm6, %v1643_v12 }
 0xad9   :  { %4387 = vmatmul.mubr.msk.f32.vlgmr.msra.gmra.mrb[36].mxu0 %vm1661_vm6, %v1644_v13 }
 0xade   :  { %v4366_v14 = vpop.f32.mrb[32].mxu1 }
 0xadf   :  { %v1630_v34 = vadd.f32 %v4366_v14, %v1529_v26  ;;  %v1624_v15 = vpop.f32.mrb[33].mxu1 }
 0xae0   :  { %v1625_v19 = vadd.f32 %v1624_v15, %v1529_v26 }
 0xae1   :  { %v1646_v21 = vmax.f32 %v1630_v34, 0.0 }
 0xae2   :  { %v1645_v18 = vmax.f32 %v1625_v19, 0.0 }
 0xae3   :  { %v4369_v25 = vpop.f32.mrb[34].mxu1 }
 0xae4   :  { %v1640_v11 = vadd.f32 %v4369_v25, %v1529_v26  ;;  %v1634_v31 = vpop.f32.mrb[35].mxu1  ;;  %4389 = vmatprep.mubr.msk.f32.mxu0 %vm1661_vm6, %v1645_v18 }
 0xae5   :  { %v1635_v23 = vadd.f32 %v1634_v31, %v1529_v26  ;;  %4390 = vmatmul.mubr.msk.f32.gmra.mrb[38].mxu0 %vm1661_vm6, %v1646_v21 }
 0xae6   :  { %v1648_v24 = vmax.f32 %v1640_v11, 0.0 }
 0xae7   :  { %v1647_v37 = vmax.f32 %v1635_v23, 0.0 }
 0xae9   :  { %4392 = vmatprep.mubr.msk.f32.mxu0 %vm1661_vm6, %v1647_v37 }
 0xaea   :  { %4393 = vmatmul.mubr.msk.f32.gmra.mrb[40].mxu0 %vm1661_vm6, %v1648_v24 }
 0xaeb   :  { %4418 = vmatprep.mubr.msk.f32.mxu0 %vm5028_vm2, %v5029_v45 }
 0xbac   :  { %v4388_v46 = vpop.f32.mrb[36].mxu0 }
 0xbad   :  { %v1752_v29 = vadd.f32 %v4388_v46, %v1660_v38  ;;  %v1746_v30 = vpop.f32.mrb[37].mxu0 }
 0xbae   :  { %v1747_v48 = vadd.f32 %v1746_v30, %v1660_v38  ;;  %v3899_v30 = vld [vmem:[%s6259_s5 + $0x28] sm:$0xff] }
 0xbaf   :  { %v1776_v41 = vadd.f32 %v1752_v29, %v5569_v61  ;;  %v3898_v29 = vld [vmem:[%s6259_s5 + $0x20] sm:$0xff] }
 0xbb0   :  { %v1775_v52 = vadd.f32 %v1747_v48, %v5567_v60  ;;  %v4681_v48 = vpack.c.bf16 %v3899_v30, %v3898_v29 }
 0xbb1   :  { %v1784_v54 = vsel %vm180_vm1, %v1776_v41, 0.0 }
 0xbb2   :  { %1785 = vadd.xlane.f32.xlu0 %v1784_v54  ;;  %v1781_v56 = vsel %vm180_vm1, %v1775_v52, 0.0  ;;  %4682 = vmatprep.subr.bf16.mxu1 %v4681_v48 }
 0xbb3   :  { %1782 = vadd.xlane.f32.xlu1 %v1781_v56  ;;  %4684 = vmatpush3.bf16.msra.mxu1 %v4681_v48 }
 0xbb8   :  { %v4391_v40 = vpop.f32.mrb[38].mxu0 }
 0xbb9   :  { %v1762_v49 = vadd.f32 %v4391_v40, %v1660_v38  ;;  %v1756_v50 = vpop.f32.mrb[39].mxu0 }
 0xbba   :  { %v1757_v59 = vadd.f32 %v1756_v50, %v1660_v38 }
 0xbbb   :  { %v1778_v39 = vadd.f32 %v1762_v49, %v1519_v20 }
 0xbbc   :  { %v1777_v43 = vadd.f32 %v1757_v59, %v5576_v4 }
 0xbbd   :  { %v4394_v62 = vpop.f32.mrb[40].mxu0  ;;  %v1790_v2 = vsel %vm180_vm1, %v1778_v39, 0.0 }
 0xbbe   :  { %v1772_v3 = vadd.f32 %v4394_v62, %v1660_v38  ;;  %1791 = vadd.xlane.f32.xlu0 %v1790_v2  ;;  %v1766_v61 = vpop.f32.mrb[41].mxu0  ;;  %v1787_v60 = vsel %vm180_vm1, %v1777_v43, 0.0  ;;  %v1871_v2 = vsub.s32 7, %v5183_v32 }
 0xbbf   :  { %v1767_v5 = vadd.f32 %v1766_v61, %v1660_v38  ;;  %1788 = vadd.xlane.f32.xlu1 %v1787_v60 }
 0xbc0   :  { %v1780_v16 = vadd.f32 %v1772_v3, %v5586_v10 }
 0xbc1   :  { %v1779_v6 = vadd.f32 %v1767_v5, %v5584_v9 }
 0xbc2   :  { %v1796_v7 = vsel %vm180_vm1, %v1780_v16, 0.0 }
 0xbc3   :  { %1797 = vadd.xlane.f32.xlu0 %v1796_v7  ;;  %v1793_v20 = vsel %vm180_vm1, %v1779_v6, 0.0 }
 0xbc4   :  { %1794 = vadd.xlane.f32.xlu1 %v1793_v20 }
 0xc3f   :  { %v1786_v4 = vpop.xlane.xlu0 %1785 }
 0xc40   :  { %v1800_v22 = vmul.f32 0.03125, %v1786_v4  ;;  %v1783_v53 = vpop.xlane.xlu1 %1782 }
 0xc41   :  { %v1799_v8 = vmul.f32 0.03125, %v1783_v53 }
 0xc42   :  { %v1806_v58 = vsub.f32 %v1776_v41, %v1800_v22  ;;  %v3900_v41 = vld [vmem:[%s6259_s5 + $0x30] sm:$0xff]  ;;  %v1872_v22 = vrot.slane %v5557_v36, %v1871_v2 }
 0xc43   :  { %v5626_v63 = vsub.f32 %v1775_v52, %v1799_v8  ;;  %v3901_v52 = vld [vmem:[%s6259_s5 + $0x38] sm:$0xff] }
 0xc44   :  { %v1812_v1 = vmul.f32 %v1806_v58, %v1806_v58  ;;  %v4685_v54 = vpack.c.bf16 %v3901_v52, %v3900_v41 }
 0xc45   :  { %v1811_v26 = vmul.f32 %v5626_v63, %v5626_v63 }
 0xc46   :  { %v1820_v10 = vsel %vm180_vm1, %v1812_v1, 0.0  ;;  %4686 = vmatprep.subr.bf16.mxu1 %v4685_v54 }
 0xc47   :  { %1821 = vadd.xlane.f32.xlu0 %v1820_v10  ;;  %v1817_v9 = vsel %vm180_vm1, %v1811_v26, 0.0  ;;  %4688 = vmatpush3.bf16.msra.mxu1 %v4685_v54 }
 0xc48   :  { %1818 = vadd.xlane.f32.xlu1 %v1817_v9  ;;  %4693 = vmatprep.subr.bf16.mxu1 %v5026_v35 }
 0xc4b   :  { %v1792_v47 = vpop.xlane.xlu0 %1791 }
 0xc4c   :  { %v1802_v51 = vmul.f32 0.03125, %v1792_v47  ;;  %v1789_v57 = vpop.xlane.xlu1 %1788 }
 0xc4d   :  { %v1801_v0 = vmul.f32 0.03125, %v1789_v57 }
 0xc4e   :  { %v5632_v12 = vsub.f32 %v1778_v39, %v1802_v51 }
 0xc4f   :  { %v5634_v13 = vsub.f32 %v1777_v43, %v1801_v0  ;;  %v1861_v43 = vsub.s32 6, %v5183_v32 }
 0xc50   :  { %v1798_v14 = vpop.xlane.xlu0 %1797  ;;  %v1814_v34 = vmul.f32 %v5632_v12, %v5632_v12 }
 0xc51   :  { %v1804_v15 = vmul.f32 0.03125, %v1798_v14  ;;  %v1795_v19 = vpop.xlane.xlu1 %1794  ;;  %v1813_v18 = vmul.f32 %v5634_v13, %v5634_v13  ;;  %v1862_v60 = vrot.slane %v5557_v36, %v1861_v43 }
 0xc52   :  { %v1803_v21 = vmul.f32 0.03125, %v1795_v19  ;;  %v1826_v25 = vsel %vm180_vm1, %v1814_v34, 0.0 }
 0xc53   :  { %v5641_v11 = vsub.f32 %v1780_v16, %v1804_v15  ;;  %1827 = vadd.xlane.f32.xlu0 %v1826_v25  ;;  %v1823_v31 = vsel %vm180_vm1, %v1813_v18, 0.0 }
 0xc54   :  { %v5644_v23 = vsub.f32 %v1779_v6, %v1803_v21  ;;  %1824 = vadd.xlane.f32.xlu1 %v1823_v31 }
 0xc55   :  { %v1816_v37 = vmul.f32 %v5641_v11, %v5641_v11 }
 0xc56   :  { %v1815_v24 = vmul.f32 %v5644_v23, %v5644_v23 }
 0xc57   :  { %v1832_v38 = vsel %vm180_vm1, %v1816_v37, 0.0 }
 0xc58   :  { %1833 = vadd.xlane.f32.xlu0 %v1832_v38  ;;  %v1829_v46 = vsel %vm180_vm1, %v1815_v24, 0.0 }
 0xc59   :  { %1830 = vadd.xlane.f32.xlu1 %v1829_v46 }
 0xcd4   :  { %v1822_v56 = vpop.xlane.xlu0 %1821 }
 0xcd5   :  { %v1836_v40 = vmul.f32 0.03125, %v1822_v56  ;;  %v1819_v49 = vpop.xlane.xlu1 %1818 }
 0xcd6   :  { %v1835_v50 = vmul.f32 0.03125, %v1819_v49 }
 0xcd7   :  { %v1842_v59 = vadd.f32 1e-05, %v1836_v40 }
 0xcd8   :  { %v1841_v39 = vadd.f32 1e-05, %v1835_v50 }
 0xcd9   :  { %4914 = vrsqrt.f32 %v1842_v59 }
 0xcda   :  { %4916 = vrsqrt.f32 %v1841_v39 }
 0xce0   :  { %v1828_v62 = vpop.xlane.xlu0 %1827 }
 0xce1   :  { %v1838_v3 = vmul.f32 0.03125, %v1828_v62  ;;  %v1825_v61 = vpop.xlane.xlu1 %1824 }
 0xce2   :  { %v1837_v5 = vmul.f32 0.03125, %v1825_v61 }
 0xce3   :  { %v4915_v16 = vpop.eup %4914  ;;  %v1844_v6 = vadd.f32 1e-05, %v1838_v3 }
 0xce4   :  { %v4917_v7 = vpop.eup %4916  ;;  %v1854_v20 = vmul.f32 %v4915_v16, %v1806_v58  ;;  %v1843_v4 = vadd.f32 1e-05, %v1837_v5 }
 0xce5   :  { %4918 = vrsqrt.f32 %v1844_v6  ;;  %v1834_v53 = vpop.xlane.xlu0 %1833  ;;  %v1853_v8 = vmul.f32 %v4917_v7, %v5626_v63 }
 0xce6   :  { %v1864_v1 = vmul.f32 %v1862_v60, %v1854_v20  ;;  %4920 = vrsqrt.f32 %v1843_v4  ;;  %v1840_v26 = vmul.f32 0.03125, %v1834_v53  ;;  %v1831_v10 = vpop.xlane.xlu1 %1830 }
 0xce7   :  { %v1839_v9 = vmul.f32 0.03125, %v1831_v10  ;;  %v1863_v47 = vmul.f32 %v1862_v60, %v1853_v8 }
 0xce8   :  { %v1846_v51 = vadd.f32 1e-05, %v1840_v26  ;;  %v5676_v58 = vadd.f32 %v1872_v22, %v1864_v1  ;;  %v5777_v26 = vld [vmem:[%s6256_s2] ss:$0 sm:$0xff] }
 0xce9   :  { %v1845_v57 = vadd.f32 1e-05, %v1839_v9  ;;  %v5674_v0 = vadd.f32 %v1872_v22, %v1863_v47 }
 0xcea   :  { %4922 = vrsqrt.f32 %v1846_v51 }
 0xceb   :  { %4924 = vrsqrt.f32 %v1845_v57  ;;  %4403 = vmatprep.mubr.msk.f32.mxu1 %vm180_vm1, %v5674_v0 }
 0xcec   :  { %4404 = vmatmul.mubr.msk.f32.vlgmr.msra.gmra.mrb[36].mxu1 %vm180_vm1, %v5676_v58 }
 0xcef   :  { %v4919_v36 = vpop.eup %4918 }
 0xcf0   :  { %v4921_v63 = vpop.eup %4920  ;;  %v1856_v14 = vmul.f32 %v4919_v36, %v5632_v12 }
 0xcf1   :  { %v1855_v34 = vmul.f32 %v4921_v63, %v5634_v13 }
 0xcf2   :  { %v1866_v15 = vmul.f32 %v1862_v60, %v1856_v14 }
 0xcf3   :  { %v1865_v19 = vmul.f32 %v1862_v60, %v1855_v34 }
 0xcf4   :  { %v4923_v18 = vpop.eup %4922  ;;  %v5687_v37 = vadd.f32 %v1872_v22, %v1866_v15 }
 0xcf5   :  { %v4925_v21 = vpop.eup %4924  ;;  %v5684_v25 = vadd.f32 %v1872_v22, %v1865_v19  ;;  %v1858_v31 = vmul.f32 %v4923_v18, %v5641_v11  ;;  %v5707_v11 = vld [vmem:[%s6263_s9 + $0x8] sm:$0xff] }
 0xcf6   :  { %v1857_v24 = vmul.f32 %v4925_v21, %v5644_v23  ;;  %v1889_v23 = vrot.slane %v5707_v11, %v178_v33 }
 0xcf7   :  { %4406 = vmatprep.mubr.msk.f32.mxu1 %vm180_vm1, %v5684_v25  ;;  %v1868_v38 = vmul.f32 %v1862_v60, %v1858_v31 }
 0xcf8   :  { %4407 = vmatmul.mubr.msk.f32.gmra.mrb[38].mxu1 %vm180_vm1, %v5687_v37  ;;  %v1867_v12 = vmul.f32 %v1862_v60, %v1857_v24 }
 0xcf9   :  { %v5696_v46 = vadd.f32 %v1872_v22, %v1868_v38  ;;  %v5788_v38 = vld [vmem:[%s6256_s2 + $0x1] ss:$0 sm:$0xff] }
 0xcfa   :  { %v5694_v13 = vadd.f32 %v1872_v22, %v1867_v12 }
 0xcfc   :  { %4409 = vmatprep.mubr.msk.f32.mxu1 %vm180_vm1, %v5694_v13 }
 0xcfd   :  { %4410 = vmatmul.mubr.msk.f32.gmra.mrb[40].mxu1 %vm180_vm1, %v5696_v46 }
 0xcfe   :  { %4433 = vmatprep.mubr.msk.f32.mxu1 %vm5028_vm2, %v5029_v45 }
 0xdbf   :  { %v4405_v29 = vpop.f32.mrb[36].mxu1 }
 0xdc0   :  { %v5712_v30 = vadd.f32 %v4405_v29, %v1889_v23  ;;  %v1974_v48 = vpop.f32.mrb[37].mxu1 }
 0xdc1   :  { %v5714_v41 = vadd.f32 %v1974_v48, %v1889_v23 }
 0xdc3   :  { %v5718_v52 = vpack.i.bf16 %v5712_v30, %v5714_v41 }
 0xdc5   :  { %4813 = vrot.lane.b32.xlu1 %v5718_v52, %s5027_s17 }
 0xdcb   :  { %v4408_v54 = vpop.f32.mrb[38].mxu1 }
 0xdcc   :  { %v1984_v56 = vpop.f32.mrb[39].mxu1  ;;  %v5728_v59 = vadd.f32 %v4408_v54, %v1889_v23 }
 0xdcd   :  { %v5722_v40 = vadd.f32 %v1984_v56, %v1889_v23 }
 0xdcf   :  { %2010 = vrot.lane.b32.xlu1 %v5722_v40, %s5027_s17 }
 0xdd0   :  { %v4411_v33 = vpop.f32.mrb[40].mxu1 }
 0xdd1   :  { %v5726_v49 = vadd.f32 %v4411_v33, %v1889_v23  ;;  %v1994_v50 = vpop.f32.mrb[41].mxu1 }
 0xdd2   :  { %v5730_v39 = vadd.f32 %v1994_v50, %v1889_v23 }
 0xdd3   :  { %2111 = vrot.lane.b32.xlu1 %v5726_v49, %s5027_s17 }
 0xdd4   :  { %v5736_v62 = vpack.i.bf16 %v5730_v39, %v5728_v59 }
 0xdd6   :  { %4818 = vrot.lane.b32.xlu0 %v5736_v62, %s5027_s17 }
 0xe37   :  { %v4814_v3 = vpop.permute.xlu1 %4813 }
 0xe38   :  { %v4816_v61 = vunpack.i.h.bf16 %v4814_v3  ;;  %v4815_v60 = vunpack.i.l.bf16 %v4814_v3 }
 0xe3a   :  { %v4690_v5 = vpack.c.bf16 %v4816_v61, %v4815_v60 }
 0xe3c   :  { %4692 = vmatpush3.bf16.xpose.msk.msra.mxu0 %vm5230_vm4, %v4690_v5 }
 0xe3d   :  { %4416 = vmatprep.subr.mxu0 %v5029_v45 }
 0xe41   :  { %v2011_v16 = vpop.permute.xlu1 %2010 }
 0xe44   :  { %4417 = vmatpush3.xpose.msk.msra.mxu0 %vm303_vm3, %v2011_v16 }
 0xe45   :  { %4697 = vmatprep.subr.bf16.mxu0 %v5026_v35  ;;  %v2112_v22 = vpop.permute.xlu1 %2111 }
 0xe47   :  { %4419 = vmatmul.mubr.msk.f32.vlgmr.msra.gmra.mrb[42].mxu0 %vm303_vm3, %v5714_v41 }
 0xe48   :  { %v4819_v6 = vpop.permute.xlu0 %4818  ;;  %4421 = vmatprep.mubr.msk.f32.mxu0 %vm5028_vm2, %v5029_v45 }
 0xe49   :  { %v4821_v7 = vunpack.i.h.bf16 %v4819_v6  ;;  %v4820_v20 = vunpack.i.l.bf16 %v4819_v6 }
 0xe4b   :  { %v4694_v4 = vpack.c.bf16 %v4821_v7, %v4820_v20  ;;  %4422 = vmatmul.mubr.msk.f32.gmra.mrb[44].mxu0 %vm303_vm3, %v5712_v30 }
 0xe4c   :  { %4424 = vmatprep.mubr.msk.f32.mxu0 %vm5028_vm2, %v5029_v45 }
 0xe4d   :  { %4696 = vmatpush3.bf16.xpose.msk.msra.mxu1 %vm5230_vm4, %v4694_v4 }
 0xe4e   :  { %4431 = vmatprep.subr.mxu1 %v5029_v45 }
 0xe4f   :  { %4425 = vmatmul.mubr.msk.f32.gmra.mrb[46].mxu0 %vm303_vm3, %v5722_v40 }
 0xe50   :  { %4448 = vmatprep.mubr.msk.f32.mxu0 %vm5028_vm2, %v5029_v45 }
 0xe55   :  { %4432 = vmatpush3.xpose.msk.msra.mxu1 %vm303_vm3, %v2112_v22 }
 0xe56   :  { %4700 = vmatprep.subr.bf16.mxu1 %v5026_v35 }
 0xe58   :  { %4434 = vmatmul.mubr.msk.f32.vlgmr.msra.gmra.mrb[42].mxu1 %vm303_vm3, %v5728_v59 }
 0xe59   :  { %4436 = vmatprep.mubr.msk.f32.mxu1 %vm5028_vm2, %v5029_v45 }
 0xe5c   :  { %4437 = vmatmul.mubr.msk.f32.gmra.mrb[44].mxu1 %vm303_vm3, %v5730_v39 }
 0xe5d   :  { %4439 = vmatprep.mubr.msk.f32.mxu1 %vm5028_vm2, %v5029_v45 }
 0xe60   :  { %4440 = vmatmul.mubr.msk.f32.gmra.mrb[46].mxu1 %vm303_vm3, %v5726_v49 }
 0xe61   :  { %4463 = vmatprep.mubr.msk.f32.mxu1 %vm5028_vm2, %v5029_v45 }
 0xf1a   :  { %v2090_v53 = vpop.f32.mrb[42].mxu0 }
 0xf1b   :  { %v2205_v8 = vmul.f32 0.25, %v2090_v53  ;;  %v4420_v1 = vpop.f32.mrb[43].mxu0 }
 0xf1d   :  { %v2211_v10 = vadd.f32 %v5777_v26, %v2205_v8 }
 0xf1e   :  { %v2095_v9 = vpop.f32.mrb[44].mxu0 }
 0xf1f   :  { %v2206_v47 = vmul.f32 0.25, %v2095_v9  ;;  %v4423_v51 = vpop.f32.mrb[45].mxu0  ;;  %v2217_v57 = vsel %vm521_vm5, %v2211_v10, -inf }
 0xf20   :  { %2218 = vmax.xlane.f32.xlu0 %v2217_v57 }
 0xf21   :  { %v2212_v36 = vadd.f32 %v5777_v26, %v2206_v47 }
 0xf22   :  { %v2100_v63 = vpop.f32.mrb[46].mxu0 }
 0xf23   :  { %v2207_v14 = vmul.f32 0.25, %v2100_v63  ;;  %v4426_v34 = vpop.f32.mrb[47].mxu0  ;;  %v2220_v15 = vsel %vm521_vm5, %v2212_v36, -inf }
 0xf24   :  { %2221 = vmax.xlane.f32.xlu1 %v2220_v15 }
 0xf25   :  { %v2213_v19 = vadd.f32 %v5777_v26, %v2207_v14 }
 0xf27   :  { %v2223_v18 = vsel %vm521_vm5, %v2213_v19, -inf }
 0xf28   :  { %2224 = vmax.xlane.f32.xlu0 %v2223_v18 }
 0xf2b   :  { %v2191_v21 = vpop.f32.mrb[42].mxu1 }
 0xf2c   :  { %v2208_v31 = vmul.f32 0.25, %v2191_v21  ;;  %v4435_v24 = vpop.f32.mrb[43].mxu1 }
 0xf2e   :  { %v2214_v12 = vadd.f32 %v5788_v38, %v2208_v31 }
 0xf2f   :  { %v2196_v23 = vpop.f32.mrb[44].mxu1 }
 0xf30   :  { %v2209_v29 = vmul.f32 0.25, %v2196_v23  ;;  %v4438_v48 = vpop.f32.mrb[45].mxu1  ;;  %v2226_v54 = vsel %vm521_vm5, %v2214_v12, -inf }
 0xf31   :  { %2227 = vmax.xlane.f32.xlu0 %v2226_v54 }
 0xf32   :  { %v2215_v56 = vadd.f32 %v5788_v38, %v2209_v29 }
 0xf33   :  { %v2201_v33 = vpop.f32.mrb[46].mxu1 }
 0xf34   :  { %v4441_v50 = vpop.f32.mrb[47].mxu1  ;;  %v2229_v3 = vsel %vm521_vm5, %v2215_v56, -inf  ;;  %v2210_v61 = vmul.f32 0.25, %v2201_v33 }
 0xf35   :  { %2230 = vmax.xlane.f32.xlu1 %v2229_v3 }
 0xf36   :  { %v5809_v60 = vadd.f32 %v5788_v38, %v2210_v61 }
 0xf38   :  { %v2232_v5 = vsel %vm521_vm5, %v5809_v60, -inf }
 0xf46   :  { %4823 = vrot.lane.b32.xlu1 %v5718_v52, %s5030_s22 }
 0xf47   :  { %4828 = vrot.lane.b32.xlu0 %v5736_v62, %s5030_s22 }
 0xf4a   :  { %2287 = vrot.lane.b32.xlu1 %v5722_v40, %s5030_s22 }
 0xf4b   :  { %4833 = vrot.lane.b32.xlu0 %v5718_v52, %s5031_s23 }
 0xf4e   :  { %2385 = vrot.lane.b32.xlu1 %v5726_v49, %s5030_s22 }
 0xf52   :  { %4838 = vrot.lane.b32.xlu1 %v5736_v62, %s5031_s23 }
 0xf56   :  { %2479 = vrot.lane.b32.xlu1 %v5714_v41, %s5032_s24 }
 0xf6a   :  { %2233 = vmax.xlane.f32.xlu0 %v2232_v5 }
 0xf80   :  { %2489 = vrot.lane.b32.xlu0 %v5722_v40, %s5031_s23 }
 0xfad   :  { %v2219_v16 = vpop.xlane.xlu0 %2218 }
 0xfae   :  { %v2235_v6 = vsub.f32 %v2211_v10, %v2219_v16 }
 0xfb0   :  { %v2241_v7 = vmul.f32 1.442695, %v2235_v6 }
 0xfb1   :  { %v2222_v20 = vpop.xlane.xlu1 %2221 }
 0xfb2   :  { %4926 = vpow2.f32 %v2241_v7  ;;  %v2236_v4 = vsub.f32 %v2212_v36, %v2222_v20 }
 0xfb4   :  { %v2243_v22 = vmul.f32 1.442695, %v2236_v4 }
 0xfb5   :  { %v2225_v53 = vpop.xlane.xlu0 %2224 }
 0xfb6   :  { %4928 = vpow2.f32 %v2243_v22  ;;  %v2237_v41 = vsub.f32 %v2213_v19, %v2225_v53 }
 0xfb8   :  { %v2245_v8 = vmul.f32 1.442695, %v2237_v41 }
 0xfba   :  { %4930 = vpow2.f32 %v2245_v8 }
 0xfbc   :  { %v5815_v1 = vpop.eup %4926 }
 0xfbd   :  { %v2253_v9 = vsel %vm521_vm5, %v5815_v1, 0.0 }
 0xfbe   :  { %v2228_v47 = vpop.xlane.xlu0 %2227  ;;  %2254 = vadd.xlane.f32.xlu1 %v2253_v9 }
 0xfbf   :  { %v2238_v51 = vsub.f32 %v2214_v12, %v2228_v47 }
 0xfc0   :  { %v5819_v57 = vpop.eup %4928 }
 0xfc1   :  { %v2247_v10 = vmul.f32 1.442695, %v2238_v51  ;;  %v2256_v36 = vsel %vm521_vm5, %v5819_v57, 0.0 }
 0xfc2   :  { %v4829_v63 = vpop.permute.xlu0 %4828  ;;  %v2231_v14 = vpop.xlane.xlu1 %2230  ;;  %2257 = vadd.xlane.f32.xlu0 %v2256_v36 }
 0xfc3   :  { %4932 = vpow2.f32 %v2247_v10  ;;  %v4831_v34 = vunpack.i.h.bf16 %v4829_v63  ;;  %v4830_v15 = vunpack.i.l.bf16 %v4829_v63  ;;  %v2239_v19 = vsub.f32 %v2215_v56, %v2231_v14 }
 0xfc4   :  { %v5823_v18 = vpop.eup %4930 }
 0xfc5   :  { %v4701_v21 = vpack.c.bf16 %v4831_v34, %v4830_v15  ;;  %v2249_v31 = vmul.f32 1.442695, %v2239_v19  ;;  %v2259_v24 = vsel %vm521_vm5, %v5823_v18, 0.0 }
 0xfc6   :  { %v4824_v12 = vpop.permute.xlu1 %4823  ;;  %2260 = vadd.xlane.f32.xlu0 %v2259_v24  ;;  %v4834_v5 = vpop.permute.xlu0 %4833 }
 0xfc7   :  { %4934 = vpow2.f32 %v2249_v31  ;;  %v4826_v23 = vunpack.i.h.bf16 %v4824_v12  ;;  %4702 = vmatpush3.bf16.msra.mxu1 %v4701_v21  ;;  %v4825_v29 = vunpack.i.l.bf16 %v4824_v12  ;;  %v4836_v9 = vunpack.i.h.bf16 %v4834_v5 }
 0xfc8   :  { %4461 = vmatprep.subr.mxu1 %v5029_v45  ;;  %v4835_v47 = vunpack.i.l.bf16 %v4834_v5 }
 0xfc9   :  { %v4698_v48 = vpack.c.bf16 %v4826_v23, %v4825_v29 }
 0xfca   :  { %v2288_v54 = vpop.permute.xlu1 %2287  ;;  %v4704_v36 = vpack.c.bf16 %v4836_v9, %v4835_v47 }
 0xfcb   :  { %4699 = vmatpush3.bf16.msra.mxu0 %v4698_v48 }
 0xfcc   :  { %4446 = vmatprep.subr.mxu0 %v5029_v45 }
 0xfcd   :  { %v5828_v33 = vpop.eup %4932 }
 0xfce   :  { %v2386_v56 = vpop.permute.xlu1 %2385  ;;  %v2262_v50 = vsel %vm521_vm5, %v5828_v33, 0.0 }
 0xfcf   :  { %2263 = vadd.xlane.f32.xlu1 %v2262_v50  ;;  %4462 = vmatpush3.msra.mxu1 %v2386_v56 }
 0xfd0   :  { %4447 = vmatpush3.msra.mxu0 %v2288_v54  ;;  %4707 = vmatprep.subr.bf16.mxu1 %v5026_v35 }
 0xfd1   :  { %v5834_v3 = vpop.eup %4934  ;;  %4703 = vmatprep.subr.bf16.mxu0 %v5026_v35 }
 0xfd2   :  { %v2265_v61 = vsel %vm521_vm5, %v5834_v3, 0.0 }
 0xfd3   :  { %2266 = vadd.xlane.f32.xlu1 %v2265_v61 }
 0xfdc   :  { %2593 = vrot.lane.b32.xlu0 %v5726_v49, %s5031_s23 }
 0xfe4   :  { %2481 = vrot.lane.b32.xlu1 %v5712_v30, %s5032_s24  ;;  %v4839_v30 = vpop.permute.xlu1 %4838 }
 0xfe5   :  { %v4840_v15 = vunpack.i.l.bf16 %v4839_v30 }
 0xfe8   :  { %2483 = vrot.lane.b32.xlu1 %v5722_v40, %s5032_s24  ;;  %v2480_v22 = vpop.permute.xlu1 %2479 }
 0xfec   :  { %2587 = vrot.lane.b32.xlu1 %v5726_v49, %s5032_s24 }
 0xff7   :  { %v2234_v16 = vpop.xlane.xlu0 %2233 }
 0xff8   :  { %v2240_v6 = vsub.f32 %v5809_v60, %v2234_v16 }
 0xffa   :  { %v2251_v7 = vmul.f32 1.442695, %v2240_v6 }
 0xffb   :  { %v2490_v53 = vpop.permute.xlu0 %2489 }
 0xffc   :  { %4936 = vpow2.f32 %v2251_v7 }
0x1006   :  { %v5848_v20 = vpop.eup %4936 }
0x1007   :  { %v2268_v4 = vsel %vm521_vm5, %v5848_v20, 0.0 }
0x1008   :  { %2269 = vadd.xlane.f32.xlu0 %v2268_v4 }
0x101e   :  { %2583 = vrot.lane.b32.xlu0 %v5728_v59, %s5032_s24 }
0x1022   :  { %2585 = vrot.lane.b32.xlu0 %v5730_v39, %s5032_s24 }
0x104b   :  { %v2255_v41 = vpop.xlane.xlu1 %2254 }
0x104c   :  { %4938 = vrcp.f32 %v2255_v41 }
0x104f   :  { %v2258_v60 = vpop.xlane.xlu0 %2257 }
0x1050   :  { %4940 = vrcp.f32 %v2258_v60 }
0x1053   :  { %v2261_v8 = vpop.xlane.xlu0 %2260 }
0x1054   :  { %4942 = vrcp.f32 %v2261_v8 }
0x1056   :  { %v4939_v51 = vpop.eup %4938 }
0x1057   :  { %v2277_v10 = vmul.f32 %v4939_v51, %v5815_v1  ;;  %v2594_v55 = vpop.permute.xlu0 %2593 }
0x1059   :  { %4449 = vmatmul.mubr.msk.f32.vlgmr.msra.gmra.mrb[48].mxu0 %vm521_vm5, %v2277_v10 }
0x105a   :  { %v4941_v59 = vpop.eup %4940  ;;  %4706 = vmatpush3.bf16.xpose.msk.msra.mxu0 %vm5230_vm4, %v4704_v36  ;;  %4451 = vmatprep.mubr.msk.f32.mxu0 %vm5028_vm2, %v5029_v45 }
0x105b   :  { %v2278_v39 = vmul.f32 %v4941_v59, %v5819_v57  ;;  %4476 = vmatprep.subr.mxu0 %v5029_v45  ;;  %v4841_v57 = vunpack.i.h.bf16 %v4839_v30 }
0x105c   :  { %v2264_v63 = vpop.xlane.xlu1 %2263 }
0x105d   :  { %4944 = vrcp.f32 %v2264_v63  ;;  %4452 = vmatmul.mubr.msk.f32.gmra.mrb[50].mxu0 %vm521_vm5, %v2278_v39  ;;  %v4708_v31 = vpack.c.bf16 %v4841_v57, %v4840_v15 }
0x105e   :  { %v4943_v14 = vpop.eup %4942  ;;  %4454 = vmatprep.mubr.msk.f32.mxu0 %vm5028_vm2, %v5029_v45 }
0x105f   :  { %v2279_v1 = vmul.f32 %v4943_v14, %v5823_v18 }
0x1060   :  { %v2267_v34 = vpop.xlane.xlu1 %2266 }
0x1061   :  { %4946 = vrcp.f32 %v2267_v34  ;;  %4455 = vmatmul.mubr.msk.f32.gmra.mrb[52].mxu0 %vm521_vm5, %v2279_v1 }
0x1062   :  { %4477 = vmatpush3.xpose.msk.msra.mxu0 %vm303_vm3, %v2490_v53  ;;  %4478 = vmatprep.mubr.msk.f32.mxu0 %vm5028_vm2, %v5029_v45 }
0x1063   :  { %4711 = vmatprep.subr.bf16.mxu0 %v5026_v35 }
0x1064   :  { %v2482_v19 = vpop.permute.xlu1 %2481 }
0x1065   :  { %4479 = vmatmul.mubr.msk.f32.vlgmr.msra.gmra.mrb[54].mxu0 %vm303_vm3, %v2480_v22 }
0x1066   :  { %4481 = vmatprep.mubr.msk.f32.mxu0 %vm5028_vm2, %v5029_v45 }
0x1067   :  { %v4945_v18 = vpop.eup %4944 }
0x1068   :  { %v2280_v21 = vmul.f32 %v4945_v18, %v5828_v33  ;;  %v2484_v12 = vpop.permute.xlu1 %2483 }
0x1069   :  { %4482 = vmatmul.mubr.msk.f32.gmra.mrb[56].mxu0 %vm303_vm3, %v2482_v19 }
0x106a   :  { %4464 = vmatmul.mubr.msk.f32.vlgmr.msra.gmra.mrb[48].mxu1 %vm521_vm5, %v2280_v21  ;;  %4484 = vmatprep.mubr.msk.f32.mxu0 %vm5028_vm2, %v5029_v45 }
0x106b   :  { %v4947_v24 = vpop.eup %4946  ;;  %4710 = vmatpush3.bf16.xpose.msk.msra.mxu1 %vm5230_vm4, %v4708_v31  ;;  %4466 = vmatprep.mubr.msk.f32.mxu1 %vm5028_vm2, %v5029_v45 }
0x106c   :  { %v2281_v23 = vmul.f32 %v4947_v24, %v5834_v3  ;;  %4491 = vmatprep.subr.mxu1 %v5029_v45  ;;  %v2588_v50 = vpop.permute.xlu1 %2587 }
0x106d   :  { %4485 = vmatmul.mubr.msk.f32.gmra.mrb[58].mxu0 %vm303_vm3, %v2484_v12 }
0x106e   :  { %4467 = vmatmul.mubr.msk.f32.gmra.mrb[50].mxu1 %vm521_vm5, %v2281_v23  ;;  %4508 = vmatprep.mubr.msk.f32.mxu0 %vm5028_vm2, %v5029_v45 }
0x106f   :  { %4469 = vmatprep.mubr.msk.f32.mxu1 %vm5028_vm2, %v5029_v45 }
0x1073   :  { %4492 = vmatpush3.xpose.msk.msra.mxu1 %vm303_vm3, %v2594_v55 }
0x1074   :  { %4714 = vmatprep.subr.bf16.mxu1 %v5026_v35 }
0x1095   :  { %v2270_v29 = vpop.xlane.xlu0 %2269 }
0x1096   :  { %4948 = vrcp.f32 %v2270_v29 }
0x1099   :  { %v2584_v33 = vpop.permute.xlu0 %2583 }
0x109d   :  { %v2586_v56 = vpop.permute.xlu0 %2585 }
0x10a0   :  { %v4949_v48 = vpop.eup %4948 }
0x10a1   :  { %v2282_v54 = vmul.f32 %v4949_v48, %v5848_v20 }
0x10a3   :  { %4470 = vmatmul.mubr.msk.f32.gmra.mrb[52].mxu1 %vm521_vm5, %v2282_v54 }
0x10a4   :  { %4493 = vmatprep.mubr.msk.f32.mxu1 %vm5028_vm2, %v5029_v45 }
0x10a7   :  { %4494 = vmatmul.mubr.msk.f32.vlgmr.msra.gmra.mrb[54].mxu1 %vm303_vm3, %v2584_v33 }
0x10a8   :  { %4496 = vmatprep.mubr.msk.f32.mxu1 %vm5028_vm2, %v5029_v45 }
0x10ab   :  { %4497 = vmatmul.mubr.msk.f32.gmra.mrb[56].mxu1 %vm303_vm3, %v2586_v56 }
0x10ac   :  { %4499 = vmatprep.mubr.msk.f32.mxu1 %vm5028_vm2, %v5029_v45 }
0x10af   :  { %4500 = vmatmul.mubr.msk.f32.gmra.mrb[58].mxu1 %vm303_vm3, %v2588_v50 }
0x10b0   :  { %4523 = vmatprep.mubr.msk.f32.mxu1 %vm5028_vm2, %v5029_v45 }
0x112c   :  { %v5908_v3 = vpop.f32.mrb[48].mxu0 }
0x112d   :  { %v4450_v61 = vpop.f32.mrb[49].mxu0 }
0x1130   :  { %v5910_v5 = vpop.f32.mrb[50].mxu0 }
0x1131   :  { %v4453_v16 = vpop.f32.mrb[51].mxu0 }
0x1134   :  { %v5912_v6 = vpop.f32.mrb[52].mxu0 }
0x1135   :  { %v4456_v7 = vpop.f32.mrb[53].mxu0 }
0x1138   :  { %v2569_v20 = vpop.f32.mrb[54].mxu0 }
0x1139   :  { %v2687_v4 = vmul.f32 0.25, %v2569_v20  ;;  %v4480_v30 = vpop.f32.mrb[55].mxu0 }
0x113b   :  { %v2693_v22 = vadd.f32 %v5777_v26, %v2687_v4 }
0x113c   :  { %v2574_v53 = vpop.f32.mrb[56].mxu0 }
0x113d   :  { %v5915_v41 = vpop.f32.mrb[48].mxu1  ;;  %v2688_v60 = vmul.f32 0.25, %v2574_v53  ;;  %v4483_v8 = vpop.f32.mrb[57].mxu0  ;;  %v2699_v9 = vsel %vm521_vm5, %v2693_v22, -inf }
0x113e   :  { %v4465_v47 = vpop.f32.mrb[49].mxu1  ;;  %2700 = vmax.xlane.f32.xlu0 %v2699_v9 }
0x113f   :  { %v2694_v51 = vadd.f32 %v5777_v26, %v2688_v60 }
0x1140   :  { %v2579_v10 = vpop.f32.mrb[58].mxu0 }
0x1141   :  { %v5919_v36 = vpop.f32.mrb[50].mxu1  ;;  %v4486_v59 = vpop.f32.mrb[59].mxu0  ;;  %v2702_v39 = vsel %vm521_vm5, %v2694_v51, -inf  ;;  %v2689_v57 = vmul.f32 0.25, %v2579_v10 }
0x1142   :  { %v4468_v63 = vpop.f32.mrb[51].mxu1  ;;  %2703 = vmax.xlane.f32.xlu1 %v2702_v39 }
0x1143   :  { %v2695_v31 = vadd.f32 %v5777_v26, %v2689_v57 }
0x1145   :  { %v2705_v33 = vsel %vm521_vm5, %v2695_v31, -inf }
0x1176   :  { %v5922_v14 = vpop.f32.mrb[52].mxu1 }
0x1177   :  { %v4471_v1 = vpop.f32.mrb[53].mxu1 }
0x117a   :  { %v2673_v34 = vpop.f32.mrb[54].mxu1 }
0x117b   :  { %v2690_v15 = vmul.f32 0.25, %v2673_v34  ;;  %v4495_v19 = vpop.f32.mrb[55].mxu1 }
0x117d   :  { %v2696_v18 = vadd.f32 %v5788_v38, %v2690_v15 }
0x117e   :  { %v2678_v21 = vpop.f32.mrb[56].mxu1 }
0x117f   :  { %v2691_v24 = vmul.f32 0.25, %v2678_v21  ;;  %v4498_v12 = vpop.f32.mrb[57].mxu1  ;;  %v2708_v23 = vsel %vm521_vm5, %v2696_v18, -inf }
0x1180   :  { %2709 = vmax.xlane.f32.xlu0 %v2708_v23 }
0x1181   :  { %v2697_v55 = vadd.f32 %v5788_v38, %v2691_v24 }
0x1182   :  { %v2683_v29 = vpop.f32.mrb[58].mxu1 }
0x1183   :  { %v2692_v48 = vmul.f32 0.25, %v2683_v29  ;;  %v4501_v54 = vpop.f32.mrb[59].mxu1  ;;  %v2711_v56 = vsel %vm521_vm5, %v2697_v55, -inf }
0x1184   :  { %2706 = vmax.xlane.f32.xlu0 %v2705_v33  ;;  %2712 = vmax.xlane.f32.xlu1 %v2711_v56 }
0x1185   :  { %v2698_v50 = vadd.f32 %v5788_v38, %v2692_v48 }
0x1187   :  { %v2714_v26 = vsel %vm521_vm5, %v2698_v50, -inf }
0x1188   :  { %2715 = vmax.xlane.f32.xlu0 %v2714_v26 }
0x1195   :  { %4843 = vrot.lane.b32.xlu1 %v5718_v52, %s5033_s25 }
0x11cb   :  { %v2701_v61 = vpop.xlane.xlu0 %2700 }
0x11cc   :  { %v2717_v16 = vsub.f32 %v2693_v22, %v2701_v61 }
0x11ce   :  { %v2723_v7 = vmul.f32 1.442695, %v2717_v16 }
0x11cf   :  { %v2704_v20 = vpop.xlane.xlu1 %2703 }
0x11d0   :  { %4950 = vpow2.f32 %v2723_v7  ;;  %v2718_v4 = vsub.f32 %v2694_v51, %v2704_v20 }
0x11d2   :  { %v2725_v30 = vmul.f32 1.442695, %v2718_v4 }
0x11d4   :  { %4952 = vpow2.f32 %v2725_v30 }
0x11da   :  { %v4951_v53 = vpop.eup %4950 }
0x11db   :  { %v2735_v60 = vsel %vm521_vm5, %v4951_v53, 0.0 }
0x11dc   :  { %2736 = vadd.xlane.f32.xlu1 %v2735_v60 }
0x11de   :  { %v4953_v8 = vpop.eup %4952 }
0x11df   :  { %v2738_v38 = vsel %vm521_vm5, %v4953_v8, 0.0 }
0x11e0   :  { %2739 = vadd.xlane.f32.xlu0 %v2738_v38 }
0x120d   :  { %v2710_v9 = vpop.xlane.xlu0 %2709 }
0x120e   :  { %v2720_v47 = vsub.f32 %v2696_v18, %v2710_v9 }
0x1210   :  { %v2729_v10 = vmul.f32 1.442695, %v2720_v47 }
0x1211   :  { %v2707_v52 = vpop.xlane.xlu0 %2706  ;;  %v2713_v59 = vpop.xlane.xlu1 %2712 }
0x1212   :  { %4954 = vpow2.f32 %v2729_v10  ;;  %v2719_v22 = vsub.f32 %v2695_v31, %v2707_v52  ;;  %v2721_v39 = vsub.f32 %v2697_v55, %v2713_v59 }
0x1214   :  { %v2727_v63 = vmul.f32 1.442695, %v2719_v22  ;;  %v2731_v51 = vmul.f32 1.442695, %v2721_v39 }
0x1215   :  { %v4844_v1 = vpop.permute.xlu1 %4843  ;;  %v2716_v34 = vpop.xlane.xlu0 %2715 }
0x1216   :  { %4956 = vpow2.f32 %v2727_v63  ;;  %v4846_v57 = vunpack.i.h.bf16 %v4844_v1  ;;  %v4845_v15 = vunpack.i.l.bf16 %v4844_v1  ;;  %v2722_v19 = vsub.f32 %v2698_v50, %v2716_v34  ;;  %v3944_v63 = vld [vmem:[%s6260_s6 + $0x20] sm:$0xff]  ;;  %v3946_v34 = vld [vmem:[%s6260_s6 + $0x30] sm:$0xff] }
0x1217   :  { %4958 = vpow2.f32 %v2731_v51  ;;  %v3945_v51 = vld [vmem:[%s6260_s6 + $0x28] sm:$0xff] }
0x1218   :  { %v4712_v21 = vpack.c.bf16 %v4846_v57, %v4845_v15  ;;  %v2733_v24 = vmul.f32 1.442695, %v2722_v19  ;;  %v4717_v1 = vpack.c.bf16 %v3945_v51, %v3944_v63  ;;  %v3947_v57 = vld [vmem:[%s6260_s6 + $0x38] sm:$0xff] }
0x1219   :  { %v4721_v15 = vpack.c.bf16 %v3947_v57, %v3946_v34 }
0x121a   :  { %4960 = vpow2.f32 %v2733_v24  ;;  %4713 = vmatpush3.bf16.msra.mxu0 %v4712_v21 }
0x121b   :  { %4506 = vmatprep.subr.mxu0 %v5029_v45 }
0x121c   :  { %v4955_v18 = vpop.eup %4954 }
0x121d   :  { %v2744_v12 = vsel %vm521_vm5, %v4955_v18, 0.0 }
0x121e   :  { %2745 = vadd.xlane.f32.xlu1 %v2744_v12 }
0x1220   :  { %v4957_v31 = vpop.eup %4956 }
0x1221   :  { %v4959_v23 = vpop.eup %4958  ;;  %v2741_v55 = vsel %vm521_vm5, %v4957_v31, 0.0 }
0x1222   :  { %v2747_v29 = vsel %vm521_vm5, %v4959_v23, 0.0  ;;  %2742 = vadd.xlane.f32.xlu0 %v2741_v55 }
0x1223   :  { %2748 = vadd.xlane.f32.xlu1 %v2747_v29 }
0x1224   :  { %v4961_v48 = vpop.eup %4960 }
0x1225   :  { %v2750_v54 = vsel %vm521_vm5, %v4961_v48, 0.0 }
0x1226   :  { %2751 = vadd.xlane.f32.xlu0 %v2750_v54 }
0x1234   :  { %2769 = vrot.lane.b32.xlu1 %v5722_v40, %s5033_s25 }
0x1238   :  { %2867 = vrot.lane.b32.xlu1 %v5726_v49, %s5033_s25 }
0x123c   :  { %4848 = vrot.lane.b32.xlu0 %v5736_v62, %s5033_s25 }
0x1269   :  { %v2737_v33 = vpop.xlane.xlu1 %2736 }
0x126a   :  { %4962 = vrcp.f32 %v2737_v33 }
0x126d   :  { %v2740_v56 = vpop.xlane.xlu0 %2739 }
0x126e   :  { %4964 = vrcp.f32 %v2740_v56 }
0x1274   :  { %v4963_v16 = vpop.eup %4962 }
0x1275   :  { %v2759_v20 = vmul.f32 %v4963_v16, %v4951_v53 }
0x1278   :  { %v4965_v40 = vpop.eup %4964 }
0x1279   :  { %v2760_v60 = vmul.f32 %v4965_v40, %v4953_v8 }
0x12ab   :  { %v2746_v50 = vpop.xlane.xlu1 %2745 }
0x12af   :  { %v2743_v26 = vpop.xlane.xlu0 %2742 }
0x12b0   :  { %v2749_v61 = vpop.xlane.xlu1 %2748  ;;  %4966 = vrcp.f32 %v2743_v26 }
0x12b1   :  { %4968 = vrcp.f32 %v2746_v50 }
0x12b2   :  { %4970 = vrcp.f32 %v2749_v61 }
0x12b3   :  { %v2752_v7 = vpop.xlane.xlu0 %2751 }
0x12b4   :  { %v2770_v4 = vpop.permute.xlu1 %2769  ;;  %4972 = vrcp.f32 %v2752_v7 }
0x12b5   :  { %4507 = vmatpush3.msra.mxu0 %v2770_v4 }
0x12b6   :  { %4509 = vmatmul.mubr.msk.f32.vlgmr.msra.gmra.mrb[60].mxu0 %vm521_vm5, %v2759_v20  ;;  %4718 = vmatprep.subr.bf16.mxu0 %v4717_v1 }
0x12b7   :  { %v4849_v49 = vpop.permute.xlu0 %4848  ;;  %4511 = vmatprep.mubr.msk.f32.mxu0 %vm5028_vm2, %v5029_v45  ;;  %4720 = vmatpush3.bf16.msra.mxu0 %v4717_v1 }
0x12b8   :  { %v4851_v62 = vunpack.i.h.bf16 %v4849_v49  ;;  %v4850_v30 = vunpack.i.l.bf16 %v4849_v49  ;;  %v2868_v52 = vpop.permute.xlu1 %2867  ;;  %4722 = vmatprep.subr.bf16.mxu0 %v4721_v15 }
0x12ba   :  { %v4967_v38 = vpop.eup %4966  ;;  %v4715_v9 = vpack.c.bf16 %v4851_v62, %v4850_v30  ;;  %4512 = vmatmul.mubr.msk.f32.gmra.mrb[62].mxu0 %vm521_vm5, %v2760_v60 }
0x12bb   :  { %4514 = vmatprep.mubr.msk.f32.mxu0 %vm5028_vm2, %v5029_v45  ;;  %v2761_v53 = vmul.f32 %v4967_v38, %v4957_v31  ;;  %v4969_v47 = vpop.eup %4968  ;;  %4724 = vmatpush3.bf16.msra.mxu0 %v4721_v15 }
0x12bc   :  { %4716 = vmatpush3.bf16.msra.mxu1 %v4715_v9  ;;  %v2762_v10 = vmul.f32 %v4969_v47, %v4955_v18  ;;  %v4971_v59 = vpop.eup %4970 }
0x12bd   :  { %4521 = vmatprep.subr.mxu1 %v5029_v45  ;;  %v2763_v8 = vmul.f32 %v4971_v59, %v4959_v23 }
0x12be   :  { %4515 = vmatmul.mubr.msk.f32.gmra.mrb[64].mxu0 %vm521_vm5, %v2761_v53  ;;  %v4973_v22 = vpop.eup %4972 }
0x12bf   :  { %v2764_v39 = vmul.f32 %v4973_v22, %v4961_v48 }
0x12c0   :  { %4522 = vmatpush3.msra.mxu1 %v2868_v52 }
0x12c1   :  { %4524 = vmatmul.mubr.msk.f32.vlgmr.msra.gmra.mrb[60].mxu1 %vm521_vm5, %v2762_v10 }
0x12c2   :  { %4526 = vmatprep.mubr.msk.f32.mxu1 %vm5028_vm2, %v5029_v45 }
0x12c5   :  { %4527 = vmatmul.mubr.msk.f32.gmra.mrb[62].mxu1 %vm521_vm5, %v2763_v8 }
0x12c6   :  { %4529 = vmatprep.mubr.msk.f32.mxu1 %vm5028_vm2, %v5029_v45 }
0x12c9   :  { %4530 = vmatmul.mubr.msk.f32.gmra.mrb[64].mxu1 %vm521_vm5, %v2764_v39 }
0x1389   :  { %v2849_v19 = vpop.f32.mrb[60].mxu0 }
0x138a   :  { %v4510_v21 = vpop.f32.mrb[61].mxu0  ;;  %2967 = vrot.lane.b32.xlu0 %v2849_v19, %s5034_s14 }
0x138d   :  { %v2854_v24 = vpop.f32.mrb[62].mxu0 }
0x138e   :  { %2969 = vrot.lane.b32.xlu1 %v2854_v24, %s5034_s14  ;;  %v4513_v18 = vpop.f32.mrb[63].mxu0 }
0x1391   :  { %v2859_v12 = vpop.f32.mrb[64].mxu0 }
0x1392   :  { %2971 = vrot.lane.b32.xlu0 %v2859_v12, %s5034_s14  ;;  %v4516_v31 = vpop.f32.mrb[65].mxu0 }
0x1394   :  { %v2947_v23 = vpop.f32.mrb[60].mxu1 }
0x1395   :  { %2973 = vrot.lane.b32.xlu1 %v2947_v23, %s5034_s14  ;;  %v4525_v55 = vpop.f32.mrb[61].mxu1 }
0x1398   :  { %v2952_v29 = vpop.f32.mrb[62].mxu1 }
0x1399   :  { %2975 = vrot.lane.b32.xlu0 %v2952_v29, %s5034_s14  ;;  %v4528_v48 = vpop.f32.mrb[63].mxu1 }
0x139c   :  { %v2957_v54 = vpop.f32.mrb[64].mxu1 }
0x139d   :  { %2977 = vrot.lane.b32.xlu1 %v2957_v54, %s5034_s14  ;;  %v4531_v33 = vpop.f32.mrb[65].mxu1 }
0x13fc   :  { %v2968_v56 = vpop.permute.xlu0 %2967 }
0x13fd   :  { %v2985_v50 = vsel %vm303_vm3, %v5908_v3, %v2968_v56 }
0x13fe   :  { %4540 = vmatprep.mubr.msk.f32.mxu0 %vm180_vm1, %v2985_v50 }
0x1400   :  { %v2970_v26 = vpop.permute.xlu1 %2969 }
0x1401   :  { %v2986_v61 = vsel %vm303_vm3, %v5910_v5, %v2970_v26 }
0x1402   :  { %4541 = vmatmul.mubr.msk.f32.vlgmr.msra.gmra.mrb[66].mxu0 %vm180_vm1, %v2986_v61 }
0x1404   :  { %v2972_v16 = vpop.permute.xlu0 %2971 }
0x1405   :  { %v2987_v7 = vsel %vm303_vm3, %v5912_v6, %v2972_v16  ;;  %v2999_v6 = vrot.slane %v5707_v11, %v1302_v27 }
0x1406   :  { %4543 = vmatprep.mubr.msk.f32.mxu0 %vm180_vm1, %v2987_v7 }
0x1407   :  { %v2974_v20 = vpop.permute.xlu1 %2973 }
0x1408   :  { %v2988_v4 = vsel %vm303_vm3, %v5915_v41, %v2974_v20 }
0x1409   :  { %4544 = vmatmul.mubr.msk.f32.gmra.mrb[68].mxu0 %vm180_vm1, %v2988_v4 }
0x140b   :  { %v2976_v3 = vpop.permute.xlu0 %2975 }
0x140c   :  { %v2989_v40 = vsel %vm303_vm3, %v5919_v36, %v2976_v3 }
0x140d   :  { %4546 = vmatprep.mubr.msk.f32.mxu0 %vm180_vm1, %v2989_v40 }
0x140f   :  { %v2978_v5 = vpop.permute.xlu1 %2977 }
0x1410   :  { %v2990_v49 = vsel %vm303_vm3, %v5922_v14, %v2978_v5 }
0x1411   :  { %4547 = vmatmul.mubr.msk.f32.gmra.mrb[70].mxu0 %vm180_vm1, %v2990_v49 }
0x14d5   :  { %v4542_v62 = vpop.f32.mrb[66].mxu0 }
0x14d6   :  { %v3090_v41 = vadd.f32 %v4542_v62, %v2999_v6  ;;  %v3084_v30 = vpop.f32.mrb[67].mxu0  ;;  %v3955_v62 = vld [vmem:[%s6261_s7 + $0x28] sm:$0xff] }
0x14d7   :  { %v3085_v60 = vadd.f32 %v3084_v30, %v2999_v6  ;;  %v3956_v30 = vld [vmem:[%s6261_s7 + $0x30] sm:$0xff] }
0x14d8   :  { %v3114_v38 = vadd.f32 %v3090_v41, %v5676_v58 }
0x14d9   :  { %v3113_v36 = vadd.f32 %v3085_v60, %v5674_v0  ;;  %v3957_v60 = vld [vmem:[%s6261_s7 + $0x38] sm:$0xff] }
0x14da   :  { %v3122_v9 = vsel %vm180_vm1, %v3114_v38, 0.0 }
0x14db   :  { %3123 = vadd.xlane.f32.xlu1 %v3122_v9  ;;  %v3119_v53 = vsel %vm180_vm1, %v3113_v36, 0.0  ;;  %v3965_v9 = vld [vmem:[%s6262_s8 + $0x48] sm:$0xff] }
0x14dc   :  { %3120 = vadd.xlane.f32.xlu0 %v3119_v53  ;;  %v4545_v14 = vpop.f32.mrb[68].mxu0  ;;  %v3966_v53 = vld [vmem:[%s6262_s8 + $0x50] sm:$0xff] }
0x14dd   :  { %v3094_v47 = vpop.f32.mrb[69].mxu0  ;;  %v3100_v10 = vadd.f32 %v4545_v14, %v2999_v6 }
0x14de   :  { %v3095_v52 = vadd.f32 %v3094_v47, %v2999_v6  ;;  %v3967_v47 = vld [vmem:[%s6262_s8 + $0x58] sm:$0xff] }
0x14df   :  { %v3116_v11 = vadd.f32 %v3100_v10, %v5687_v37  ;;  %v4737_v10 = vpack.c.bf16 %v3967_v47, %v3966_v53 }
0x14e0   :  { %v3115_v27 = vadd.f32 %v3095_v52, %v5684_v25  ;;  %v3968_v52 = vld [vmem:[%s6262_s8 + $0x60] sm:$0xff] }
0x14e1   :  { %v3128_v39 = vsel %vm180_vm1, %v3116_v11, 0.0 }
0x14e2   :  { %v3125_v59 = vsel %vm180_vm1, %v3115_v27, 0.0 }
0x14e3   :  { %3126 = vadd.xlane.f32.xlu0 %v3125_v59 }
0x14e4   :  { %v4548_v58 = vpop.f32.mrb[70].mxu0 }
0x14e5   :  { %v3110_v8 = vadd.f32 %v4548_v58, %v2999_v6  ;;  %v3104_v0 = vpop.f32.mrb[71].mxu0 }
0x14e6   :  { %v3105_v22 = vadd.f32 %v3104_v0, %v2999_v6  ;;  %v3954_v6 = vld [vmem:[%s6261_s7 + $0x20] sm:$0xff] }
0x14e7   :  { %v3118_v63 = vadd.f32 %v3110_v8, %v5696_v46  ;;  %3129 = vadd.xlane.f32.xlu0 %v3128_v39  ;;  %v4725_v41 = vpack.c.bf16 %v3955_v62, %v3954_v6 }
0x14e8   :  { %v3117_v51 = vadd.f32 %v3105_v22, %v5694_v13 }
0x14e9   :  { %v3134_v1 = vsel %vm180_vm1, %v3118_v63, 0.0  ;;  %4726 = vmatprep.subr.bf16.mxu1 %v4725_v41 }
0x14ea   :  { %v3131_v25 = vsel %vm180_vm1, %v3117_v51, 0.0  ;;  %4728 = vmatpush3.bf16.msra.mxu1 %v4725_v41 }
0x14eb   :  { %3135 = vadd.xlane.f32.xlu0 %v3134_v1  ;;  %3132 = vadd.xlane.f32.xlu1 %v3131_v25 }
0x1568   :  { %v3124_v37 = vpop.xlane.xlu1 %3123 }
0x1569   :  { %v3138_v34 = vmul.f32 0.03125, %v3124_v37  ;;  %v3121_v57 = vpop.xlane.xlu0 %3120 }
0x156a   :  { %v3137_v15 = vmul.f32 0.03125, %v3121_v57 }
0x156b   :  { %v6013_v19 = vsub.f32 %v3114_v38, %v3138_v34  ;;  %v4729_v38 = vpack.c.bf16 %v3957_v60, %v3956_v30  ;;  %v6077_v34 = vld [vmem:[%s6263_s9 + $0x8] sm:$0xff] }
0x156c   :  { %v6015_v21 = vsub.f32 %v3113_v36, %v3137_v15  ;;  %v3964_v36 = vld [vmem:[%s6262_s8 + $0x40] sm:$0xff]  ;;  %v3200_v57 = vrot.slane %v6077_v34, %v1504_v17 }
0x156d   :  { %v3150_v46 = vmul.f32 %v6013_v19, %v6013_v19  ;;  %4730 = vmatprep.subr.bf16.mxu1 %v4729_v38  ;;  %v4733_v14 = vpack.c.bf16 %v3965_v9, %v3964_v36  ;;  %v3225_v36 = vrot.slane %v6077_v34, %v1528_v44 }
0x156e   :  { %v3149_v13 = vmul.f32 %v6015_v21, %v6015_v21  ;;  %4732 = vmatpush3.bf16.msra.mxu1 %v4729_v38 }
0x156f   :  { %v3158_v24 = vsel %vm180_vm1, %v3150_v46, 0.0  ;;  %4749 = vmatprep.subr.bf16.mxu1 %v5026_v35  ;;  %4734 = vmatprep.subr.bf16.mxu0 %v4733_v14 }
0x1570   :  { %3159 = vadd.xlane.f32.xlu0 %v3158_v24  ;;  %v3127_v18 = vpop.xlane.xlu0 %3126  ;;  %v3155_v12 = vsel %vm180_vm1, %v3149_v13, 0.0  ;;  %4736 = vmatpush3.bf16.msra.mxu0 %v4733_v14  ;;  %v3210_v24 = vrot.slane %v6077_v34, %v1514_v28 }
0x1571   :  { %v3139_v31 = vmul.f32 0.03125, %v3127_v18  ;;  %3156 = vadd.xlane.f32.xlu1 %v3155_v12  ;;  %4738 = vmatprep.subr.bf16.mxu0 %v4737_v10 }
0x1573   :  { %v6023_v23 = vsub.f32 %v3115_v27, %v3139_v31  ;;  %v3969_v27 = vld [vmem:[%s6262_s8 + $0x68] sm:$0xff] }
0x1574   :  { %v3130_v55 = vpop.xlane.xlu0 %3129  ;;  %4740 = vmatpush3.bf16.msra.mxu0 %v4737_v10 }
0x1575   :  { %v3140_v29 = vmul.f32 0.03125, %v3130_v55  ;;  %v3151_v48 = vmul.f32 %v6023_v23, %v6023_v23 }
0x1577   :  { %v6027_v54 = vsub.f32 %v3116_v11, %v3140_v29  ;;  %v3161_v33 = vsel %vm180_vm1, %v3151_v48, 0.0  ;;  %v4741_v11 = vpack.c.bf16 %v3969_v27, %v3968_v52 }
0x1578   :  { %v3136_v56 = vpop.xlane.xlu0 %3135  ;;  %3162 = vadd.xlane.f32.xlu1 %v3161_v33  ;;  %v3133_v50 = vpop.xlane.xlu1 %3132 }
0x1579   :  { %v3142_v26 = vmul.f32 0.03125, %v3136_v56  ;;  %v3141_v61 = vmul.f32 0.03125, %v3133_v50  ;;  %v3152_v16 = vmul.f32 %v6027_v54, %v6027_v54  ;;  %4742 = vmatprep.subr.bf16.mxu0 %v4741_v11 }
0x157a   :  { %4744 = vmatpush3.bf16.msra.mxu0 %v4741_v11 }
0x157b   :  { %v6032_v7 = vsub.f32 %v3118_v63, %v3142_v26  ;;  %v6034_v20 = vsub.f32 %v3117_v51, %v3141_v61  ;;  %v3164_v4 = vsel %vm180_vm1, %v3152_v16, 0.0 }
0x157c   :  { %3165 = vadd.xlane.f32.xlu0 %v3164_v4 }
0x157d   :  { %v3154_v3 = vmul.f32 %v6032_v7, %v6032_v7  ;;  %v3153_v40 = vmul.f32 %v6034_v20, %v6034_v20 }
0x157f   :  { %v3170_v5 = vsel %vm180_vm1, %v3154_v3, 0.0  ;;  %v3167_v49 = vsel %vm180_vm1, %v3153_v40, 0.0 }
0x1580   :  { %3171 = vadd.xlane.f32.xlu0 %v3170_v5  ;;  %3168 = vadd.xlane.f32.xlu1 %v3167_v49 }
0x15fd   :  { %v3160_v59 = vpop.xlane.xlu0 %3159 }
0x15fe   :  { %v3174_v58 = vmul.f32 0.03125, %v3160_v59  ;;  %v3157_v8 = vpop.xlane.xlu1 %3156 }
0x15ff   :  { %v3173_v0 = vmul.f32 0.03125, %v3157_v8 }
0x1600   :  { %v3180_v22 = vadd.f32 1e-05, %v3174_v58 }
0x1601   :  { %v3179_v39 = vadd.f32 1e-05, %v3173_v0 }
0x1602   :  { %4974 = vrsqrt.f32 %v3180_v22 }
0x1603   :  { %4976 = vrsqrt.f32 %v3179_v39 }
0x1605   :  { %v3163_v63 = vpop.xlane.xlu1 %3162 }
0x1606   :  { %v3175_v51 = vmul.f32 0.03125, %v3163_v63 }
0x1608   :  { %v3181_v1 = vadd.f32 1e-05, %v3175_v51 }
0x1609   :  { %v3166_v25 = vpop.xlane.xlu0 %3165 }
0x160a   :  { %4978 = vrsqrt.f32 %v3181_v1  ;;  %v3176_v37 = vmul.f32 0.03125, %v3166_v25  ;;  %v5035_v25 = vmov 0  }
0x160b   :  { %4852 = vset.pattern.permute.xlu1 %v5035_v25  ;;  %4853 = vset.pattern.permute.xlu0 %v5035_v25  ;;  %v3579_v25 = vld [vmem:[%s6257_s3 + $0x20] sm:$0xff] }
0x160c   :  { %v4975_v15 = vpop.eup %4974  ;;  %v3182_v46 = vadd.f32 1e-05, %v3176_v37  ;;  %v3357_v37 = vrot.slane %v6077_v34, %v1659_v42 }
0x160d   :  { %v4977_v13 = vpop.eup %4976  ;;  %v3192_v18 = vmul.f32 %v4975_v15, %v6013_v19  ;;  %v3172_v12 = vpop.xlane.xlu0 %3171 }
0x160e   :  { %v3169_v31 = vpop.xlane.xlu1 %3168  ;;  %4980 = vrsqrt.f32 %v3182_v46  ;;  %v3178_v55 = vmul.f32 0.03125, %v3172_v12  ;;  %v3191_v48 = vmul.f32 %v4977_v13, %v6015_v21 }
0x160f   :  { %v3177_v29 = vmul.f32 0.03125, %v3169_v31  ;;  %v3202_v33 = vmul.f32 %v3200_v57, %v3192_v18 }
0x1610   :  { %v3184_v56 = vadd.f32 1e-05, %v3178_v55  ;;  %v3201_v17 = vmul.f32 %v3200_v57, %v3191_v48 }
0x1611   :  { %v3183_v50 = vadd.f32 1e-05, %v3177_v29  ;;  %v6089_v61 = vadd.f32 %v3210_v24, %v3202_v33 }
0x1612   :  { %4982 = vrsqrt.f32 %v3184_v56  ;;  %v6087_v26 = vadd.f32 %v3210_v24, %v3201_v17 }
0x1613   :  { %4984 = vrsqrt.f32 %v3183_v50 }
0x1614   :  { %v4979_v28 = vpop.eup %4978  ;;  %4557 = vmatprep.mubr.msk.f32.mxu1 %vm180_vm1, %v6087_v26 }
0x1615   :  { %4558 = vmatmul.mubr.msk.f32.vlgmr.msra.gmra.mrb[66].mxu1 %vm180_vm1, %v6089_v61  ;;  %v3193_v19 = vmul.f32 %v4979_v28, %v6023_v23 }
0x1617   :  { %v3203_v21 = vmul.f32 %v3200_v57, %v3193_v19 }
0x1618   :  { %v4981_v16 = vpop.eup %4980 }
0x1619   :  { %v6096_v4 = vadd.f32 %v3210_v24, %v3203_v21  ;;  %v3194_v3 = vmul.f32 %v4981_v16, %v6027_v54  ;;  %v3970_v54 = vld [vmem:[%s6262_s8 + $0x70] sm:$0xff] }
0x161b   :  { %4560 = vmatprep.mubr.msk.f32.mxu1 %vm180_vm1, %v6096_v4  ;;  %v3204_v40 = vmul.f32 %v3200_v57, %v3194_v3 }
0x161c   :  { %v4983_v5 = vpop.eup %4982 }
0x161d   :  { %v4985_v49 = vpop.eup %4984  ;;  %v3214_v6 = vadd.f32 %v3210_v24, %v3204_v40  ;;  %v3196_v62 = vmul.f32 %v4983_v5, %v6032_v7  ;;  %v3971_v7 = vld [vmem:[%s6262_s8 + $0x78] sm:$0xff] }
0x161e   :  { %v3195_v41 = vmul.f32 %v4985_v49, %v6034_v20  ;;  %v4745_v20 = vpack.c.bf16 %v3971_v7, %v3970_v54 }
0x161f   :  { %4561 = vmatmul.mubr.msk.f32.gmra.mrb[68].mxu1 %vm180_vm1, %v3214_v6  ;;  %v3206_v23 = vmul.f32 %v3200_v57, %v3196_v62 }
0x1620   :  { %v3205_v30 = vmul.f32 %v3200_v57, %v3195_v41  ;;  %4746 = vmatprep.subr.bf16.mxu0 %v4745_v20 }
0x1621   :  { %v6104_v60 = vadd.f32 %v3210_v24, %v3206_v23  ;;  %4748 = vmatpush3.bf16.msra.mxu0 %v4745_v20 }
0x1622   :  { %v3215_v38 = vadd.f32 %v3210_v24, %v3205_v30 }
0x1624   :  { %4563 = vmatprep.mubr.msk.f32.mxu1 %vm180_vm1, %v3215_v38 }
0x1625   :  { %4564 = vmatmul.mubr.msk.f32.gmra.mrb[70].mxu1 %vm180_vm1, %v6104_v60 }
0x1626   :  { %4599 = vmatprep.mubr.msk.f32.mxu1 %vm5028_vm2, %v5029_v45 }
0x16e8   :  { %v4559_v9 = vpop.f32.mrb[66].mxu1 }
0x16e9   :  { %v3316_v53 = vadd.f32 %v4559_v9, %v3225_v36  ;;  %v3310_v14 = vpop.f32.mrb[67].mxu1 }
0x16ea   :  { %v3311_v47 = vadd.f32 %v3310_v14, %v3225_v36 }
0x16eb   :  { %v3340_v52 = vmax.f32 %v3316_v53, 0.0 }
0x16ec   :  { %v3339_v10 = vmax.f32 %v3311_v47, 0.0 }
0x16ee   :  { %4582 = vmatprep.mubr.msk.f32.mxu0 %vm1661_vm6, %v3339_v10 }
0x16ef   :  { %4583 = vmatmul.mubr.msk.f32.vlgmr.msra.gmra.mrb[72].mxu0 %vm1661_vm6, %v3340_v52 }
0x16f2   :  { %v4562_v27 = vpop.f32.mrb[68].mxu1 }
0x16f3   :  { %v3326_v11 = vadd.f32 %v4562_v27, %v3225_v36  ;;  %v3320_v59 = vpop.f32.mrb[69].mxu1 }
0x16f4   :  { %v3321_v58 = vadd.f32 %v3320_v59, %v3225_v36 }
0x16f5   :  { %v3342_v0 = vmax.f32 %v3326_v11, 0.0 }
0x16f6   :  { %v3341_v8 = vmax.f32 %v3321_v58, 0.0 }
0x16f8   :  { %v4565_v22 = vpop.f32.mrb[70].mxu1  ;;  %4585 = vmatprep.mubr.msk.f32.mxu0 %vm1661_vm6, %v3341_v8 }
0x16f9   :  { %v3336_v44 = vadd.f32 %v4565_v22, %v3225_v36  ;;  %v3330_v39 = vpop.f32.mrb[71].mxu1  ;;  %4586 = vmatmul.mubr.msk.f32.gmra.mrb[74].mxu0 %vm1661_vm6, %v3342_v0 }
0x16fa   :  { %v3331_v63 = vadd.f32 %v3330_v39, %v3225_v36 }
0x16fb   :  { %v3344_v1 = vmax.f32 %v3336_v44, 0.0 }
0x16fc   :  { %v3343_v51 = vmax.f32 %v3331_v63, 0.0 }
0x16fe   :  { %4588 = vmatprep.mubr.msk.f32.mxu0 %vm1661_vm6, %v3343_v51 }
0x16ff   :  { %4589 = vmatmul.mubr.msk.f32.gmra.mrb[76].mxu0 %vm1661_vm6, %v3344_v1  ;;  %v3578_v1 = vld [vmem:[%s6257_s3 + $0x18] sm:$0xff] }
0x17c2   :  { %v4584_v57 = vpop.f32.mrb[72].mxu0 }
0x17c3   :  { %v3448_v15 = vadd.f32 %v4584_v57, %v3357_v37  ;;  %v3442_v46 = vpop.f32.mrb[73].mxu0  ;;  %v3580_v57 = vld [vmem:[%s6257_s3 + $0x28] sm:$0xff] }
0x17c4   :  { %v3443_v13 = vadd.f32 %v3442_v46, %v3357_v37  ;;  %v3639_v46 = vld [vmem:[%s6264_s10] sm:$0xff] }
0x17c5   :  { %v3472_v24 = vadd.f32 %v3448_v15, %v6089_v61  ;;  %v3576_v15 = vld [vmem:[%s6257_s3 + $0x8] sm:$0xff] }
0x17c6   :  { %v3471_v18 = vadd.f32 %v3443_v13, %v6087_v26  ;;  %v3640_v13 = vld [vmem:[%s6264_s10 + $0x8] sm:$0xff] }
0x17c7   :  { %v3480_v12 = vsel %vm180_vm1, %v3472_v24, 0.0 }
0x17c8   :  { %3481 = vadd.xlane.f32.xlu0 %v3480_v12  ;;  %v3477_v31 = vsel %vm180_vm1, %v3471_v18, 0.0  ;;  %v3642_v12 = vld [vmem:[%s6264_s10 + $0x18] sm:$0xff] }
0x17c9   :  { %3478 = vadd.xlane.f32.xlu1 %v3477_v31 }
0x17cc   :  { %v4587_v55 = vpop.f32.mrb[74].mxu0 }
0x17cd   :  { %v3458_v29 = vadd.f32 %v4587_v55, %v3357_v37  ;;  %v3452_v48 = vpop.f32.mrb[75].mxu0 }
0x17ce   :  { %v3453_v33 = vadd.f32 %v3452_v48, %v3357_v37 }
0x17cf   :  { %v3474_v56 = vadd.f32 %v3458_v29, %v3214_v6 }
0x17d0   :  { %v3473_v42 = vadd.f32 %v3453_v33, %v6096_v4  ;;  %v3575_v4 = vld [vmem:[%s6257_s3] sm:$0xff] }
0x17d1   :  { %v3486_v50 = vsel %vm180_vm1, %v3474_v56, 0.0 }
0x17d2   :  { %v4590_v17 = vpop.f32.mrb[76].mxu0  ;;  %3487 = vadd.xlane.f32.xlu1 %v3486_v50  ;;  %v3483_v19 = vsel %vm180_vm1, %v3473_v42, 0.0 }
0x17d3   :  { %v3462_v61 = vpop.f32.mrb[77].mxu0  ;;  %v3468_v28 = vadd.f32 %v4590_v17, %v3357_v37 }
0x17d4   :  { %v3463_v26 = vadd.f32 %v3462_v61, %v3357_v37  ;;  %v3577_v37 = vld [vmem:[%s6257_s3 + $0x10] sm:$0xff] }
0x17d5   :  { %v3476_v16 = vadd.f32 %v3468_v28, %v6104_v60 }
0x17d6   :  { %v3475_v21 = vadd.f32 %v3463_v26, %v3215_v38  ;;  %3484 = vadd.xlane.f32.xlu1 %v3483_v19 }
0x17d7   :  { %v3492_v40 = vsel %vm180_vm1, %v3476_v16, 0.0 }
0x17d8   :  { %v3489_v3 = vsel %vm180_vm1, %v3475_v21, 0.0 }
0x17d9   :  { %3490 = vadd.xlane.f32.xlu0 %v3489_v3  ;;  %v3558_v3 = vrot.slane %v6077_v34, %v1861_v43 }
0x17dd   :  { %3493 = vadd.xlane.f32.xlu0 %v3492_v40 }
0x17e7   :  { %3583 = vperm.xlu1 %4852, %v3575_v4  }
0x1855   :  { %v3482_v5 = vpop.xlane.xlu0 %3481 }
0x1856   :  { %v3496_v49 = vmul.f32 0.03125, %v3482_v5  ;;  %v3479_v6 = vpop.xlane.xlu1 %3478 }
0x1857   :  { %v3495_v62 = vmul.f32 0.03125, %v3479_v6 }
0x1858   :  { %v6142_v41 = vsub.f32 %v3472_v24, %v3496_v49  ;;  %v4750_v24 = vpack.c.bf16 %v3640_v13, %v3639_v46 }
0x1859   :  { %v6144_v23 = vsub.f32 %v3471_v18, %v3495_v62  ;;  %v3641_v18 = vld [vmem:[%s6264_s10 + $0x10] sm:$0xff]  ;;  %v3568_v62 = vrot.slane %v6077_v34, %v1871_v2 }
0x185a   :  { %v3508_v30 = vmul.f32 %v6142_v41, %v6142_v41  ;;  %4751 = vmatpush3.bf16.msra.mxu1 %v4750_v24  ;;  %v4753_v31 = vpack.c.bf16 %v3642_v12, %v3641_v18 }
0x185b   :  { %v3507_v60 = vmul.f32 %v6144_v23, %v6144_v23  ;;  %4752 = vmatprep.subr.bf16.mxu1 %v5026_v35 }
0x185c   :  { %v3516_v38 = vsel %vm180_vm1, %v3508_v30, 0.0 }
0x185d   :  { %3517 = vadd.xlane.f32.xlu0 %v3516_v38  ;;  %v3513_v54 = vsel %vm180_vm1, %v3507_v60, 0.0 }
0x185e   :  { %3514 = vadd.xlane.f32.xlu1 %v3513_v54  ;;  %4754 = vmatpush3.bf16.msra.mxu1 %v4753_v31 }
0x185f   :  { %v3488_v7 = vpop.xlane.xlu1 %3487  ;;  %4755 = vmatprep.subr.bf16.mxu1 %v5026_v35 }
0x1860   :  { %v3498_v20 = vmul.f32 0.03125, %v3488_v7 }
0x1862   :  { %v6152_v36 = vsub.f32 %v3474_v56, %v3498_v20 }
0x1863   :  { %v3485_v9 = vpop.xlane.xlu1 %3484 }
0x1864   :  { %v3497_v53 = vmul.f32 0.03125, %v3485_v9  ;;  %v3510_v14 = vmul.f32 %v6152_v36, %v6152_v36 }
0x1866   :  { %v6156_v47 = vsub.f32 %v3473_v42, %v3497_v53  ;;  %v3491_v10 = vpop.xlane.xlu0 %3490  ;;  %v3522_v52 = vsel %vm180_vm1, %v3510_v14, 0.0 }
0x1867   :  { %3523 = vadd.xlane.f32.xlu1 %v3522_v52  ;;  %v3499_v11 = vmul.f32 0.03125, %v3491_v10  ;;  %v3584_v55 = vpop.permute.xlu1 %3583 }
0x1868   :  { %v3509_v27 = vmul.f32 %v6156_v47, %v6156_v47 }
0x1869   :  { %v6162_v0 = vsub.f32 %v3475_v21, %v3499_v11 }
0x186a   :  { %v3494_v59 = vpop.xlane.xlu0 %3493  ;;  %v3519_v58 = vsel %vm180_vm1, %v3509_v27, 0.0 }
0x186b   :  { %v3500_v8 = vmul.f32 0.03125, %v3494_v59  ;;  %3520 = vadd.xlane.f32.xlu1 %v3519_v58  ;;  %v3511_v63 = vmul.f32 %v6162_v0, %v6162_v0 }
0x186d   :  { %v6164_v22 = vsub.f32 %v3476_v16, %v3500_v8  ;;  %v3525_v51 = vsel %vm180_vm1, %v3511_v63, 0.0 }
0x186f   :  { %v3512_v44 = vmul.f32 %v6164_v22, %v6164_v22 }
0x1871   :  { %v3528_v39 = vsel %vm180_vm1, %v3512_v44, 0.0 }
0x1872   :  { %3529 = vadd.xlane.f32.xlu0 %v3528_v39 }
0x1876   :  { %3526 = vadd.xlane.f32.xlu0 %v3525_v51 }
0x187c   :  { %3598 = vperm.xlu1 %4852, %v3578_v1  }
0x1880   :  { %3603 = vperm.xlu1 %4852, %v3579_v25  }
0x1884   :  { %3593 = vperm.xlu1 %4852, %v3577_v37  }
0x1888   :  { %3608 = vperm.xlu1 %4852, %v3580_v57  }
0x188c   :  { %3588 = vperm.xlu0 %4853, %v3576_v15  }
0x18ea   :  { %v3518_v29 = vpop.xlane.xlu0 %3517 }
0x18eb   :  { %v3515_v48 = vpop.xlane.xlu1 %3514  ;;  %v3532_v56 = vmul.f32 0.03125, %v3518_v29 }
0x18ec   :  { %v3531_v33 = vmul.f32 0.03125, %v3515_v48 }
0x18ed   :  { %v3538_v50 = vadd.f32 1e-05, %v3532_v56 }
0x18ee   :  { %v3537_v42 = vadd.f32 1e-05, %v3531_v33 }
0x18f0   :  { %4986 = vrsqrt.f32 %v3537_v42 }
0x18f1   :  { %4988 = vrsqrt.f32 %v3538_v50 }
0x18f4   :  { %v3524_v17 = vpop.xlane.xlu1 %3523 }
0x18f5   :  { %v3534_v61 = vmul.f32 0.03125, %v3524_v17 }
0x18f7   :  { %v3540_v19 = vadd.f32 1e-05, %v3534_v61 }
0x18f8   :  { %v3521_v28 = vpop.xlane.xlu1 %3520 }
0x18f9   :  { %v3533_v26 = vmul.f32 0.03125, %v3521_v28 }
0x18fa   :  { %v4987_v21 = vpop.eup %4986 }
0x18fb   :  { %v3539_v16 = vadd.f32 1e-05, %v3533_v26  ;;  %v3549_v40 = vmul.f32 %v4987_v21, %v6144_v23  ;;  %v4989_v4 = vpop.eup %4988 }
0x18fc   :  { %v3599_v6 = vpop.permute.xlu1 %3598  ;;  %v3550_v60 = vmul.f32 %v4989_v4, %v6142_v41 }
0x18fd   :  { %4990 = vrsqrt.f32 %v3539_v16  ;;  %v3559_v38 = vmul.f32 %v3558_v3, %v3549_v40  ;;  %v3980_v16 = vld [vmem:[%s6264_s10 + $0x20] sm:$0xff] }
0x18fe   :  { %4992 = vrsqrt.f32 %v3540_v19  ;;  %v3560_v9 = vmul.f32 %v3558_v3, %v3550_v60 }
0x18ff   :  { %v3530_v5 = vpop.xlane.xlu0 %3529  ;;  %v3569_v43 = vadd.f32 %v3568_v62, %v3559_v38  ;;  %v3978_v38 = vld [vmem:[%s6265_s11] ss:$0 sm:$0xff] }
0x1900   :  { %v3536_v49 = vmul.f32 0.03125, %v3530_v5  ;;  %v3604_v23 = vpop.permute.xlu1 %3603  ;;  %v3570_v32 = vadd.f32 %v3568_v62, %v3560_v9 }
0x1901   :  { %v3611_v27 = vmul.f32 %v3584_v55, %v3569_v43 }
0x1902   :  { %v3542_v30 = vadd.f32 1e-05, %v3536_v49 }
0x1903   :  { %v3527_v54 = vpop.xlane.xlu0 %3526  ;;  %v3617_v44 = vsel %vm180_vm1, %v3611_v27, 0.0 }
0x1904   :  { %4994 = vrsqrt.f32 %v3542_v30  ;;  %v3535_v7 = vmul.f32 0.03125, %v3527_v54  ;;  %v3594_v59 = vpop.permute.xlu1 %3593  ;;  %v3983_v30 = vld [vmem:[%s6264_s10 + $0x38] sm:$0xff] }
0x1906   :  { %v3541_v20 = vadd.f32 1e-05, %v3535_v7 }
0x1907   :  { %v4991_v53 = vpop.eup %4990 }
0x1908   :  { %v4993_v14 = vpop.eup %4992  ;;  %4996 = vrsqrt.f32 %v3541_v20  ;;  %v3551_v10 = vmul.f32 %v4991_v53, %v6156_v47  ;;  %v3609_v31 = vpop.permute.xlu1 %3608 }
0x1909   :  { %v3552_v2 = vmul.f32 %v4993_v14, %v6152_v36 }
0x190a   :  { %v3561_v52 = vmul.f32 %v3558_v3, %v3551_v10 }
0x190b   :  { %v3589_v34 = vpop.permute.xlu0 %3588  ;;  %v3562_v63 = vmul.f32 %v3558_v3, %v3552_v2 }
0x190c   :  { %v3571_v41 = vadd.f32 %v3568_v62, %v3561_v52  ;;  %v3612_v11 = vmul.f32 %v3589_v34, %v3570_v32 }
0x190d   :  { %v3572_v36 = vadd.f32 %v3568_v62, %v3562_v63 }
0x190e   :  { %v4995_v58 = vpop.eup %4994  ;;  %v3613_v8 = vmul.f32 %v3594_v59, %v3571_v41  ;;  %v3618_v39 = vsel %vm180_vm1, %v3612_v11, 0.0 }
0x190f   :  { %v3554_v51 = vmul.f32 %v4995_v58, %v6164_v22  ;;  %v3619_v1 = vadd.f32 %v3618_v39, %v3617_v44  ;;  %v3614_v18 = vmul.f32 %v3599_v6, %v3572_v36 }
0x1910   :  { %v3620_v47 = vsel %vm180_vm1, %v3613_v8, 0.0 }
0x1911   :  { %v3564_v25 = vmul.f32 %v3558_v3, %v3554_v51  ;;  %v3621_v57 = vadd.f32 %v3620_v47, %v3619_v1  ;;  %v3628_v22 = vsel %vm180_vm1, %v3614_v18, 0.0 }
0x1912   :  { %v4997_v37 = vpop.eup %4996 }
0x1913   :  { %v3553_v15 = vmul.f32 %v4997_v37, %v6162_v0  ;;  %v3574_v13 = vadd.f32 %v3568_v62, %v3564_v25  ;;  %v3622_v24 = vrot.slane %v3621_v57, 4 }
0x1915   :  { %v3563_v46 = vmul.f32 %v3558_v3, %v3553_v15  ;;  %v3616_v29 = vmul.f32 %v3609_v31, %v3574_v13  ;;  %v3623_v48 = vadd.f32 %v3622_v24, %v3621_v57  ;;  %v3981_v3 = vld [vmem:[%s6264_s10 + $0x28] sm:$0xff] }
0x1916   :  { %v4756_v49 = vpack.c.bf16 %v3981_v3, %v3980_v16 }
0x1917   :  { %v3573_v12 = vadd.f32 %v3568_v62, %v3563_v46  ;;  %v3631_v42 = vsel %vm180_vm1, %v3616_v29, 0.0  ;;  %v3624_v17 = vrot.slane %v3623_v48, 2  ;;  %v3982_v62 = vld [vmem:[%s6264_s10 + $0x30] sm:$0xff]  ;;  %s5002_s10 = scalar_lea.vmem %s3822_s4, 32 }
0x1918   :  { %v4759_v60 = vpack.c.bf16 %v3983_v30, %v3982_v62  ;;  %p5003_p0 = scmp.ne.s32.totalorder %s3822_s4, %s5002_s10  ;;  %p5008_p2 = scmp.lt.s32.totalorder %s5002_s10, %s5002_s10 }
0x1919   :  { %v3615_v55 = vmul.f32 %v3604_v23, %v3573_v12  ;;  %v3625_v28 = vadd.f32 %v3624_v17, %v3623_v48 }
0x191a   :  { %p5009_p3 = por %p5008_p2, %p5007_p1 }
0x191b   :  { %v3629_v33 = vsel %vm180_vm1, %v3615_v55, 0.0  ;;  %v3626_v21 = vrot.slane %v3625_v28, 1 }
0x191c   :  { %v3630_v56 = vadd.f32 %v3629_v33, %v3628_v22  ;;  %p5010_p4 = pnand %p5009_p3, %p5003_p0 }
0x191d   :  { %v3627_v5 = vadd.f32 %v3626_v21, %v3625_v28 }
0x191e   :  { %v3632_v50 = vadd.f32 %v3631_v42, %v3630_v56 }
0x1920   :  { %v3633_v61 = vrot.slane %v3632_v50, 4 }
0x1922   :  { %v3634_v0 = vadd.f32 %v3633_v61, %v3632_v50 }
0x1924   :  { %v3635_v26 = vrot.slane %v3634_v0, 2 }
0x1926   :  { %v3636_v19 = vadd.f32 %v3635_v26, %v3634_v0 }
0x1928   :  { %v3637_v40 = vrot.slane %v3636_v19, 1 }
0x192a   :  { %v3638_v4 = vadd.f32 %v3637_v40, %v3636_v19 }
0x192c   :  { %v3653_v6 = vsel %vm3652_vm7, %v3638_v4, %v3627_v5 }
0x192d   :  { %4600 = vmatmul.mubr.msk.f32.vlgmr.msra.gmra.mrb[72].mxu1 %vm180_vm1, %v3653_v6 }
0x192e   :  { %4757 = vmatpush3.bf16.msra.mxu1 %v4756_v49  ;;  %4610 = vmatprep.mubr.msk.f32.mxu1 %vm5028_vm2, %v5029_v45 }
0x192f   :  { %4758 = vmatprep.subr.bf16.mxu1 %v5026_v35  ;;  %v3985_v35 = vld [vmem:[%s6265_s11 + $0x1] ss:$0 sm:$0xff] }
0x1932   :  { %4760 = vmatpush3.bf16.msra.mxu1 %v4759_v60 }
0x1a00   :  { %v3722_v54 = vpop.f32.mrb[72].mxu1 }
0x1a01   :  { %v3723_v7 = vadd.f32 %v3978_v38, %v3722_v54  ;;  %v4601_v20 = vpop.f32.mrb[73].mxu1 }
0x1a03   :  { %v3726_v45 = vmax.f32 %v3723_v7, 0.0 }
0x1a05   :  { %4611 = vmatmul.mubr.msk.f32.vlgmr.msra.gmra.mrb[74].mxu1 %vm180_vm1, %v3726_v45 }
0x1ad8   :  { %v3809_v9 = vpop.f32.mrb[74].mxu1 }
0x1ad9   :  { %v3810_v43 = vadd.f32 %v3985_v35, %v3809_v9  ;;  %v4612_v53 = vpop.f32.mrb[75].mxu1 }
0x1adb   :  { %3814 = vst.msk [vmem:[#allocation2] sm:$0x3] %vm3813_vm8, %v3810_v43 }
0x1adc   :  { %5013 = shalt.err (!%p5010_p4)
}
0x1add   :  { %s5014_s1 = scalar_lea.hbm %s6266_s12, 32 }
0x1ade   :  { %p5015_p5 = scmp.ne.s32.totalorder %s6266_s12, %s5014_s1  ;;  %p5018_p6 = scmp.lt.u32.totalorder %s5014_s1, %s6266_s12 }
0x1ae0   :  { %p5020_p7 = pnand %p5018_p6, %p5015_p5 }
0x1ae2   :  { %5023 = shalt.err (!%p5020_p7)
}
0x1ae3   :  { %3824 = dma.vmem_to_hbm [thread:$0]  %s3822_s4, 32, %s6266_s12, [#allocation3]  }
0x1ae4   :  { %5024 = dma.done.wait [#allocation3], 32  }
0x1ae5   :  { %5025 = vsyncadd [#allocation3], 4294967264 }
0x1ae6   :  { %3828 = vsyncpa [#allocation3], 1 }

</bundles_post_ra>
